<compile_context>
chip_gen: v7x
topology: tpu7x:2x2x1
jax: 0.10.0
libtpu: 0.0.40
codegen_flags: <defaults>
</compile_context>

<pallas_src>
import functools

import numpy as np

import jax
import jax.numpy as jnp
from jax.experimental import pallas as pl
from jax.experimental.pallas import tpu as pltpu


# --------------------------------------------------------------------------------------
# Static geometry of the padded row-major ("flat") coordinate systems.
# --------------------------------------------------------------------------------------
def _flat_dims(H, W):
    Wp1 = W + 2
    H2, W2 = H // 2, W // 2
    Wp2 = W2 + 2
    H4, W4 = H2 // 2, W2 // 2
    return dict(
        Wp1=Wp1, H2=H2, W2=W2, Wp2=Wp2, H4=H4, W4=W4,
        P1=(H + 2) * Wp1,                       # padded-flat length of conv1 input
        P2=(H2 + 2) * Wp2,                      # padded-flat length of conv2 input
        L1=(H - 1) * Wp1 + W,                   # span covering all valid conv1 outputs
        Lp1=(H2 - 1) * 2 * Wp1 + (W2 - 1) * 2 + 1,   # span of pool1 strided bases
        L2=(H2 - 1) * Wp2 + W2,
        Lp2=(H4 - 1) * 2 * Wp2 + (W4 - 1) * 2 + 1,
        T=H4 * W4,                              # LSTM sequence length
    )


def _build_pool_repad(H, W):
    """0/1 matrix (Lp1, P2): pool1 strided-base flat coords -> zero-padded conv2 input."""
    d = _flat_dims(H, W)
    sel = np.zeros((d["Lp1"], d["P2"]), np.float32)
    for i2 in range(d["H2"]):
        for j2 in range(d["W2"]):
            m = 2 * i2 * d["Wp1"] + 2 * j2
            n = (i2 + 1) * d["Wp2"] + (j2 + 1)
            sel[m, n] = 1.0
    return sel


def _build_raster_gather(H, W):
    """0/1 matrix (Lp2, T): pool2 strided-base flat coords -> raster timestep order."""
    d = _flat_dims(H, W)
    g = np.zeros((d["Lp2"], d["T"]), np.float32)
    for i4 in range(d["H4"]):
        for j4 in range(d["W4"]):
            t = i4 * d["W4"] + j4                        # matches torch permute/reshape
            m = 2 * i4 * d["Wp2"] + 2 * j4
            g[m, t] = 1.0
    return g


def _build_time_expand(T, G4):
    """0/1 matrix (T, T*G4): lane-expands each timestep value to a 4H-wide gate block."""
    e = np.zeros((T, T * G4), np.float32)
    for t in range(T):
        e[t, t * G4:(t + 1) * G4] = 1.0
    return e


# --------------------------------------------------------------------------------------
# Kernel
# --------------------------------------------------------------------------------------
def _cnn_lstm_kernel(x_ref, w1_ref, b1_ref, sel_ref, w2_ref, b2_ref,
                     g_ref, e_ref, wih_ref, bl_ref, whh_ref,
                     wf1_ref, bf1_ref, wf2_ref, bf2_ref,
                     o_ref, *, H, W):
    """Fused CNN + LSTM + FC forward for one batch block.

    x_ref  : (B, (H+2)*(W+2))   zero-padded, row-major flattened input (Cin = 1)
    w1_ref : (C1*B, 9)          conv1 weights replicated per batch row  [c*B+b, kh*3+kw]
    b1_ref : (C1*B, 1)
    sel_ref: (Lp1, P2)          0/1 pool1-compaction + re-pad matrix
    w2_ref : (C2*B, C1*9)       conv2 weights replicated per batch row  [co*B+b, ci*9+kh*3+kw]
    b2_ref : (C2*B, 1)
    g_ref  : (Lp2, T)           0/1 raster gather matrix
    e_ref  : (T, T*4H)          0/1 timestep lane-expansion matrix
    wih_ref: (C2*B, T*4H)       W_ih^T tiled over T and replicated per batch row
    bl_ref : (1, T*4H)          (b_ih + b_hh) tiled over T
    whh_ref: (Hd, 4H)           LSTM hidden weights (transposed, gate order i,f,g,o)
    wf1_ref: (Hd, D1), bf1_ref: (1, D1)
    wf2_ref: (D1, 1),  bf2_ref: (1, 1)
    o_ref  : (B, 1)
    """
    f32 = jnp.float32
    B = x_ref.shape[0]
    C1 = w1_ref.shape[0] // B
    C2 = w2_ref.shape[0] // B
    Hd = whh_ref.shape[0]
    G4 = whh_ref.shape[1]                       # 4*Hd
    T = g_ref.shape[1]

    d = _flat_dims(H, W)
    Wp1, Wp2 = d["Wp1"], d["Wp2"]
    L1, Lp1, L2, Lp2 = d["L1"], d["Lp1"], d["L2"], d["Lp2"]

    # ---- stage 1: conv1 + ReLU + maxpool(2), output channels folded into sublanes -----
    xpf = x_ref[...]                                            # (B, P1)
    xrep = jnp.concatenate([xpf] * C1, axis=0)                  # (C1*B, P1)
    w1 = w1_ref[...]
    acc1 = jnp.zeros((C1 * B, L1), f32)
    for kh in range(3):                                         # 9 shifted slices total
        for kw in range(3):
            s = kh * Wp1 + kw
            tap = kh * 3 + kw
            acc1 = acc1 + w1[:, tap:tap + 1] * xrep[:, s:s + L1]
    a1 = jnp.maximum(acc1 + b1_ref[...], 0.0)
    p1 = jnp.maximum(
        jnp.maximum(a1[:, 0:Lp1], a1[:, 1:1 + Lp1]),
        jnp.maximum(a1[:, Wp1:Wp1 + Lp1], a1[:, Wp1 + 1:Wp1 + 1 + Lp1]))   # (C1*B, Lp1)

    # ---- stage 1.5: compact + re-pad pooled map via ONE selection matmul --------------
    a2pf = jnp.dot(p1, sel_ref[...], preferred_element_type=f32)           # (C1*B, P2)

    # ---- stage 2: conv2 + ReLU + maxpool(2), output channels folded into sublanes -----
    w2 = w2_ref[...]
    acc2 = jnp.zeros((C2 * B, L2), f32)
    for ci in range(C1):
        xi = a2pf[ci * B:(ci + 1) * B, :]                       # (B, P2)
        xi_rep = jnp.concatenate([xi] * C2, axis=0)             # (C2*B, P2)
        for kh in range(3):                                     # 36 shifted slices total
            for kw in range(3):
                s = kh * Wp2 + kw
                col = ci * 9 + kh * 3 + kw
                acc2 = acc2 + w2[:, col:col + 1] * xi_rep[:, s:s + L2]
    a2 = jnp.maximum(acc2 + b2_ref[...], 0.0)
    p2 = jnp.maximum(
        jnp.maximum(a2[:, 0:Lp2], a2[:, 1:1 + Lp2]),
        jnp.maximum(a2[:, Wp2:Wp2 + Lp2], a2[:, Wp2 + 1:Wp2 + 1 + Lp2]))   # (C2*B, Lp2)

    # ---- stage 3: raster gather + hoisted LSTM input projection, (B, T*4H) layout -----
    seq = jnp.dot(p2, g_ref[...], preferred_element_type=f32)              # (C2*B, T)
    seq_exp = jnp.dot(seq, e_ref[...], preferred_element_type=f32)         # (C2*B, T*4H)
    prod = seq_exp * wih_ref[...]                                          # (C2*B, T*4H)
    # Reduce the C2 channel groups (rows c*B+b) down to (B, T*4H): sublane tree-reduce.
    red = prod
    n_groups = C2
    while n_groups > 1 and n_groups % 2 == 0:
        half = n_groups // 2
        red = red[:half * B, :] + red[half * B:, :]
        n_groups = half
    xproj = red[:B, :]
    for grp in range(1, n_groups):
        xproj = xproj + red[grp * B:(grp + 1) * B, :]
    xproj = xproj + bl_ref[...]                                            # (B, T*4H)

    # ---- stage 4: LSTM recurrence (fully unrolled); per-step slices are 4H=128 aligned -
    whh = whh_ref[...]
    h = jnp.zeros((B, Hd), f32)
    c = jnp.zeros((B, Hd), f32)
    for t in range(T):
        g = xproj[:, t * G4:(t + 1) * G4] + jnp.dot(h, whh, preferred_element_type=f32)
        sg = jax.nn.sigmoid(g)                    # one full-width EUP pass (i, f, o gates)
        i_g = sg[:, 0:Hd]
        f_g = sg[:, Hd:2 * Hd]
        o_g = sg[:, 3 * Hd:4 * Hd]
        g_g = jnp.tanh(g[:, 2 * Hd:3 * Hd])       # tanh only on the g-gate quarter
        c = f_g * c + i_g * g_g
        h = o_g * jnp.tanh(c)

    # ---- stage 5: FC head (Dropout = identity at inference) ---------------------------
    dns = jnp.maximum(jnp.dot(h, wf1_ref[...], preferred_element_type=f32) + bf1_ref[...], 0.0)
    logit = jnp.dot(dns, wf2_ref[...], preferred_element_type=f32) + bf2_ref[...]
    o_ref[...] = jax.nn.sigmoid(logit).astype(o_ref.dtype)


# --------------------------------------------------------------------------------------
# Wrapper: constant packing + pallas_call
# --------------------------------------------------------------------------------------
def pack_params(params, *, batch_block, H, W):
    """Precompute every kernel-side constant in the wrapper (no in-kernel iota/div/mod)."""
    Bb = batch_block
    c1w, c1b = params["conv1_w"], params["conv1_b"]        # (C1,1,3,3), (C1,)
    c2w, c2b = params["conv2_w"], params["conv2_b"]        # (C2,C1,3,3), (C2,)
    wih, whh = params["lstm_w_ih"], params["lstm_w_hh"]    # (4H,C2), (4H,Hd)
    bih, bhh = params["lstm_b_ih"], params["lstm_b_hh"]    # (4H,), (4H,)
    f1w, f1b = params["fc1_w"], params["fc1_b"]            # (D1,Hd), (D1,)
    f2w, f2b = params["fc2_w"], params["fc2_b"]            # (1,D1), (1,)

    C1, C2 = c1w.shape[0], c2w.shape[0]
    G4 = wih.shape[0]
    T = _flat_dims(H, W)["T"]

    return {
        "w1col": jnp.repeat(c1w.reshape(C1, 9), Bb, axis=0),              # (C1*Bb, 9)
        "b1col": jnp.repeat(c1b.reshape(C1, 1), Bb, axis=0),              # (C1*Bb, 1)
        "sel": jnp.asarray(_build_pool_repad(H, W)),                      # (Lp1, P2)
        "w2col": jnp.repeat(c2w.reshape(C2, C1 * 9), Bb, axis=0),         # (C2*Bb, C1*9)
        "b2col": jnp.repeat(c2b.reshape(C2, 1), Bb, axis=0),              # (C2*Bb, 1)
        "gat": jnp.asarray(_build_raster_gather(H, W)),                   # (Lp2, T)
        "exp": jnp.asarray(_build_time_expand(T, G4)),                    # (T, T*4H)
        "wih_rep": jnp.repeat(jnp.tile(wih.T, (1, T)), Bb, axis=0),       # (C2*Bb, T*4H)
        "b_rep": jnp.tile((bih + bhh).reshape(1, G4), (1, T)),            # (1, T*4H)
        "whh_t": whh.T,                                                   # (Hd, 4H)
        "f1w_t": f1w.T, "f1b": f1b.reshape(1, -1),
        "f2w_t": f2w.T, "f2b": f2b.reshape(1, -1),
    }


def cnn_lstm_forward(x_nchw, packed, *, H, W, batch_block):
    B, Cin, Hx, Wx = x_nchw.shape
    assert Cin == 1 and Hx == H and Wx == W and H % 4 == 0 and W % 4 == 0
    Bb = batch_block
    assert B % Bb == 0, "batch must be divisible by the batch block"
    n_blocks = B // Bb
    Hp, Wp = H + 2, W + 2

    # Zero-pad in the wrapper (layout plumbing fused into the input copy by XLA).
    x_pad = jnp.pad(x_nchw[:, 0, :, :], ((0, 0), (1, 1), (1, 1))).reshape(B, Hp * Wp)

    consts = [packed["w1col"], packed["b1col"], packed["sel"], packed["w2col"],
              packed["b2col"], packed["gat"], packed["exp"], packed["wih_rep"],
              packed["b_rep"], packed["whh_t"], packed["f1w_t"], packed["f1b"],
              packed["f2w_t"], packed["f2b"]]
    const_specs = [pl.BlockSpec(c.shape, lambda i: (0, 0)) for c in consts]

    kern = functools.partial(_cnn_lstm_kernel, H=H, W=W)
    return pl.pallas_call(
        kern,
        out_shape=jax.ShapeDtypeStruct((B, 1), jnp.float32),
        grid=(n_blocks,),
        in_specs=[pl.BlockSpec((Bb, Hp * Wp), lambda i: (i, 0))] + const_specs,
        out_specs=pl.BlockSpec((Bb, 1), lambda i: (i, 0)),
        compiler_params=pltpu.CompilerParams(
            dimension_semantics=("parallel",)),    # both TCs on v7x when n_blocks > 1
    )(x_pad, *consts)


# --------------------------------------------------------------------------------------
# Params (torch-style layouts / init) and demo
# --------------------------------------------------------------------------------------
def init_params(key, conv1_filters, conv2_filters, lstm_units, dense_units):
    ks = jax.random.split(key, 12)

    def u(k, shape, fan_in):
        bound = 1.0 / jnp.sqrt(float(fan_in))
        return jax.random.uniform(k, shape, jnp.float32, -bound, bound)

    C1, C2, Hd, D1 = conv1_filters, conv2_filters, lstm_units, dense_units
    return {
        "conv1_w": u(ks[0], (C1, 1, 3, 3), 9), "conv1_b": u(ks[1], (C1,), 9),
        "conv2_w": u(ks[2], (C2, C1, 3, 3), C1 * 9), "conv2_b": u(ks[3], (C2,), C1 * 9),
        # torch LSTM layouts; gate order i, f, g, o
        "lstm_w_ih": u(ks[4], (4 * Hd, C2), Hd), "lstm_w_hh": u(ks[5], (4 * Hd, Hd), Hd),
        "lstm_b_ih": u(ks[6], (4 * Hd,), Hd), "lstm_b_hh": u(ks[7], (4 * Hd,), Hd),
        "fc1_w": u(ks[8], (D1, Hd), Hd), "fc1_b": u(ks[9], (D1,), Hd),
        "fc2_w": u(ks[10], (1, D1), D1), "fc2_b": u(ks[11], (1,), D1),
    }


if __name__ == "__main__":
    conv1_filters, conv2_filters = 4, 8
    lstm_units, dense_units = 32, 16
    dropout = 0.25      # nn.Dropout is identity at inference
    H = W = 16
    B = 2

    key = jax.random.PRNGKey(0)
    kx, kp = jax.random.split(key)
    x = jax.random.normal(kx, (B, 1, H, W), jnp.float32)      # NCHW like torch
    params = init_params(kp, conv1_filters, conv2_filters, lstm_units, dense_units)

    # Batch block sized for VMEM headroom when the batch scales (cap ~256 for v7x's 64 MiB).
    batch_block = min(B, 256)
    packed = pack_params(params, batch_block=batch_block, H=H, W=W)

    fwd = jax.jit(functools.partial(cnn_lstm_forward, H=H, W=W, batch_block=batch_block))
    out = fwd(x, packed)
    jax.block_until_ready(out)

    assert out.shape == (B, 1), out.shape
    assert bool(jnp.all((out > 0.0) & (out < 1.0))), "sigmoid output out of range"
    print("KERNEL_OK")
</pallas_src>

<mosaic_0001>
module attributes {stable_mosaic.version = 11 : i64} {
  func.func @_cnn_lstm_kernel(%arg0: i32, %arg1: memref<2x324xf32, #tpu.memory_space<vmem>>, %arg2: memref<8x9xf32, #tpu.memory_space<vmem>>, %arg3: memref<8x1xf32, #tpu.memory_space<vmem>>, %arg4: memref<267x100xf32, #tpu.memory_space<vmem>>, %arg5: memref<16x36xf32, #tpu.memory_space<vmem>>, %arg6: memref<16x1xf32, #tpu.memory_space<vmem>>, %arg7: memref<67x16xf32, #tpu.memory_space<vmem>>, %arg8: memref<16x2048xf32, #tpu.memory_space<vmem>>, %arg9: memref<16x2048xf32, #tpu.memory_space<vmem>>, %arg10: memref<1x2048xf32, #tpu.memory_space<vmem>>, %arg11: memref<32x128xf32, #tpu.memory_space<vmem>>, %arg12: memref<32x16xf32, #tpu.memory_space<vmem>>, %arg13: memref<1x16xf32, #tpu.memory_space<vmem>>, %arg14: memref<16x1xf32, #tpu.memory_space<vmem>>, %arg15: memref<1x1xf32, #tpu.memory_space<vmem>>, %arg16: memref<2x1xf32, #tpu.memory_space<vmem>>) attributes {dimension_semantics = [#tpu.dimension_semantics<parallel>], iteration_bounds = array<i64: 1>, scalar_prefetch = 0 : i64, scratch_operands = 0 : i64, tpu.core_type = #tpu.core_type<tc>, window_params = [{transform_indices = @transform_0, window_bounds = array<i64: 2, 324>}, {pipeline_mode = #tpu.pipeline_mode<synchronous>, transform_indices = @transform_1, window_bounds = array<i64: 8, 9>}, {pipeline_mode = #tpu.pipeline_mode<synchronous>, transform_indices = @transform_2, window_bounds = array<i64: 8, 1>}, {pipeline_mode = #tpu.pipeline_mode<synchronous>, transform_indices = @transform_3, window_bounds = array<i64: 267, 100>}, {pipeline_mode = #tpu.pipeline_mode<synchronous>, transform_indices = @transform_4, window_bounds = array<i64: 16, 36>}, {pipeline_mode = #tpu.pipeline_mode<synchronous>, transform_indices = @transform_5, window_bounds = array<i64: 16, 1>}, {pipeline_mode = #tpu.pipeline_mode<synchronous>, transform_indices = @transform_6, window_bounds = array<i64: 67, 16>}, {pipeline_mode = #tpu.pipeline_mode<synchronous>, transform_indices = @transform_7, window_bounds = array<i64: 16, 2048>}, {pipeline_mode = #tpu.pipeline_mode<synchronous>, transform_indices = @transform_8, window_bounds = array<i64: 16, 2048>}, {pipeline_mode = #tpu.pipeline_mode<synchronous>, transform_indices = @transform_9, window_bounds = array<i64: 1, 2048>}, {pipeline_mode = #tpu.pipeline_mode<synchronous>, transform_indices = @transform_10, window_bounds = array<i64: 32, 128>}, {pipeline_mode = #tpu.pipeline_mode<synchronous>, transform_indices = @transform_11, window_bounds = array<i64: 32, 16>}, {pipeline_mode = #tpu.pipeline_mode<synchronous>, transform_indices = @transform_12, window_bounds = array<i64: 1, 16>}, {pipeline_mode = #tpu.pipeline_mode<synchronous>, transform_indices = @transform_13, window_bounds = array<i64: 16, 1>}, {pipeline_mode = #tpu.pipeline_mode<synchronous>, transform_indices = @transform_14, window_bounds = array<i64: 1, 1>}, {transform_indices = @transform_15, window_bounds = array<i64: 2, 1>}]} {
    %c0 = arith.constant 0 : index
    %c0_0 = arith.constant 0 : index
    %0 = vector.load %arg1[%c0, %c0_0] : memref<2x324xf32, #tpu.memory_space<vmem>>, vector<2x324xf32>
    %1 = tpu.concatenate %0, %0, %0, %0 in 0 : vector<2x324xf32>, vector<2x324xf32>, vector<2x324xf32>, vector<2x324xf32> -> vector<8x324xf32>
    %c0_1 = arith.constant 0 : index
    %c0_2 = arith.constant 0 : index
    %2 = vector.load %arg2[%c0_1, %c0_2] : memref<8x9xf32, #tpu.memory_space<vmem>>, vector<8x9xf32>
    %cst = arith.constant 0.000000e+00 : f32
    %3 = vector.broadcast %cst : f32 to vector<8x286xf32>
    %4 = vector.extract_strided_slice %2 {offsets = [0, 0], sizes = [8, 1], strides = [1, 1]} : vector<8x9xf32> to vector<8x1xf32>
    %5 = vector.extract_strided_slice %1 {offsets = [0, 0], sizes = [8, 286], strides = [1, 1]} : vector<8x324xf32> to vector<8x286xf32>
    %6 = vector.broadcast %4 : vector<8x1xf32> to vector<8x286xf32>
    %7 = arith.mulf %6, %5 : vector<8x286xf32>
    %8 = arith.addf %3, %7 : vector<8x286xf32>
    %9 = vector.extract_strided_slice %2 {offsets = [0, 1], sizes = [8, 1], strides = [1, 1]} : vector<8x9xf32> to vector<8x1xf32>
    %10 = vector.extract_strided_slice %1 {offsets = [0, 1], sizes = [8, 286], strides = [1, 1]} : vector<8x324xf32> to vector<8x286xf32>
    %11 = vector.broadcast %9 : vector<8x1xf32> to vector<8x286xf32>
    %12 = arith.mulf %11, %10 : vector<8x286xf32>
    %13 = arith.addf %8, %12 : vector<8x286xf32>
    %14 = vector.extract_strided_slice %2 {offsets = [0, 2], sizes = [8, 1], strides = [1, 1]} : vector<8x9xf32> to vector<8x1xf32>
    %15 = vector.extract_strided_slice %1 {offsets = [0, 2], sizes = [8, 286], strides = [1, 1]} : vector<8x324xf32> to vector<8x286xf32>
    %16 = vector.broadcast %14 : vector<8x1xf32> to vector<8x286xf32>
    %17 = arith.mulf %16, %15 : vector<8x286xf32>
    %18 = arith.addf %13, %17 : vector<8x286xf32>
    %19 = vector.extract_strided_slice %2 {offsets = [0, 3], sizes = [8, 1], strides = [1, 1]} : vector<8x9xf32> to vector<8x1xf32>
    %20 = vector.extract_strided_slice %1 {offsets = [0, 18], sizes = [8, 286], strides = [1, 1]} : vector<8x324xf32> to vector<8x286xf32>
    %21 = vector.broadcast %19 : vector<8x1xf32> to vector<8x286xf32>
    %22 = arith.mulf %21, %20 : vector<8x286xf32>
    %23 = arith.addf %18, %22 : vector<8x286xf32>
    %24 = vector.extract_strided_slice %2 {offsets = [0, 4], sizes = [8, 1], strides = [1, 1]} : vector<8x9xf32> to vector<8x1xf32>
    %25 = vector.extract_strided_slice %1 {offsets = [0, 19], sizes = [8, 286], strides = [1, 1]} : vector<8x324xf32> to vector<8x286xf32>
    %26 = vector.broadcast %24 : vector<8x1xf32> to vector<8x286xf32>
    %27 = arith.mulf %26, %25 : vector<8x286xf32>
    %28 = arith.addf %23, %27 : vector<8x286xf32>
    %29 = vector.extract_strided_slice %2 {offsets = [0, 5], sizes = [8, 1], strides = [1, 1]} : vector<8x9xf32> to vector<8x1xf32>
    %30 = vector.extract_strided_slice %1 {offsets = [0, 20], sizes = [8, 286], strides = [1, 1]} : vector<8x324xf32> to vector<8x286xf32>
    %31 = vector.broadcast %29 : vector<8x1xf32> to vector<8x286xf32>
    %32 = arith.mulf %31, %30 : vector<8x286xf32>
    %33 = arith.addf %28, %32 : vector<8x286xf32>
    %34 = vector.extract_strided_slice %2 {offsets = [0, 6], sizes = [8, 1], strides = [1, 1]} : vector<8x9xf32> to vector<8x1xf32>
    %35 = vector.extract_strided_slice %1 {offsets = [0, 36], sizes = [8, 286], strides = [1, 1]} : vector<8x324xf32> to vector<8x286xf32>
    %36 = vector.broadcast %34 : vector<8x1xf32> to vector<8x286xf32>
    %37 = arith.mulf %36, %35 : vector<8x286xf32>
    %38 = arith.addf %33, %37 : vector<8x286xf32>
    %39 = vector.extract_strided_slice %2 {offsets = [0, 7], sizes = [8, 1], strides = [1, 1]} : vector<8x9xf32> to vector<8x1xf32>
    %40 = vector.extract_strided_slice %1 {offsets = [0, 37], sizes = [8, 286], strides = [1, 1]} : vector<8x324xf32> to vector<8x286xf32>
    %41 = vector.broadcast %39 : vector<8x1xf32> to vector<8x286xf32>
    %42 = arith.mulf %41, %40 : vector<8x286xf32>
    %43 = arith.addf %38, %42 : vector<8x286xf32>
    %44 = vector.extract_strided_slice %2 {offsets = [0, 8], sizes = [8, 1], strides = [1, 1]} : vector<8x9xf32> to vector<8x1xf32>
    %45 = vector.extract_strided_slice %1 {offsets = [0, 38], sizes = [8, 286], strides = [1, 1]} : vector<8x324xf32> to vector<8x286xf32>
    %46 = vector.broadcast %44 : vector<8x1xf32> to vector<8x286xf32>
    %47 = arith.mulf %46, %45 : vector<8x286xf32>
    %48 = arith.addf %43, %47 : vector<8x286xf32>
    %c0_3 = arith.constant 0 : index
    %c0_4 = arith.constant 0 : index
    %49 = vector.load %arg3[%c0_3, %c0_4] : memref<8x1xf32, #tpu.memory_space<vmem>>, vector<8x1xf32>
    %50 = vector.broadcast %49 : vector<8x1xf32> to vector<8x286xf32>
    %51 = arith.addf %48, %50 : vector<8x286xf32>
    %cst_5 = arith.constant 0.000000e+00 : f32
    %52 = vector.broadcast %cst_5 : f32 to vector<8x286xf32>
    %53 = arith.maximumf %51, %52 : vector<8x286xf32>
    %54 = vector.extract_strided_slice %53 {offsets = [0, 0], sizes = [8, 267], strides = [1, 1]} : vector<8x286xf32> to vector<8x267xf32>
    %55 = vector.extract_strided_slice %53 {offsets = [0, 1], sizes = [8, 267], strides = [1, 1]} : vector<8x286xf32> to vector<8x267xf32>
    %56 = arith.maximumf %54, %55 : vector<8x267xf32>
    %57 = vector.extract_strided_slice %53 {offsets = [0, 18], sizes = [8, 267], strides = [1, 1]} : vector<8x286xf32> to vector<8x267xf32>
    %58 = vector.extract_strided_slice %53 {offsets = [0, 19], sizes = [8, 267], strides = [1, 1]} : vector<8x286xf32> to vector<8x267xf32>
    %59 = arith.maximumf %57, %58 : vector<8x267xf32>
    %60 = arith.maximumf %56, %59 : vector<8x267xf32>
    %c0_6 = arith.constant 0 : index
    %c0_7 = arith.constant 0 : index
    %61 = vector.load %arg4[%c0_6, %c0_7] : memref<267x100xf32, #tpu.memory_space<vmem>>, vector<267x100xf32>
    %cst_8 = arith.constant dense<0.000000e+00> : vector<8x100xf32>
    %62 = tpu.matmul %60, %61, %cst_8 {dimension_numbers = #tpu.dot_dimension_numbers<[1], [0], [0], [1], [0, 0, 1, 1], [], []>} : vector<8x267xf32>, vector<267x100xf32>, vector<8x100xf32> -> vector<8x100xf32>
    %c0_9 = arith.constant 0 : index
    %c0_10 = arith.constant 0 : index
    %63 = vector.load %arg5[%c0_9, %c0_10] : memref<16x36xf32, #tpu.memory_space<vmem>>, vector<16x36xf32>
    %cst_11 = arith.constant 0.000000e+00 : f32
    %64 = vector.broadcast %cst_11 : f32 to vector<16x78xf32>
    %65 = vector.extract_strided_slice %62 {offsets = [0, 0], sizes = [2, 100], strides = [1, 1]} : vector<8x100xf32> to vector<2x100xf32>
    %66 = tpu.concatenate %65, %65, %65, %65, %65, %65, %65, %65 in 0 : vector<2x100xf32>, vector<2x100xf32>, vector<2x100xf32>, vector<2x100xf32>, vector<2x100xf32>, vector<2x100xf32>, vector<2x100xf32>, vector<2x100xf32> -> vector<16x100xf32>
    %67 = vector.extract_strided_slice %63 {offsets = [0, 0], sizes = [16, 1], strides = [1, 1]} : vector<16x36xf32> to vector<16x1xf32>
    %68 = vector.extract_strided_slice %66 {offsets = [0, 0], sizes = [16, 78], strides = [1, 1]} : vector<16x100xf32> to vector<16x78xf32>
    %69 = vector.broadcast %67 : vector<16x1xf32> to vector<16x78xf32>
    %70 = arith.mulf %69, %68 : vector<16x78xf32>
    %71 = arith.addf %64, %70 : vector<16x78xf32>
    %72 = vector.extract_strided_slice %63 {offsets = [0, 1], sizes = [16, 1], strides = [1, 1]} : vector<16x36xf32> to vector<16x1xf32>
    %73 = vector.extract_strided_slice %66 {offsets = [0, 1], sizes = [16, 78], strides = [1, 1]} : vector<16x100xf32> to vector<16x78xf32>
    %74 = vector.broadcast %72 : vector<16x1xf32> to vector<16x78xf32>
    %75 = arith.mulf %74, %73 : vector<16x78xf32>
    %76 = arith.addf %71, %75 : vector<16x78xf32>
    %77 = vector.extract_strided_slice %63 {offsets = [0, 2], sizes = [16, 1], strides = [1, 1]} : vector<16x36xf32> to vector<16x1xf32>
    %78 = vector.extract_strided_slice %66 {offsets = [0, 2], sizes = [16, 78], strides = [1, 1]} : vector<16x100xf32> to vector<16x78xf32>
    %79 = vector.broadcast %77 : vector<16x1xf32> to vector<16x78xf32>
    %80 = arith.mulf %79, %78 : vector<16x78xf32>
    %81 = arith.addf %76, %80 : vector<16x78xf32>
    %82 = vector.extract_strided_slice %63 {offsets = [0, 3], sizes = [16, 1], strides = [1, 1]} : vector<16x36xf32> to vector<16x1xf32>
    %83 = vector.extract_strided_slice %66 {offsets = [0, 10], sizes = [16, 78], strides = [1, 1]} : vector<16x100xf32> to vector<16x78xf32>
    %84 = vector.broadcast %82 : vector<16x1xf32> to vector<16x78xf32>
    %85 = arith.mulf %84, %83 : vector<16x78xf32>
    %86 = arith.addf %81, %85 : vector<16x78xf32>
    %87 = vector.extract_strided_slice %63 {offsets = [0, 4], sizes = [16, 1], strides = [1, 1]} : vector<16x36xf32> to vector<16x1xf32>
    %88 = vector.extract_strided_slice %66 {offsets = [0, 11], sizes = [16, 78], strides = [1, 1]} : vector<16x100xf32> to vector<16x78xf32>
    %89 = vector.broadcast %87 : vector<16x1xf32> to vector<16x78xf32>
    %90 = arith.mulf %89, %88 : vector<16x78xf32>
    %91 = arith.addf %86, %90 : vector<16x78xf32>
    %92 = vector.extract_strided_slice %63 {offsets = [0, 5], sizes = [16, 1], strides = [1, 1]} : vector<16x36xf32> to vector<16x1xf32>
    %93 = vector.extract_strided_slice %66 {offsets = [0, 12], sizes = [16, 78], strides = [1, 1]} : vector<16x100xf32> to vector<16x78xf32>
    %94 = vector.broadcast %92 : vector<16x1xf32> to vector<16x78xf32>
    %95 = arith.mulf %94, %93 : vector<16x78xf32>
    %96 = arith.addf %91, %95 : vector<16x78xf32>
    %97 = vector.extract_strided_slice %63 {offsets = [0, 6], sizes = [16, 1], strides = [1, 1]} : vector<16x36xf32> to vector<16x1xf32>
    %98 = vector.extract_strided_slice %66 {offsets = [0, 20], sizes = [16, 78], strides = [1, 1]} : vector<16x100xf32> to vector<16x78xf32>
    %99 = vector.broadcast %97 : vector<16x1xf32> to vector<16x78xf32>
    %100 = arith.mulf %99, %98 : vector<16x78xf32>
    %101 = arith.addf %96, %100 : vector<16x78xf32>
    %102 = vector.extract_strided_slice %63 {offsets = [0, 7], sizes = [16, 1], strides = [1, 1]} : vector<16x36xf32> to vector<16x1xf32>
    %103 = vector.extract_strided_slice %66 {offsets = [0, 21], sizes = [16, 78], strides = [1, 1]} : vector<16x100xf32> to vector<16x78xf32>
    %104 = vector.broadcast %102 : vector<16x1xf32> to vector<16x78xf32>
    %105 = arith.mulf %104, %103 : vector<16x78xf32>
    %106 = arith.addf %101, %105 : vector<16x78xf32>
    %107 = vector.extract_strided_slice %63 {offsets = [0, 8], sizes = [16, 1], strides = [1, 1]} : vector<16x36xf32> to vector<16x1xf32>
    %108 = vector.extract_strided_slice %66 {offsets = [0, 22], sizes = [16, 78], strides = [1, 1]} : vector<16x100xf32> to vector<16x78xf32>
    %109 = vector.broadcast %107 : vector<16x1xf32> to vector<16x78xf32>
    %110 = arith.mulf %109, %108 : vector<16x78xf32>
    %111 = arith.addf %106, %110 : vector<16x78xf32>
    %112 = vector.extract_strided_slice %62 {offsets = [2, 0], sizes = [2, 100], strides = [1, 1]} : vector<8x100xf32> to vector<2x100xf32>
    %113 = tpu.concatenate %112, %112, %112, %112, %112, %112, %112, %112 in 0 : vector<2x100xf32>, vector<2x100xf32>, vector<2x100xf32>, vector<2x100xf32>, vector<2x100xf32>, vector<2x100xf32>, vector<2x100xf32>, vector<2x100xf32> -> vector<16x100xf32>
    %114 = vector.extract_strided_slice %63 {offsets = [0, 9], sizes = [16, 1], strides = [1, 1]} : vector<16x36xf32> to vector<16x1xf32>
    %115 = vector.extract_strided_slice %113 {offsets = [0, 0], sizes = [16, 78], strides = [1, 1]} : vector<16x100xf32> to vector<16x78xf32>
    %116 = vector.broadcast %114 : vector<16x1xf32> to vector<16x78xf32>
    %117 = arith.mulf %116, %115 : vector<16x78xf32>
    %118 = arith.addf %111, %117 : vector<16x78xf32>
    %119 = vector.extract_strided_slice %63 {offsets = [0, 10], sizes = [16, 1], strides = [1, 1]} : vector<16x36xf32> to vector<16x1xf32>
    %120 = vector.extract_strided_slice %113 {offsets = [0, 1], sizes = [16, 78], strides = [1, 1]} : vector<16x100xf32> to vector<16x78xf32>
    %121 = vector.broadcast %119 : vector<16x1xf32> to vector<16x78xf32>
    %122 = arith.mulf %121, %120 : vector<16x78xf32>
    %123 = arith.addf %118, %122 : vector<16x78xf32>
    %124 = vector.extract_strided_slice %63 {offsets = [0, 11], sizes = [16, 1], strides = [1, 1]} : vector<16x36xf32> to vector<16x1xf32>
    %125 = vector.extract_strided_slice %113 {offsets = [0, 2], sizes = [16, 78], strides = [1, 1]} : vector<16x100xf32> to vector<16x78xf32>
    %126 = vector.broadcast %124 : vector<16x1xf32> to vector<16x78xf32>
    %127 = arith.mulf %126, %125 : vector<16x78xf32>
    %128 = arith.addf %123, %127 : vector<16x78xf32>
    %129 = vector.extract_strided_slice %63 {offsets = [0, 12], sizes = [16, 1], strides = [1, 1]} : vector<16x36xf32> to vector<16x1xf32>
    %130 = vector.extract_strided_slice %113 {offsets = [0, 10], sizes = [16, 78], strides = [1, 1]} : vector<16x100xf32> to vector<16x78xf32>
    %131 = vector.broadcast %129 : vector<16x1xf32> to vector<16x78xf32>
    %132 = arith.mulf %131, %130 : vector<16x78xf32>
    %133 = arith.addf %128, %132 : vector<16x78xf32>
    %134 = vector.extract_strided_slice %63 {offsets = [0, 13], sizes = [16, 1], strides = [1, 1]} : vector<16x36xf32> to vector<16x1xf32>
    %135 = vector.extract_strided_slice %113 {offsets = [0, 11], sizes = [16, 78], strides = [1, 1]} : vector<16x100xf32> to vector<16x78xf32>
    %136 = vector.broadcast %134 : vector<16x1xf32> to vector<16x78xf32>
    %137 = arith.mulf %136, %135 : vector<16x78xf32>
    %138 = arith.addf %133, %137 : vector<16x78xf32>
    %139 = vector.extract_strided_slice %63 {offsets = [0, 14], sizes = [16, 1], strides = [1, 1]} : vector<16x36xf32> to vector<16x1xf32>
    %140 = vector.extract_strided_slice %113 {offsets = [0, 12], sizes = [16, 78], strides = [1, 1]} : vector<16x100xf32> to vector<16x78xf32>
    %141 = vector.broadcast %139 : vector<16x1xf32> to vector<16x78xf32>
    %142 = arith.mulf %141, %140 : vector<16x78xf32>
    %143 = arith.addf %138, %142 : vector<16x78xf32>
    %144 = vector.extract_strided_slice %63 {offsets = [0, 15], sizes = [16, 1], strides = [1, 1]} : vector<16x36xf32> to vector<16x1xf32>
    %145 = vector.extract_strided_slice %113 {offsets = [0, 20], sizes = [16, 78], strides = [1, 1]} : vector<16x100xf32> to vector<16x78xf32>
    %146 = vector.broadcast %144 : vector<16x1xf32> to vector<16x78xf32>
    %147 = arith.mulf %146, %145 : vector<16x78xf32>
    %148 = arith.addf %143, %147 : vector<16x78xf32>
    %149 = vector.extract_strided_slice %63 {offsets = [0, 16], sizes = [16, 1], strides = [1, 1]} : vector<16x36xf32> to vector<16x1xf32>
    %150 = vector.extract_strided_slice %113 {offsets = [0, 21], sizes = [16, 78], strides = [1, 1]} : vector<16x100xf32> to vector<16x78xf32>
    %151 = vector.broadcast %149 : vector<16x1xf32> to vector<16x78xf32>
    %152 = arith.mulf %151, %150 : vector<16x78xf32>
    %153 = arith.addf %148, %152 : vector<16x78xf32>
    %154 = vector.extract_strided_slice %63 {offsets = [0, 17], sizes = [16, 1], strides = [1, 1]} : vector<16x36xf32> to vector<16x1xf32>
    %155 = vector.extract_strided_slice %113 {offsets = [0, 22], sizes = [16, 78], strides = [1, 1]} : vector<16x100xf32> to vector<16x78xf32>
    %156 = vector.broadcast %154 : vector<16x1xf32> to vector<16x78xf32>
    %157 = arith.mulf %156, %155 : vector<16x78xf32>
    %158 = arith.addf %153, %157 : vector<16x78xf32>
    %159 = vector.extract_strided_slice %62 {offsets = [4, 0], sizes = [2, 100], strides = [1, 1]} : vector<8x100xf32> to vector<2x100xf32>
    %160 = tpu.concatenate %159, %159, %159, %159, %159, %159, %159, %159 in 0 : vector<2x100xf32>, vector<2x100xf32>, vector<2x100xf32>, vector<2x100xf32>, vector<2x100xf32>, vector<2x100xf32>, vector<2x100xf32>, vector<2x100xf32> -> vector<16x100xf32>
    %161 = vector.extract_strided_slice %63 {offsets = [0, 18], sizes = [16, 1], strides = [1, 1]} : vector<16x36xf32> to vector<16x1xf32>
    %162 = vector.extract_strided_slice %160 {offsets = [0, 0], sizes = [16, 78], strides = [1, 1]} : vector<16x100xf32> to vector<16x78xf32>
    %163 = vector.broadcast %161 : vector<16x1xf32> to vector<16x78xf32>
    %164 = arith.mulf %163, %162 : vector<16x78xf32>
    %165 = arith.addf %158, %164 : vector<16x78xf32>
    %166 = vector.extract_strided_slice %63 {offsets = [0, 19], sizes = [16, 1], strides = [1, 1]} : vector<16x36xf32> to vector<16x1xf32>
    %167 = vector.extract_strided_slice %160 {offsets = [0, 1], sizes = [16, 78], strides = [1, 1]} : vector<16x100xf32> to vector<16x78xf32>
    %168 = vector.broadcast %166 : vector<16x1xf32> to vector<16x78xf32>
    %169 = arith.mulf %168, %167 : vector<16x78xf32>
    %170 = arith.addf %165, %169 : vector<16x78xf32>
    %171 = vector.extract_strided_slice %63 {offsets = [0, 20], sizes = [16, 1], strides = [1, 1]} : vector<16x36xf32> to vector<16x1xf32>
    %172 = vector.extract_strided_slice %160 {offsets = [0, 2], sizes = [16, 78], strides = [1, 1]} : vector<16x100xf32> to vector<16x78xf32>
    %173 = vector.broadcast %171 : vector<16x1xf32> to vector<16x78xf32>
    %174 = arith.mulf %173, %172 : vector<16x78xf32>
    %175 = arith.addf %170, %174 : vector<16x78xf32>
    %176 = vector.extract_strided_slice %63 {offsets = [0, 21], sizes = [16, 1], strides = [1, 1]} : vector<16x36xf32> to vector<16x1xf32>
    %177 = vector.extract_strided_slice %160 {offsets = [0, 10], sizes = [16, 78], strides = [1, 1]} : vector<16x100xf32> to vector<16x78xf32>
    %178 = vector.broadcast %176 : vector<16x1xf32> to vector<16x78xf32>
    %179 = arith.mulf %178, %177 : vector<16x78xf32>
    %180 = arith.addf %175, %179 : vector<16x78xf32>
    %181 = vector.extract_strided_slice %63 {offsets = [0, 22], sizes = [16, 1], strides = [1, 1]} : vector<16x36xf32> to vector<16x1xf32>
    %182 = vector.extract_strided_slice %160 {offsets = [0, 11], sizes = [16, 78], strides = [1, 1]} : vector<16x100xf32> to vector<16x78xf32>
    %183 = vector.broadcast %181 : vector<16x1xf32> to vector<16x78xf32>
    %184 = arith.mulf %183, %182 : vector<16x78xf32>
    %185 = arith.addf %180, %184 : vector<16x78xf32>
    %186 = vector.extract_strided_slice %63 {offsets = [0, 23], sizes = [16, 1], strides = [1, 1]} : vector<16x36xf32> to vector<16x1xf32>
    %187 = vector.extract_strided_slice %160 {offsets = [0, 12], sizes = [16, 78], strides = [1, 1]} : vector<16x100xf32> to vector<16x78xf32>
    %188 = vector.broadcast %186 : vector<16x1xf32> to vector<16x78xf32>
    %189 = arith.mulf %188, %187 : vector<16x78xf32>
    %190 = arith.addf %185, %189 : vector<16x78xf32>
    %191 = vector.extract_strided_slice %63 {offsets = [0, 24], sizes = [16, 1], strides = [1, 1]} : vector<16x36xf32> to vector<16x1xf32>
    %192 = vector.extract_strided_slice %160 {offsets = [0, 20], sizes = [16, 78], strides = [1, 1]} : vector<16x100xf32> to vector<16x78xf32>
    %193 = vector.broadcast %191 : vector<16x1xf32> to vector<16x78xf32>
    %194 = arith.mulf %193, %192 : vector<16x78xf32>
    %195 = arith.addf %190, %194 : vector<16x78xf32>
    %196 = vector.extract_strided_slice %63 {offsets = [0, 25], sizes = [16, 1], strides = [1, 1]} : vector<16x36xf32> to vector<16x1xf32>
    %197 = vector.extract_strided_slice %160 {offsets = [0, 21], sizes = [16, 78], strides = [1, 1]} : vector<16x100xf32> to vector<16x78xf32>
    %198 = vector.broadcast %196 : vector<16x1xf32> to vector<16x78xf32>
    %199 = arith.mulf %198, %197 : vector<16x78xf32>
    %200 = arith.addf %195, %199 : vector<16x78xf32>
    %201 = vector.extract_strided_slice %63 {offsets = [0, 26], sizes = [16, 1], strides = [1, 1]} : vector<16x36xf32> to vector<16x1xf32>
    %202 = vector.extract_strided_slice %160 {offsets = [0, 22], sizes = [16, 78], strides = [1, 1]} : vector<16x100xf32> to vector<16x78xf32>
    %203 = vector.broadcast %201 : vector<16x1xf32> to vector<16x78xf32>
    %204 = arith.mulf %203, %202 : vector<16x78xf32>
    %205 = arith.addf %200, %204 : vector<16x78xf32>
    %206 = vector.extract_strided_slice %62 {offsets = [6, 0], sizes = [2, 100], strides = [1, 1]} : vector<8x100xf32> to vector<2x100xf32>
    %207 = tpu.concatenate %206, %206, %206, %206, %206, %206, %206, %206 in 0 : vector<2x100xf32>, vector<2x100xf32>, vector<2x100xf32>, vector<2x100xf32>, vector<2x100xf32>, vector<2x100xf32>, vector<2x100xf32>, vector<2x100xf32> -> vector<16x100xf32>
    %208 = vector.extract_strided_slice %63 {offsets = [0, 27], sizes = [16, 1], strides = [1, 1]} : vector<16x36xf32> to vector<16x1xf32>
    %209 = vector.extract_strided_slice %207 {offsets = [0, 0], sizes = [16, 78], strides = [1, 1]} : vector<16x100xf32> to vector<16x78xf32>
    %210 = vector.broadcast %208 : vector<16x1xf32> to vector<16x78xf32>
    %211 = arith.mulf %210, %209 : vector<16x78xf32>
    %212 = arith.addf %205, %211 : vector<16x78xf32>
    %213 = vector.extract_strided_slice %63 {offsets = [0, 28], sizes = [16, 1], strides = [1, 1]} : vector<16x36xf32> to vector<16x1xf32>
    %214 = vector.extract_strided_slice %207 {offsets = [0, 1], sizes = [16, 78], strides = [1, 1]} : vector<16x100xf32> to vector<16x78xf32>
    %215 = vector.broadcast %213 : vector<16x1xf32> to vector<16x78xf32>
    %216 = arith.mulf %215, %214 : vector<16x78xf32>
    %217 = arith.addf %212, %216 : vector<16x78xf32>
    %218 = vector.extract_strided_slice %63 {offsets = [0, 29], sizes = [16, 1], strides = [1, 1]} : vector<16x36xf32> to vector<16x1xf32>
    %219 = vector.extract_strided_slice %207 {offsets = [0, 2], sizes = [16, 78], strides = [1, 1]} : vector<16x100xf32> to vector<16x78xf32>
    %220 = vector.broadcast %218 : vector<16x1xf32> to vector<16x78xf32>
    %221 = arith.mulf %220, %219 : vector<16x78xf32>
    %222 = arith.addf %217, %221 : vector<16x78xf32>
    %223 = vector.extract_strided_slice %63 {offsets = [0, 30], sizes = [16, 1], strides = [1, 1]} : vector<16x36xf32> to vector<16x1xf32>
    %224 = vector.extract_strided_slice %207 {offsets = [0, 10], sizes = [16, 78], strides = [1, 1]} : vector<16x100xf32> to vector<16x78xf32>
    %225 = vector.broadcast %223 : vector<16x1xf32> to vector<16x78xf32>
    %226 = arith.mulf %225, %224 : vector<16x78xf32>
    %227 = arith.addf %222, %226 : vector<16x78xf32>
    %228 = vector.extract_strided_slice %63 {offsets = [0, 31], sizes = [16, 1], strides = [1, 1]} : vector<16x36xf32> to vector<16x1xf32>
    %229 = vector.extract_strided_slice %207 {offsets = [0, 11], sizes = [16, 78], strides = [1, 1]} : vector<16x100xf32> to vector<16x78xf32>
    %230 = vector.broadcast %228 : vector<16x1xf32> to vector<16x78xf32>
    %231 = arith.mulf %230, %229 : vector<16x78xf32>
    %232 = arith.addf %227, %231 : vector<16x78xf32>
    %233 = vector.extract_strided_slice %63 {offsets = [0, 32], sizes = [16, 1], strides = [1, 1]} : vector<16x36xf32> to vector<16x1xf32>
    %234 = vector.extract_strided_slice %207 {offsets = [0, 12], sizes = [16, 78], strides = [1, 1]} : vector<16x100xf32> to vector<16x78xf32>
    %235 = vector.broadcast %233 : vector<16x1xf32> to vector<16x78xf32>
    %236 = arith.mulf %235, %234 : vector<16x78xf32>
    %237 = arith.addf %232, %236 : vector<16x78xf32>
    %238 = vector.extract_strided_slice %63 {offsets = [0, 33], sizes = [16, 1], strides = [1, 1]} : vector<16x36xf32> to vector<16x1xf32>
    %239 = vector.extract_strided_slice %207 {offsets = [0, 20], sizes = [16, 78], strides = [1, 1]} : vector<16x100xf32> to vector<16x78xf32>
    %240 = vector.broadcast %238 : vector<16x1xf32> to vector<16x78xf32>
    %241 = arith.mulf %240, %239 : vector<16x78xf32>
    %242 = arith.addf %237, %241 : vector<16x78xf32>
    %243 = vector.extract_strided_slice %63 {offsets = [0, 34], sizes = [16, 1], strides = [1, 1]} : vector<16x36xf32> to vector<16x1xf32>
    %244 = vector.extract_strided_slice %207 {offsets = [0, 21], sizes = [16, 78], strides = [1, 1]} : vector<16x100xf32> to vector<16x78xf32>
    %245 = vector.broadcast %243 : vector<16x1xf32> to vector<16x78xf32>
    %246 = arith.mulf %245, %244 : vector<16x78xf32>
    %247 = arith.addf %242, %246 : vector<16x78xf32>
    %248 = vector.extract_strided_slice %63 {offsets = [0, 35], sizes = [16, 1], strides = [1, 1]} : vector<16x36xf32> to vector<16x1xf32>
    %249 = vector.extract_strided_slice %207 {offsets = [0, 22], sizes = [16, 78], strides = [1, 1]} : vector<16x100xf32> to vector<16x78xf32>
    %250 = vector.broadcast %248 : vector<16x1xf32> to vector<16x78xf32>
    %251 = arith.mulf %250, %249 : vector<16x78xf32>
    %252 = arith.addf %247, %251 : vector<16x78xf32>
    %c0_12 = arith.constant 0 : index
    %c0_13 = arith.constant 0 : index
    %253 = vector.load %arg6[%c0_12, %c0_13] : memref<16x1xf32, #tpu.memory_space<vmem>>, vector<16x1xf32>
    %254 = vector.broadcast %253 : vector<16x1xf32> to vector<16x78xf32>
    %255 = arith.addf %252, %254 : vector<16x78xf32>
    %cst_14 = arith.constant 0.000000e+00 : f32
    %256 = vector.broadcast %cst_14 : f32 to vector<16x78xf32>
    %257 = arith.maximumf %255, %256 : vector<16x78xf32>
    %258 = vector.extract_strided_slice %257 {offsets = [0, 0], sizes = [16, 67], strides = [1, 1]} : vector<16x78xf32> to vector<16x67xf32>
    %259 = vector.extract_strided_slice %257 {offsets = [0, 1], sizes = [16, 67], strides = [1, 1]} : vector<16x78xf32> to vector<16x67xf32>
    %260 = arith.maximumf %258, %259 : vector<16x67xf32>
    %261 = vector.extract_strided_slice %257 {offsets = [0, 10], sizes = [16, 67], strides = [1, 1]} : vector<16x78xf32> to vector<16x67xf32>
    %262 = vector.extract_strided_slice %257 {offsets = [0, 11], sizes = [16, 67], strides = [1, 1]} : vector<16x78xf32> to vector<16x67xf32>
    %263 = arith.maximumf %261, %262 : vector<16x67xf32>
    %264 = arith.maximumf %260, %263 : vector<16x67xf32>
    %c0_15 = arith.constant 0 : index
    %c0_16 = arith.constant 0 : index
    %265 = vector.load %arg7[%c0_15, %c0_16] : memref<67x16xf32, #tpu.memory_space<vmem>>, vector<67x16xf32>
    %cst_17 = arith.constant dense<0.000000e+00> : vector<16x16xf32>
    %266 = tpu.matmul %264, %265, %cst_17 {dimension_numbers = #tpu.dot_dimension_numbers<[1], [0], [0], [1], [0, 0, 1, 1], [], []>} : vector<16x67xf32>, vector<67x16xf32>, vector<16x16xf32> -> vector<16x16xf32>
    %c0_18 = arith.constant 0 : index
    %c0_19 = arith.constant 0 : index
    %267 = vector.load %arg8[%c0_18, %c0_19] : memref<16x2048xf32, #tpu.memory_space<vmem>>, vector<16x2048xf32>
    %cst_20 = arith.constant dense<0.000000e+00> : vector<16x2048xf32>
    %268 = tpu.matmul %266, %267, %cst_20 {dimension_numbers = #tpu.dot_dimension_numbers<[1], [0], [0], [1], [0, 0, 1, 1], [], []>} : vector<16x16xf32>, vector<16x2048xf32>, vector<16x2048xf32> -> vector<16x2048xf32>
    %c0_21 = arith.constant 0 : index
    %c0_22 = arith.constant 0 : index
    %269 = vector.load %arg9[%c0_21, %c0_22] : memref<16x2048xf32, #tpu.memory_space<vmem>>, vector<16x2048xf32>
    %270 = arith.mulf %268, %269 : vector<16x2048xf32>
    %271 = vector.extract_strided_slice %270 {offsets = [0, 0], sizes = [8, 2048], strides = [1, 1]} : vector<16x2048xf32> to vector<8x2048xf32>
    %272 = vector.extract_strided_slice %270 {offsets = [8, 0], sizes = [8, 2048], strides = [1, 1]} : vector<16x2048xf32> to vector<8x2048xf32>
    %273 = arith.addf %271, %272 : vector<8x2048xf32>
    %274 = vector.extract_strided_slice %273 {offsets = [0, 0], sizes = [4, 2048], strides = [1, 1]} : vector<8x2048xf32> to vector<4x2048xf32>
    %275 = vector.extract_strided_slice %273 {offsets = [4, 0], sizes = [4, 2048], strides = [1, 1]} : vector<8x2048xf32> to vector<4x2048xf32>
    %276 = arith.addf %274, %275 : vector<4x2048xf32>
    %277 = vector.extract_strided_slice %276 {offsets = [0, 0], sizes = [2, 2048], strides = [1, 1]} : vector<4x2048xf32> to vector<2x2048xf32>
    %278 = vector.extract_strided_slice %276 {offsets = [2, 0], sizes = [2, 2048], strides = [1, 1]} : vector<4x2048xf32> to vector<2x2048xf32>
    %279 = arith.addf %277, %278 : vector<2x2048xf32>
    %c0_23 = arith.constant 0 : index
    %c0_24 = arith.constant 0 : index
    %280 = vector.load %arg10[%c0_23, %c0_24] : memref<1x2048xf32, #tpu.memory_space<vmem>>, vector<1x2048xf32>
    %281 = vector.broadcast %280 : vector<1x2048xf32> to vector<2x2048xf32>
    %282 = arith.addf %279, %281 : vector<2x2048xf32>
    %c0_25 = arith.constant 0 : index
    %c0_26 = arith.constant 0 : index
    %283 = vector.load %arg11[%c0_25, %c0_26] : memref<32x128xf32, #tpu.memory_space<vmem>>, vector<32x128xf32>
    %cst_27 = arith.constant 0.000000e+00 : f32
    %284 = vector.broadcast %cst_27 : f32 to vector<2x32xf32>
    %cst_28 = arith.constant 0.000000e+00 : f32
    %285 = vector.broadcast %cst_28 : f32 to vector<2x32xf32>
    %286 = vector.extract_strided_slice %282 {offsets = [0, 0], sizes = [2, 128], strides = [1, 1]} : vector<2x2048xf32> to vector<2x128xf32>
    %cst_29 = arith.constant dense<0.000000e+00> : vector<2x128xf32>
    %287 = tpu.matmul %284, %283, %cst_29 {dimension_numbers = #tpu.dot_dimension_numbers<[1], [0], [0], [1], [0, 0, 1, 1], [], []>} : vector<2x32xf32>, vector<32x128xf32>, vector<2x128xf32> -> vector<2x128xf32>
    %288 = arith.addf %286, %287 : vector<2x128xf32>
    %289 = arith.negf %288 : vector<2x128xf32>
    %290 = math.exp %289 : vector<2x128xf32>
    %cst_30 = arith.constant 1.000000e+00 : f32
    %291 = vector.broadcast %cst_30 : f32 to vector<2x128xf32>
    %292 = arith.addf %291, %290 : vector<2x128xf32>
    %293 = arith.divf %291, %292 : vector<2x128xf32>
    %294 = vector.extract_strided_slice %293 {offsets = [0, 0], sizes = [2, 32], strides = [1, 1]} : vector<2x128xf32> to vector<2x32xf32>
    %295 = vector.extract_strided_slice %293 {offsets = [0, 32], sizes = [2, 32], strides = [1, 1]} : vector<2x128xf32> to vector<2x32xf32>
    %296 = vector.extract_strided_slice %293 {offsets = [0, 96], sizes = [2, 32], strides = [1, 1]} : vector<2x128xf32> to vector<2x32xf32>
    %297 = vector.extract_strided_slice %288 {offsets = [0, 64], sizes = [2, 32], strides = [1, 1]} : vector<2x128xf32> to vector<2x32xf32>
    %298 = math.tanh %297 : vector<2x32xf32>
    %299 = arith.mulf %295, %285 : vector<2x32xf32>
    %300 = arith.mulf %294, %298 : vector<2x32xf32>
    %301 = arith.addf %299, %300 : vector<2x32xf32>
    %302 = math.tanh %301 : vector<2x32xf32>
    %303 = arith.mulf %296, %302 : vector<2x32xf32>
    %304 = vector.extract_strided_slice %282 {offsets = [0, 128], sizes = [2, 128], strides = [1, 1]} : vector<2x2048xf32> to vector<2x128xf32>
    %cst_31 = arith.constant dense<0.000000e+00> : vector<2x128xf32>
    %305 = tpu.matmul %303, %283, %cst_31 {dimension_numbers = #tpu.dot_dimension_numbers<[1], [0], [0], [1], [0, 0, 1, 1], [], []>} : vector<2x32xf32>, vector<32x128xf32>, vector<2x128xf32> -> vector<2x128xf32>
    %306 = arith.addf %304, %305 : vector<2x128xf32>
    %307 = arith.negf %306 : vector<2x128xf32>
    %308 = math.exp %307 : vector<2x128xf32>
    %cst_32 = arith.constant 1.000000e+00 : f32
    %309 = vector.broadcast %cst_32 : f32 to vector<2x128xf32>
    %310 = arith.addf %309, %308 : vector<2x128xf32>
    %311 = arith.divf %309, %310 : vector<2x128xf32>
    %312 = vector.extract_strided_slice %311 {offsets = [0, 0], sizes = [2, 32], strides = [1, 1]} : vector<2x128xf32> to vector<2x32xf32>
    %313 = vector.extract_strided_slice %311 {offsets = [0, 32], sizes = [2, 32], strides = [1, 1]} : vector<2x128xf32> to vector<2x32xf32>
    %314 = vector.extract_strided_slice %311 {offsets = [0, 96], sizes = [2, 32], strides = [1, 1]} : vector<2x128xf32> to vector<2x32xf32>
    %315 = vector.extract_strided_slice %306 {offsets = [0, 64], sizes = [2, 32], strides = [1, 1]} : vector<2x128xf32> to vector<2x32xf32>
    %316 = math.tanh %315 : vector<2x32xf32>
    %317 = arith.mulf %313, %301 : vector<2x32xf32>
    %318 = arith.mulf %312, %316 : vector<2x32xf32>
    %319 = arith.addf %317, %318 : vector<2x32xf32>
    %320 = math.tanh %319 : vector<2x32xf32>
    %321 = arith.mulf %314, %320 : vector<2x32xf32>
    %322 = vector.extract_strided_slice %282 {offsets = [0, 256], sizes = [2, 128], strides = [1, 1]} : vector<2x2048xf32> to vector<2x128xf32>
    %cst_33 = arith.constant dense<0.000000e+00> : vector<2x128xf32>
    %323 = tpu.matmul %321, %283, %cst_33 {dimension_numbers = #tpu.dot_dimension_numbers<[1], [0], [0], [1], [0, 0, 1, 1], [], []>} : vector<2x32xf32>, vector<32x128xf32>, vector<2x128xf32> -> vector<2x128xf32>
    %324 = arith.addf %322, %323 : vector<2x128xf32>
    %325 = arith.negf %324 : vector<2x128xf32>
    %326 = math.exp %325 : vector<2x128xf32>
    %cst_34 = arith.constant 1.000000e+00 : f32
    %327 = vector.broadcast %cst_34 : f32 to vector<2x128xf32>
    %328 = arith.addf %327, %326 : vector<2x128xf32>
    %329 = arith.divf %327, %328 : vector<2x128xf32>
    %330 = vector.extract_strided_slice %329 {offsets = [0, 0], sizes = [2, 32], strides = [1, 1]} : vector<2x128xf32> to vector<2x32xf32>
    %331 = vector.extract_strided_slice %329 {offsets = [0, 32], sizes = [2, 32], strides = [1, 1]} : vector<2x128xf32> to vector<2x32xf32>
    %332 = vector.extract_strided_slice %329 {offsets = [0, 96], sizes = [2, 32], strides = [1, 1]} : vector<2x128xf32> to vector<2x32xf32>
    %333 = vector.extract_strided_slice %324 {offsets = [0, 64], sizes = [2, 32], strides = [1, 1]} : vector<2x128xf32> to vector<2x32xf32>
    %334 = math.tanh %333 : vector<2x32xf32>
    %335 = arith.mulf %331, %319 : vector<2x32xf32>
    %336 = arith.mulf %330, %334 : vector<2x32xf32>
    %337 = arith.addf %335, %336 : vector<2x32xf32>
    %338 = math.tanh %337 : vector<2x32xf32>
    %339 = arith.mulf %332, %338 : vector<2x32xf32>
    %340 = vector.extract_strided_slice %282 {offsets = [0, 384], sizes = [2, 128], strides = [1, 1]} : vector<2x2048xf32> to vector<2x128xf32>
    %cst_35 = arith.constant dense<0.000000e+00> : vector<2x128xf32>
    %341 = tpu.matmul %339, %283, %cst_35 {dimension_numbers = #tpu.dot_dimension_numbers<[1], [0], [0], [1], [0, 0, 1, 1], [], []>} : vector<2x32xf32>, vector<32x128xf32>, vector<2x128xf32> -> vector<2x128xf32>
    %342 = arith.addf %340, %341 : vector<2x128xf32>
    %343 = arith.negf %342 : vector<2x128xf32>
    %344 = math.exp %343 : vector<2x128xf32>
    %cst_36 = arith.constant 1.000000e+00 : f32
    %345 = vector.broadcast %cst_36 : f32 to vector<2x128xf32>
    %346 = arith.addf %345, %344 : vector<2x128xf32>
    %347 = arith.divf %345, %346 : vector<2x128xf32>
    %348 = vector.extract_strided_slice %347 {offsets = [0, 0], sizes = [2, 32], strides = [1, 1]} : vector<2x128xf32> to vector<2x32xf32>
    %349 = vector.extract_strided_slice %347 {offsets = [0, 32], sizes = [2, 32], strides = [1, 1]} : vector<2x128xf32> to vector<2x32xf32>
    %350 = vector.extract_strided_slice %347 {offsets = [0, 96], sizes = [2, 32], strides = [1, 1]} : vector<2x128xf32> to vector<2x32xf32>
    %351 = vector.extract_strided_slice %342 {offsets = [0, 64], sizes = [2, 32], strides = [1, 1]} : vector<2x128xf32> to vector<2x32xf32>
    %352 = math.tanh %351 : vector<2x32xf32>
    %353 = arith.mulf %349, %337 : vector<2x32xf32>
    %354 = arith.mulf %348, %352 : vector<2x32xf32>
    %355 = arith.addf %353, %354 : vector<2x32xf32>
    %356 = math.tanh %355 : vector<2x32xf32>
    %357 = arith.mulf %350, %356 : vector<2x32xf32>
    %358 = vector.extract_strided_slice %282 {offsets = [0, 512], sizes = [2, 128], strides = [1, 1]} : vector<2x2048xf32> to vector<2x128xf32>
    %cst_37 = arith.constant dense<0.000000e+00> : vector<2x128xf32>
    %359 = tpu.matmul %357, %283, %cst_37 {dimension_numbers = #tpu.dot_dimension_numbers<[1], [0], [0], [1], [0, 0, 1, 1], [], []>} : vector<2x32xf32>, vector<32x128xf32>, vector<2x128xf32> -> vector<2x128xf32>
    %360 = arith.addf %358, %359 : vector<2x128xf32>
    %361 = arith.negf %360 : vector<2x128xf32>
    %362 = math.exp %361 : vector<2x128xf32>
    %cst_38 = arith.constant 1.000000e+00 : f32
    %363 = vector.broadcast %cst_38 : f32 to vector<2x128xf32>
    %364 = arith.addf %363, %362 : vector<2x128xf32>
    %365 = arith.divf %363, %364 : vector<2x128xf32>
    %366 = vector.extract_strided_slice %365 {offsets = [0, 0], sizes = [2, 32], strides = [1, 1]} : vector<2x128xf32> to vector<2x32xf32>
    %367 = vector.extract_strided_slice %365 {offsets = [0, 32], sizes = [2, 32], strides = [1, 1]} : vector<2x128xf32> to vector<2x32xf32>
    %368 = vector.extract_strided_slice %365 {offsets = [0, 96], sizes = [2, 32], strides = [1, 1]} : vector<2x128xf32> to vector<2x32xf32>
    %369 = vector.extract_strided_slice %360 {offsets = [0, 64], sizes = [2, 32], strides = [1, 1]} : vector<2x128xf32> to vector<2x32xf32>
    %370 = math.tanh %369 : vector<2x32xf32>
    %371 = arith.mulf %367, %355 : vector<2x32xf32>
    %372 = arith.mulf %366, %370 : vector<2x32xf32>
    %373 = arith.addf %371, %372 : vector<2x32xf32>
    %374 = math.tanh %373 : vector<2x32xf32>
    %375 = arith.mulf %368, %374 : vector<2x32xf32>
    %376 = vector.extract_strided_slice %282 {offsets = [0, 640], sizes = [2, 128], strides = [1, 1]} : vector<2x2048xf32> to vector<2x128xf32>
    %cst_39 = arith.constant dense<0.000000e+00> : vector<2x128xf32>
    %377 = tpu.matmul %375, %283, %cst_39 {dimension_numbers = #tpu.dot_dimension_numbers<[1], [0], [0], [1], [0, 0, 1, 1], [], []>} : vector<2x32xf32>, vector<32x128xf32>, vector<2x128xf32> -> vector<2x128xf32>
    %378 = arith.addf %376, %377 : vector<2x128xf32>
    %379 = arith.negf %378 : vector<2x128xf32>
    %380 = math.exp %379 : vector<2x128xf32>
    %cst_40 = arith.constant 1.000000e+00 : f32
    %381 = vector.broadcast %cst_40 : f32 to vector<2x128xf32>
    %382 = arith.addf %381, %380 : vector<2x128xf32>
    %383 = arith.divf %381, %382 : vector<2x128xf32>
    %384 = vector.extract_strided_slice %383 {offsets = [0, 0], sizes = [2, 32], strides = [1, 1]} : vector<2x128xf32> to vector<2x32xf32>
    %385 = vector.extract_strided_slice %383 {offsets = [0, 32], sizes = [2, 32], strides = [1, 1]} : vector<2x128xf32> to vector<2x32xf32>
    %386 = vector.extract_strided_slice %383 {offsets = [0, 96], sizes = [2, 32], strides = [1, 1]} : vector<2x128xf32> to vector<2x32xf32>
    %387 = vector.extract_strided_slice %378 {offsets = [0, 64], sizes = [2, 32], strides = [1, 1]} : vector<2x128xf32> to vector<2x32xf32>
    %388 = math.tanh %387 : vector<2x32xf32>
    %389 = arith.mulf %385, %373 : vector<2x32xf32>
    %390 = arith.mulf %384, %388 : vector<2x32xf32>
    %391 = arith.addf %389, %390 : vector<2x32xf32>
    %392 = math.tanh %391 : vector<2x32xf32>
    %393 = arith.mulf %386, %392 : vector<2x32xf32>
    %394 = vector.extract_strided_slice %282 {offsets = [0, 768], sizes = [2, 128], strides = [1, 1]} : vector<2x2048xf32> to vector<2x128xf32>
    %cst_41 = arith.constant dense<0.000000e+00> : vector<2x128xf32>
    %395 = tpu.matmul %393, %283, %cst_41 {dimension_numbers = #tpu.dot_dimension_numbers<[1], [0], [0], [1], [0, 0, 1, 1], [], []>} : vector<2x32xf32>, vector<32x128xf32>, vector<2x128xf32> -> vector<2x128xf32>
    %396 = arith.addf %394, %395 : vector<2x128xf32>
    %397 = arith.negf %396 : vector<2x128xf32>
    %398 = math.exp %397 : vector<2x128xf32>
    %cst_42 = arith.constant 1.000000e+00 : f32
    %399 = vector.broadcast %cst_42 : f32 to vector<2x128xf32>
    %400 = arith.addf %399, %398 : vector<2x128xf32>
    %401 = arith.divf %399, %400 : vector<2x128xf32>
    %402 = vector.extract_strided_slice %401 {offsets = [0, 0], sizes = [2, 32], strides = [1, 1]} : vector<2x128xf32> to vector<2x32xf32>
    %403 = vector.extract_strided_slice %401 {offsets = [0, 32], sizes = [2, 32], strides = [1, 1]} : vector<2x128xf32> to vector<2x32xf32>
    %404 = vector.extract_strided_slice %401 {offsets = [0, 96], sizes = [2, 32], strides = [1, 1]} : vector<2x128xf32> to vector<2x32xf32>
    %405 = vector.extract_strided_slice %396 {offsets = [0, 64], sizes = [2, 32], strides = [1, 1]} : vector<2x128xf32> to vector<2x32xf32>
    %406 = math.tanh %405 : vector<2x32xf32>
    %407 = arith.mulf %403, %391 : vector<2x32xf32>
    %408 = arith.mulf %402, %406 : vector<2x32xf32>
    %409 = arith.addf %407, %408 : vector<2x32xf32>
    %410 = math.tanh %409 : vector<2x32xf32>
    %411 = arith.mulf %404, %410 : vector<2x32xf32>
    %412 = vector.extract_strided_slice %282 {offsets = [0, 896], sizes = [2, 128], strides = [1, 1]} : vector<2x2048xf32> to vector<2x128xf32>
    %cst_43 = arith.constant dense<0.000000e+00> : vector<2x128xf32>
    %413 = tpu.matmul %411, %283, %cst_43 {dimension_numbers = #tpu.dot_dimension_numbers<[1], [0], [0], [1], [0, 0, 1, 1], [], []>} : vector<2x32xf32>, vector<32x128xf32>, vector<2x128xf32> -> vector<2x128xf32>
    %414 = arith.addf %412, %413 : vector<2x128xf32>
    %415 = arith.negf %414 : vector<2x128xf32>
    %416 = math.exp %415 : vector<2x128xf32>
    %cst_44 = arith.constant 1.000000e+00 : f32
    %417 = vector.broadcast %cst_44 : f32 to vector<2x128xf32>
    %418 = arith.addf %417, %416 : vector<2x128xf32>
    %419 = arith.divf %417, %418 : vector<2x128xf32>
    %420 = vector.extract_strided_slice %419 {offsets = [0, 0], sizes = [2, 32], strides = [1, 1]} : vector<2x128xf32> to vector<2x32xf32>
    %421 = vector.extract_strided_slice %419 {offsets = [0, 32], sizes = [2, 32], strides = [1, 1]} : vector<2x128xf32> to vector<2x32xf32>
    %422 = vector.extract_strided_slice %419 {offsets = [0, 96], sizes = [2, 32], strides = [1, 1]} : vector<2x128xf32> to vector<2x32xf32>
    %423 = vector.extract_strided_slice %414 {offsets = [0, 64], sizes = [2, 32], strides = [1, 1]} : vector<2x128xf32> to vector<2x32xf32>
    %424 = math.tanh %423 : vector<2x32xf32>
    %425 = arith.mulf %421, %409 : vector<2x32xf32>
    %426 = arith.mulf %420, %424 : vector<2x32xf32>
    %427 = arith.addf %425, %426 : vector<2x32xf32>
    %428 = math.tanh %427 : vector<2x32xf32>
    %429 = arith.mulf %422, %428 : vector<2x32xf32>
    %430 = vector.extract_strided_slice %282 {offsets = [0, 1024], sizes = [2, 128], strides = [1, 1]} : vector<2x2048xf32> to vector<2x128xf32>
    %cst_45 = arith.constant dense<0.000000e+00> : vector<2x128xf32>
    %431 = tpu.matmul %429, %283, %cst_45 {dimension_numbers = #tpu.dot_dimension_numbers<[1], [0], [0], [1], [0, 0, 1, 1], [], []>} : vector<2x32xf32>, vector<32x128xf32>, vector<2x128xf32> -> vector<2x128xf32>
    %432 = arith.addf %430, %431 : vector<2x128xf32>
    %433 = arith.negf %432 : vector<2x128xf32>
    %434 = math.exp %433 : vector<2x128xf32>
    %cst_46 = arith.constant 1.000000e+00 : f32
    %435 = vector.broadcast %cst_46 : f32 to vector<2x128xf32>
    %436 = arith.addf %435, %434 : vector<2x128xf32>
    %437 = arith.divf %435, %436 : vector<2x128xf32>
    %438 = vector.extract_strided_slice %437 {offsets = [0, 0], sizes = [2, 32], strides = [1, 1]} : vector<2x128xf32> to vector<2x32xf32>
    %439 = vector.extract_strided_slice %437 {offsets = [0, 32], sizes = [2, 32], strides = [1, 1]} : vector<2x128xf32> to vector<2x32xf32>
    %440 = vector.extract_strided_slice %437 {offsets = [0, 96], sizes = [2, 32], strides = [1, 1]} : vector<2x128xf32> to vector<2x32xf32>
    %441 = vector.extract_strided_slice %432 {offsets = [0, 64], sizes = [2, 32], strides = [1, 1]} : vector<2x128xf32> to vector<2x32xf32>
    %442 = math.tanh %441 : vector<2x32xf32>
    %443 = arith.mulf %439, %427 : vector<2x32xf32>
    %444 = arith.mulf %438, %442 : vector<2x32xf32>
    %445 = arith.addf %443, %444 : vector<2x32xf32>
    %446 = math.tanh %445 : vector<2x32xf32>
    %447 = arith.mulf %440, %446 : vector<2x32xf32>
    %448 = vector.extract_strided_slice %282 {offsets = [0, 1152], sizes = [2, 128], strides = [1, 1]} : vector<2x2048xf32> to vector<2x128xf32>
    %cst_47 = arith.constant dense<0.000000e+00> : vector<2x128xf32>
    %449 = tpu.matmul %447, %283, %cst_47 {dimension_numbers = #tpu.dot_dimension_numbers<[1], [0], [0], [1], [0, 0, 1, 1], [], []>} : vector<2x32xf32>, vector<32x128xf32>, vector<2x128xf32> -> vector<2x128xf32>
    %450 = arith.addf %448, %449 : vector<2x128xf32>
    %451 = arith.negf %450 : vector<2x128xf32>
    %452 = math.exp %451 : vector<2x128xf32>
    %cst_48 = arith.constant 1.000000e+00 : f32
    %453 = vector.broadcast %cst_48 : f32 to vector<2x128xf32>
    %454 = arith.addf %453, %452 : vector<2x128xf32>
    %455 = arith.divf %453, %454 : vector<2x128xf32>
    %456 = vector.extract_strided_slice %455 {offsets = [0, 0], sizes = [2, 32], strides = [1, 1]} : vector<2x128xf32> to vector<2x32xf32>
    %457 = vector.extract_strided_slice %455 {offsets = [0, 32], sizes = [2, 32], strides = [1, 1]} : vector<2x128xf32> to vector<2x32xf32>
    %458 = vector.extract_strided_slice %455 {offsets = [0, 96], sizes = [2, 32], strides = [1, 1]} : vector<2x128xf32> to vector<2x32xf32>
    %459 = vector.extract_strided_slice %450 {offsets = [0, 64], sizes = [2, 32], strides = [1, 1]} : vector<2x128xf32> to vector<2x32xf32>
    %460 = math.tanh %459 : vector<2x32xf32>
    %461 = arith.mulf %457, %445 : vector<2x32xf32>
    %462 = arith.mulf %456, %460 : vector<2x32xf32>
    %463 = arith.addf %461, %462 : vector<2x32xf32>
    %464 = math.tanh %463 : vector<2x32xf32>
    %465 = arith.mulf %458, %464 : vector<2x32xf32>
    %466 = vector.extract_strided_slice %282 {offsets = [0, 1280], sizes = [2, 128], strides = [1, 1]} : vector<2x2048xf32> to vector<2x128xf32>
    %cst_49 = arith.constant dense<0.000000e+00> : vector<2x128xf32>
    %467 = tpu.matmul %465, %283, %cst_49 {dimension_numbers = #tpu.dot_dimension_numbers<[1], [0], [0], [1], [0, 0, 1, 1], [], []>} : vector<2x32xf32>, vector<32x128xf32>, vector<2x128xf32> -> vector<2x128xf32>
    %468 = arith.addf %466, %467 : vector<2x128xf32>
    %469 = arith.negf %468 : vector<2x128xf32>
    %470 = math.exp %469 : vector<2x128xf32>
    %cst_50 = arith.constant 1.000000e+00 : f32
    %471 = vector.broadcast %cst_50 : f32 to vector<2x128xf32>
    %472 = arith.addf %471, %470 : vector<2x128xf32>
    %473 = arith.divf %471, %472 : vector<2x128xf32>
    %474 = vector.extract_strided_slice %473 {offsets = [0, 0], sizes = [2, 32], strides = [1, 1]} : vector<2x128xf32> to vector<2x32xf32>
    %475 = vector.extract_strided_slice %473 {offsets = [0, 32], sizes = [2, 32], strides = [1, 1]} : vector<2x128xf32> to vector<2x32xf32>
    %476 = vector.extract_strided_slice %473 {offsets = [0, 96], sizes = [2, 32], strides = [1, 1]} : vector<2x128xf32> to vector<2x32xf32>
    %477 = vector.extract_strided_slice %468 {offsets = [0, 64], sizes = [2, 32], strides = [1, 1]} : vector<2x128xf32> to vector<2x32xf32>
    %478 = math.tanh %477 : vector<2x32xf32>
    %479 = arith.mulf %475, %463 : vector<2x32xf32>
    %480 = arith.mulf %474, %478 : vector<2x32xf32>
    %481 = arith.addf %479, %480 : vector<2x32xf32>
    %482 = math.tanh %481 : vector<2x32xf32>
    %483 = arith.mulf %476, %482 : vector<2x32xf32>
    %484 = vector.extract_strided_slice %282 {offsets = [0, 1408], sizes = [2, 128], strides = [1, 1]} : vector<2x2048xf32> to vector<2x128xf32>
    %cst_51 = arith.constant dense<0.000000e+00> : vector<2x128xf32>
    %485 = tpu.matmul %483, %283, %cst_51 {dimension_numbers = #tpu.dot_dimension_numbers<[1], [0], [0], [1], [0, 0, 1, 1], [], []>} : vector<2x32xf32>, vector<32x128xf32>, vector<2x128xf32> -> vector<2x128xf32>
    %486 = arith.addf %484, %485 : vector<2x128xf32>
    %487 = arith.negf %486 : vector<2x128xf32>
    %488 = math.exp %487 : vector<2x128xf32>
    %cst_52 = arith.constant 1.000000e+00 : f32
    %489 = vector.broadcast %cst_52 : f32 to vector<2x128xf32>
    %490 = arith.addf %489, %488 : vector<2x128xf32>
    %491 = arith.divf %489, %490 : vector<2x128xf32>
    %492 = vector.extract_strided_slice %491 {offsets = [0, 0], sizes = [2, 32], strides = [1, 1]} : vector<2x128xf32> to vector<2x32xf32>
    %493 = vector.extract_strided_slice %491 {offsets = [0, 32], sizes = [2, 32], strides = [1, 1]} : vector<2x128xf32> to vector<2x32xf32>
    %494 = vector.extract_strided_slice %491 {offsets = [0, 96], sizes = [2, 32], strides = [1, 1]} : vector<2x128xf32> to vector<2x32xf32>
    %495 = vector.extract_strided_slice %486 {offsets = [0, 64], sizes = [2, 32], strides = [1, 1]} : vector<2x128xf32> to vector<2x32xf32>
    %496 = math.tanh %495 : vector<2x32xf32>
    %497 = arith.mulf %493, %481 : vector<2x32xf32>
    %498 = arith.mulf %492, %496 : vector<2x32xf32>
    %499 = arith.addf %497, %498 : vector<2x32xf32>
    %500 = math.tanh %499 : vector<2x32xf32>
    %501 = arith.mulf %494, %500 : vector<2x32xf32>
    %502 = vector.extract_strided_slice %282 {offsets = [0, 1536], sizes = [2, 128], strides = [1, 1]} : vector<2x2048xf32> to vector<2x128xf32>
    %cst_53 = arith.constant dense<0.000000e+00> : vector<2x128xf32>
    %503 = tpu.matmul %501, %283, %cst_53 {dimension_numbers = #tpu.dot_dimension_numbers<[1], [0], [0], [1], [0, 0, 1, 1], [], []>} : vector<2x32xf32>, vector<32x128xf32>, vector<2x128xf32> -> vector<2x128xf32>
    %504 = arith.addf %502, %503 : vector<2x128xf32>
    %505 = arith.negf %504 : vector<2x128xf32>
    %506 = math.exp %505 : vector<2x128xf32>
    %cst_54 = arith.constant 1.000000e+00 : f32
    %507 = vector.broadcast %cst_54 : f32 to vector<2x128xf32>
    %508 = arith.addf %507, %506 : vector<2x128xf32>
    %509 = arith.divf %507, %508 : vector<2x128xf32>
    %510 = vector.extract_strided_slice %509 {offsets = [0, 0], sizes = [2, 32], strides = [1, 1]} : vector<2x128xf32> to vector<2x32xf32>
    %511 = vector.extract_strided_slice %509 {offsets = [0, 32], sizes = [2, 32], strides = [1, 1]} : vector<2x128xf32> to vector<2x32xf32>
    %512 = vector.extract_strided_slice %509 {offsets = [0, 96], sizes = [2, 32], strides = [1, 1]} : vector<2x128xf32> to vector<2x32xf32>
    %513 = vector.extract_strided_slice %504 {offsets = [0, 64], sizes = [2, 32], strides = [1, 1]} : vector<2x128xf32> to vector<2x32xf32>
    %514 = math.tanh %513 : vector<2x32xf32>
    %515 = arith.mulf %511, %499 : vector<2x32xf32>
    %516 = arith.mulf %510, %514 : vector<2x32xf32>
    %517 = arith.addf %515, %516 : vector<2x32xf32>
    %518 = math.tanh %517 : vector<2x32xf32>
    %519 = arith.mulf %512, %518 : vector<2x32xf32>
    %520 = vector.extract_strided_slice %282 {offsets = [0, 1664], sizes = [2, 128], strides = [1, 1]} : vector<2x2048xf32> to vector<2x128xf32>
    %cst_55 = arith.constant dense<0.000000e+00> : vector<2x128xf32>
    %521 = tpu.matmul %519, %283, %cst_55 {dimension_numbers = #tpu.dot_dimension_numbers<[1], [0], [0], [1], [0, 0, 1, 1], [], []>} : vector<2x32xf32>, vector<32x128xf32>, vector<2x128xf32> -> vector<2x128xf32>
    %522 = arith.addf %520, %521 : vector<2x128xf32>
    %523 = arith.negf %522 : vector<2x128xf32>
    %524 = math.exp %523 : vector<2x128xf32>
    %cst_56 = arith.constant 1.000000e+00 : f32
    %525 = vector.broadcast %cst_56 : f32 to vector<2x128xf32>
    %526 = arith.addf %525, %524 : vector<2x128xf32>
    %527 = arith.divf %525, %526 : vector<2x128xf32>
    %528 = vector.extract_strided_slice %527 {offsets = [0, 0], sizes = [2, 32], strides = [1, 1]} : vector<2x128xf32> to vector<2x32xf32>
    %529 = vector.extract_strided_slice %527 {offsets = [0, 32], sizes = [2, 32], strides = [1, 1]} : vector<2x128xf32> to vector<2x32xf32>
    %530 = vector.extract_strided_slice %527 {offsets = [0, 96], sizes = [2, 32], strides = [1, 1]} : vector<2x128xf32> to vector<2x32xf32>
    %531 = vector.extract_strided_slice %522 {offsets = [0, 64], sizes = [2, 32], strides = [1, 1]} : vector<2x128xf32> to vector<2x32xf32>
    %532 = math.tanh %531 : vector<2x32xf32>
    %533 = arith.mulf %529, %517 : vector<2x32xf32>
    %534 = arith.mulf %528, %532 : vector<2x32xf32>
    %535 = arith.addf %533, %534 : vector<2x32xf32>
    %536 = math.tanh %535 : vector<2x32xf32>
    %537 = arith.mulf %530, %536 : vector<2x32xf32>
    %538 = vector.extract_strided_slice %282 {offsets = [0, 1792], sizes = [2, 128], strides = [1, 1]} : vector<2x2048xf32> to vector<2x128xf32>
    %cst_57 = arith.constant dense<0.000000e+00> : vector<2x128xf32>
    %539 = tpu.matmul %537, %283, %cst_57 {dimension_numbers = #tpu.dot_dimension_numbers<[1], [0], [0], [1], [0, 0, 1, 1], [], []>} : vector<2x32xf32>, vector<32x128xf32>, vector<2x128xf32> -> vector<2x128xf32>
    %540 = arith.addf %538, %539 : vector<2x128xf32>
    %541 = arith.negf %540 : vector<2x128xf32>
    %542 = math.exp %541 : vector<2x128xf32>
    %cst_58 = arith.constant 1.000000e+00 : f32
    %543 = vector.broadcast %cst_58 : f32 to vector<2x128xf32>
    %544 = arith.addf %543, %542 : vector<2x128xf32>
    %545 = arith.divf %543, %544 : vector<2x128xf32>
    %546 = vector.extract_strided_slice %545 {offsets = [0, 0], sizes = [2, 32], strides = [1, 1]} : vector<2x128xf32> to vector<2x32xf32>
    %547 = vector.extract_strided_slice %545 {offsets = [0, 32], sizes = [2, 32], strides = [1, 1]} : vector<2x128xf32> to vector<2x32xf32>
    %548 = vector.extract_strided_slice %545 {offsets = [0, 96], sizes = [2, 32], strides = [1, 1]} : vector<2x128xf32> to vector<2x32xf32>
    %549 = vector.extract_strided_slice %540 {offsets = [0, 64], sizes = [2, 32], strides = [1, 1]} : vector<2x128xf32> to vector<2x32xf32>
    %550 = math.tanh %549 : vector<2x32xf32>
    %551 = arith.mulf %547, %535 : vector<2x32xf32>
    %552 = arith.mulf %546, %550 : vector<2x32xf32>
    %553 = arith.addf %551, %552 : vector<2x32xf32>
    %554 = math.tanh %553 : vector<2x32xf32>
    %555 = arith.mulf %548, %554 : vector<2x32xf32>
    %556 = vector.extract_strided_slice %282 {offsets = [0, 1920], sizes = [2, 128], strides = [1, 1]} : vector<2x2048xf32> to vector<2x128xf32>
    %cst_59 = arith.constant dense<0.000000e+00> : vector<2x128xf32>
    %557 = tpu.matmul %555, %283, %cst_59 {dimension_numbers = #tpu.dot_dimension_numbers<[1], [0], [0], [1], [0, 0, 1, 1], [], []>} : vector<2x32xf32>, vector<32x128xf32>, vector<2x128xf32> -> vector<2x128xf32>
    %558 = arith.addf %556, %557 : vector<2x128xf32>
    %559 = arith.negf %558 : vector<2x128xf32>
    %560 = math.exp %559 : vector<2x128xf32>
    %cst_60 = arith.constant 1.000000e+00 : f32
    %561 = vector.broadcast %cst_60 : f32 to vector<2x128xf32>
    %562 = arith.addf %561, %560 : vector<2x128xf32>
    %563 = arith.divf %561, %562 : vector<2x128xf32>
    %564 = vector.extract_strided_slice %563 {offsets = [0, 0], sizes = [2, 32], strides = [1, 1]} : vector<2x128xf32> to vector<2x32xf32>
    %565 = vector.extract_strided_slice %563 {offsets = [0, 32], sizes = [2, 32], strides = [1, 1]} : vector<2x128xf32> to vector<2x32xf32>
    %566 = vector.extract_strided_slice %563 {offsets = [0, 96], sizes = [2, 32], strides = [1, 1]} : vector<2x128xf32> to vector<2x32xf32>
    %567 = vector.extract_strided_slice %558 {offsets = [0, 64], sizes = [2, 32], strides = [1, 1]} : vector<2x128xf32> to vector<2x32xf32>
    %568 = math.tanh %567 : vector<2x32xf32>
    %569 = arith.mulf %565, %553 : vector<2x32xf32>
    %570 = arith.mulf %564, %568 : vector<2x32xf32>
    %571 = arith.addf %569, %570 : vector<2x32xf32>
    %572 = math.tanh %571 : vector<2x32xf32>
    %573 = arith.mulf %566, %572 : vector<2x32xf32>
    %c0_61 = arith.constant 0 : index
    %c0_62 = arith.constant 0 : index
    %574 = vector.load %arg12[%c0_61, %c0_62] : memref<32x16xf32, #tpu.memory_space<vmem>>, vector<32x16xf32>
    %cst_63 = arith.constant dense<0.000000e+00> : vector<2x16xf32>
    %575 = tpu.matmul %573, %574, %cst_63 {dimension_numbers = #tpu.dot_dimension_numbers<[1], [0], [0], [1], [0, 0, 1, 1], [], []>} : vector<2x32xf32>, vector<32x16xf32>, vector<2x16xf32> -> vector<2x16xf32>
    %c0_64 = arith.constant 0 : index
    %c0_65 = arith.constant 0 : index
    %576 = vector.load %arg13[%c0_64, %c0_65] : memref<1x16xf32, #tpu.memory_space<vmem>>, vector<1x16xf32>
    %577 = vector.broadcast %576 : vector<1x16xf32> to vector<2x16xf32>
    %578 = arith.addf %575, %577 : vector<2x16xf32>
    %cst_66 = arith.constant 0.000000e+00 : f32
    %579 = vector.broadcast %cst_66 : f32 to vector<2x16xf32>
    %580 = arith.maximumf %578, %579 : vector<2x16xf32>
    %c0_67 = arith.constant 0 : index
    %c0_68 = arith.constant 0 : index
    %581 = vector.load %arg14[%c0_67, %c0_68] : memref<16x1xf32, #tpu.memory_space<vmem>>, vector<16x1xf32>
    %cst_69 = arith.constant dense<0.000000e+00> : vector<2x1xf32>
    %582 = tpu.matmul %580, %581, %cst_69 {dimension_numbers = #tpu.dot_dimension_numbers<[1], [0], [0], [1], [0, 0, 1, 1], [], []>} : vector<2x16xf32>, vector<16x1xf32>, vector<2x1xf32> -> vector<2x1xf32>
    %c0_70 = arith.constant 0 : index
    %c0_71 = arith.constant 0 : index
    %583 = vector.load %arg15[%c0_70, %c0_71] : memref<1x1xf32, #tpu.memory_space<vmem>>, vector<1x1xf32>
    %584 = vector.broadcast %583 : vector<1x1xf32> to vector<2x1xf32>
    %585 = arith.addf %582, %584 : vector<2x1xf32>
    %586 = arith.negf %585 : vector<2x1xf32>
    %587 = math.exp %586 : vector<2x1xf32>
    %cst_72 = arith.constant 1.000000e+00 : f32
    %588 = vector.broadcast %cst_72 : f32 to vector<2x1xf32>
    %589 = arith.addf %588, %587 : vector<2x1xf32>
    %590 = arith.divf %588, %589 : vector<2x1xf32>
    %c0_73 = arith.constant 0 : index
    %c0_74 = arith.constant 0 : index
    %591 = vector.load %arg16[%c0_73, %c0_74] : memref<2x1xf32, #tpu.memory_space<vmem>>, vector<2x1xf32>
    tpu.vector_store %arg16[%c0_73, %c0_74], %590 {strides = array<i32>} : memref<2x1xf32, #tpu.memory_space<vmem>>, vector<2x1xf32>,
    return
  }
  func.func @transform_0(%arg0: i32) -> (i32, i32) {
    %c0_i32 = arith.constant 0 : i32
    %c0_i32_0 = arith.constant 0 : i32
    return %arg0, %c0_i32 : i32, i32
  }
  func.func @transform_1(%arg0: i32) -> (i32, i32) {
    %c0_i32 = arith.constant 0 : i32
    %c0_i32_0 = arith.constant 0 : i32
    %c0_i32_1 = arith.constant 0 : i32
    return %c0_i32, %c0_i32_0 : i32, i32
  }
  func.func @transform_2(%arg0: i32) -> (i32, i32) {
    %c0_i32 = arith.constant 0 : i32
    %c0_i32_0 = arith.constant 0 : i32
    %c0_i32_1 = arith.constant 0 : i32
    return %c0_i32, %c0_i32_0 : i32, i32
  }
  func.func @transform_3(%arg0: i32) -> (i32, i32) {
    %c0_i32 = arith.constant 0 : i32
    %c0_i32_0 = arith.constant 0 : i32
    %c0_i32_1 = arith.constant 0 : i32
    return %c0_i32, %c0_i32_0 : i32, i32
  }
  func.func @transform_4(%arg0: i32) -> (i32, i32) {
    %c0_i32 = arith.constant 0 : i32
    %c0_i32_0 = arith.constant 0 : i32
    %c0_i32_1 = arith.constant 0 : i32
    return %c0_i32, %c0_i32_0 : i32, i32
  }
  func.func @transform_5(%arg0: i32) -> (i32, i32) {
    %c0_i32 = arith.constant 0 : i32
    %c0_i32_0 = arith.constant 0 : i32
    %c0_i32_1 = arith.constant 0 : i32
    return %c0_i32, %c0_i32_0 : i32, i32
  }
  func.func @transform_6(%arg0: i32) -> (i32, i32) {
    %c0_i32 = arith.constant 0 : i32
    %c0_i32_0 = arith.constant 0 : i32
    %c0_i32_1 = arith.constant 0 : i32
    return %c0_i32, %c0_i32_0 : i32, i32
  }
  func.func @transform_7(%arg0: i32) -> (i32, i32) {
    %c0_i32 = arith.constant 0 : i32
    %c0_i32_0 = arith.constant 0 : i32
    %c0_i32_1 = arith.constant 0 : i32
    return %c0_i32, %c0_i32_0 : i32, i32
  }
  func.func @transform_8(%arg0: i32) -> (i32, i32) {
    %c0_i32 = arith.constant 0 : i32
    %c0_i32_0 = arith.constant 0 : i32
    %c0_i32_1 = arith.constant 0 : i32
    return %c0_i32, %c0_i32_0 : i32, i32
  }
  func.func @transform_9(%arg0: i32) -> (i32, i32) {
    %c0_i32 = arith.constant 0 : i32
    %c0_i32_0 = arith.constant 0 : i32
    %c0_i32_1 = arith.constant 0 : i32
    return %c0_i32, %c0_i32_0 : i32, i32
  }
  func.func @transform_10(%arg0: i32) -> (i32, i32) {
    %c0_i32 = arith.constant 0 : i32
    %c0_i32_0 = arith.constant 0 : i32
    %c0_i32_1 = arith.constant 0 : i32
    return %c0_i32, %c0_i32_0 : i32, i32
  }
  func.func @transform_11(%arg0: i32) -> (i32, i32) {
    %c0_i32 = arith.constant 0 : i32
    %c0_i32_0 = arith.constant 0 : i32
    %c0_i32_1 = arith.constant 0 : i32
    return %c0_i32, %c0_i32_0 : i32, i32
  }
  func.func @transform_12(%arg0: i32) -> (i32, i32) {
    %c0_i32 = arith.constant 0 : i32
    %c0_i32_0 = arith.constant 0 : i32
    %c0_i32_1 = arith.constant 0 : i32
    return %c0_i32, %c0_i32_0 : i32, i32
  }
  func.func @transform_13(%arg0: i32) -> (i32, i32) {
    %c0_i32 = arith.constant 0 : i32
    %c0_i32_0 = arith.constant 0 : i32
    %c0_i32_1 = arith.constant 0 : i32
    return %c0_i32, %c0_i32_0 : i32, i32
  }
  func.func @transform_14(%arg0: i32) -> (i32, i32) {
    %c0_i32 = arith.constant 0 : i32
    %c0_i32_0 = arith.constant 0 : i32
    %c0_i32_1 = arith.constant 0 : i32
    return %c0_i32, %c0_i32_0 : i32, i32
  }
  func.func @transform_15(%arg0: i32) -> (i32, i32) {
    %c0_i32 = arith.constant 0 : i32
    %c0_i32_0 = arith.constant 0 : i32
    return %arg0, %c0_i32 : i32, i32
  }
}

</mosaic_0001>

<bundles_post_ra>
// kernel: cnn_lstm_forward.1
= control target key start
LH: loop header
LB: loop body
LE: loop exit
PB: predicated region body
PF: predicated region fallthrough
CT: control target
= control target key end

     0   :  { %s6389_s0 = inlined_call_operand.vmem [shape: f32[2,324], index: 0, kind: input, shape index: {}]   ;;  %s6390_s1 = inlined_call_operand.vmem [shape: f32[8,9], index: 1, kind: input, shape index: {}]   ;;  %s6391_s2 = inlined_call_operand.vmem [shape: f32[8,1], index: 2, kind: input, shape index: {}]   ;;  %s6392_s3 = inlined_call_operand.vmem [shape: f32[267,100], index: 3, kind: input, shape index: {}]   ;;  %s6393_s4 = inlined_call_operand.vmem [shape: f32[16,36], index: 4, kind: input, shape index: {}]   ;;  %s6394_s5 = inlined_call_operand.vmem [shape: f32[16,1], index: 5, kind: input, shape index: {}]   ;;  %s6395_s6 = inlined_call_operand.vmem [shape: f32[67,16], index: 6, kind: input, shape index: {}]   ;;  %s6396_s7 = inlined_call_operand.hbm [shape: f32[16,2048], index: 7, kind: input, shape index: {}]   ;;  %s6397_s8 = inlined_call_operand.hbm [shape: f32[16,2048], index: 8, kind: input, shape index: {}]   ;;  %s6398_s9 = inlined_call_operand.vmem [shape: f32[1,2048], index: 9, kind: input, shape index: {}]   ;;  %s6399_s10 = inlined_call_operand.vmem [shape: f32[32,128], index: 10, kind: input, shape index: {}]   ;;  %s6400_s11 = inlined_call_operand.vmem [shape: f32[32,16], index: 11, kind: input, shape index: {}]   ;;  %s6401_s12 = inlined_call_operand.vmem [shape: f32[1,16], index: 12, kind: input, shape index: {}]   ;;  %s6402_s13 = inlined_call_operand.vmem [shape: f32[16,1], index: 13, kind: input, shape index: {}]   ;;  %s6403_s14 = inlined_call_operand.<no memory space> [shape: f32[1,1], index: 14, kind: input, shape index: {}]   ;;  %s6404_s15 = inlined_call_operand.vmem [shape: f32[2,1], index: 15, kind: output, shape index: {}]  }
   0x1   :  { %v20_v0 = vstv %s6403_s14 }
   0x2   :  { %21 = vst [vmem:[#allocation2] sm:$0x1] %v20_v0 }
   0x3   :  { %22 = vsyncpa [#allocation4], 0 }
   0x4   :  { %23 = vsyncpa [#allocation6], 0  ;;  %s5087_s20 = smov [#allocation3]   ;;  %s5039_s24 = scalar_lea.hbm %s6396_s7, 4096 }
   0x5   :  { %s43_s21 = sshll.u32 %s5087_s20, 4  ;;  %p5040_p0 = scmp.ne.s32.totalorder %s6396_s7, %s5039_s24  ;;  %s44_s21 = int_to_ptr.vmem [resolvable:$true] %s43_s21 }
   0x6   :  { %p5043_p1 = scmp.lt.u32.totalorder %s5039_s24, %s6396_s7 }
   0x8   :  { %p5045_p2 = pnand %p5043_p1, %p5040_p0 }
   0xa   :  { %5048 = shalt.err (!%p5045_p2)
}
   0xb   :  { %s5049_s14 = scalar_lea.vmem %s44_s21, 4096  ;;  %p5054_p4 = scmp.lt.s32.totalorder %s44_s21, %s44_s21 }
   0xc   :  { %p5050_p3 = scmp.ne.s32.totalorder %s44_s21, %s5049_s14  ;;  %p5055_p5 = scmp.lt.s32.totalorder %s5049_s14, %s5049_s14 }
   0xe   :  { %p5056_p6 = por %p5055_p5, %p5054_p4 }
  0x10   :  { %p5057_p7 = pnand %p5056_p6, %p5050_p3 }
  0x12   :  { %5060 = shalt.err (!%p5057_p7)
}
  0x13   :  { %s5088_s29 = smov 2048   ;;  %s5089_s30 = smov 128  }
  0x14   :  { %49 = dma.hbm_to_vmem [thread:$0]  %s6396_s7, 4096, %s44_s21, [#allocation4], %s5088_s29, %s5088_s29, %s5089_s30  }
  0x15   :  { %s5090_s18 = smov [#allocation5]   ;;  %s5061_s23 = scalar_lea.hbm %s6397_s8, 4096 }
  0x16   :  { %s55_s19 = sshll.u32 %s5090_s18, 4  ;;  %p5062_p8 = scmp.ne.s32.totalorder %s6397_s8, %s5061_s23  ;;  %s56_s19 = int_to_ptr.vmem [resolvable:$true] %s55_s19 }
  0x17   :  { %p5065_p9 = scmp.lt.u32.totalorder %s5061_s23, %s6397_s8 }
  0x19   :  { %p5067_p10 = pnand %p5065_p9, %p5062_p8 }
  0x1b   :  { %5070 = shalt.err (!%p5067_p10)
}
  0x1c   :  { %s5071_s28 = scalar_lea.vmem %s56_s19, 4096  ;;  %p5076_p12 = scmp.lt.s32.totalorder %s56_s19, %s56_s19 }
  0x1d   :  { %p5072_p11 = scmp.ne.s32.totalorder %s56_s19, %s5071_s28  ;;  %p5077_p13 = scmp.lt.s32.totalorder %s5071_s28, %s5071_s28 }
  0x1f   :  { %p5078_p0 = por %p5077_p13, %p5076_p12 }
  0x21   :  { %p5079_p1 = pnand %p5078_p0, %p5072_p11 }
  0x23   :  { %5082 = shalt.err (!%p5079_p1)
}
  0x24   :  { %61 = dma.hbm_to_vmem [thread:$0]  %s6397_s8, 4096, %s56_s19, [#allocation6], %s5088_s29, %s5088_s29, %s5089_s30  }
  0x25   :  { %5083 = dma.done.wait [#allocation4], 4096  }
  0x26   :  { %5084 = vsyncadd [#allocation4], 4294963200 }
  0x27   :  { %5085 = dma.done.wait [#allocation6], 4096  }
  0x28   :  { %5086 = vsyncadd [#allocation6], 4294963200  ;;  %v5091_v1 = vmov 1   ;;  %v5092_v2 = vmov 3   ;;  %v130_v3 = vld [vmem:[%s6390_s1] sm:$0xff]  ;;  %v5093_v4 = vmov 2   ;;  %v86_v14 = vlaneseq }
  0x29   :  { %4825 = vset.pattern.permute.xlu0 %v5091_v1  ;;  %4827 = vset.pattern.permute.xlu1 %v5092_v2  ;;  %v5094_v5 = vmov 4   ;;  %v5095_v6 = vmov 5   ;;  %v5096_v7 = vmov 6   ;;  %v5097_v8 = vmov 7   ;;  %v342_v11 = vld [vmem:[%s6391_s2] sm:$0xff]  ;;  %s5102_s2 = smov 126  }
  0x2a   :  { %143 = vperm.xlu0 %4825, %v130_v3   ;;  %193 = vperm.xlu1 %4827, %v130_v3   ;;  %v5098_v9 = vmov 0   ;;  %v5099_v10 = vmov 8   ;;  %v5100_v12 = vmov 1983009808   ;;  %v5269_v16 = vshrl.u32 %v86_v14, 7  ;;  %s5103_s17 = smov 110  }
  0x2b   :  { %v84_v13 = vunpack.c.l.s4 %v5100_v12  ;;  %v80_v17 = vld [vmem:[%s6389_s0] sm:$0x3f]  ;;  %vm118_vm0 = vcmask 1041408   ;;  %vm122_vm1 = vcmask 1043456   ;;  %vm126_vm2 = vcmask 1045504   ;;  %s5101_s0 = smov 127  }
  0x2c   :  { %v101_v19 = vcombine.low %v80_v17, %v80_v17  ;;  %v82_v22 = vcombine.high %v80_v17, %v80_v17  ;;  %s5104_s18 = smov 109   ;;  %s5105_s19 = smov 108   ;;  %vm158_vm3 = vcmask 1039360   ;;  %vm183_vm4 = vcmask 1031168  }
  0x2d   :  { %v85_v15 = vunpack.c.0.s8 %v84_v13  ;;  %s5106_s20 = smov 92   ;;  %s5107_s22 = smov 91   ;;  %vm208_vm5 = vcmask 900096   ;;  %vm233_vm6 = vcmask 891904   ;;  %vm258_vm7 = vcmask 883712  }
  0x2e   :  { %4826 = vset.pattern.permute.xlu0 %v5093_v4  ;;  %4828 = vset.pattern.permute.xlu1 %v5094_v5  ;;  %s5108_s23 = smov 90   ;;  %vm283_vm8 = vcmask 752640   ;;  %vm308_vm9 = vcmask 744448   ;;  %vm333_vm10 = vcmask 736256   ;;  %vm426_vm11 = vcmask 1042432   ;;  %s5141_s7 = smov 117  }
  0x2f   :  { %168 = vperm.xlu0 %4826, %v130_v3   ;;  %218 = vperm.xlu1 %4828, %v130_v3   ;;  %v88_v18 = vsub.s32 %v85_v15, %v5269_v16  ;;  %vm5110_vm12 = vmmov 1   ;;  %vm5111_vm14 = vmmov 0   ;;  %vm422_vm15 = vcmask 89088   ;;  %s5142_s21 = smov 116   ;;  %s5143_s14 = smov 107  }
  0x30   :  { %vm4610_vm13 = vmpackc.low %vm426_vm11, %vm5110_vm12  ;;  %s5144_s16 = smov 106   ;;  %s5146_s29 = smov 32  }
  0x31   :  { %v89_v20 = vrot.slane %v80_v17, %v88_v18  ;;  %v108_v21 = vrot.slane %v101_v19, %v88_v18  ;;  %v96_v26 = vrot.slane %v82_v22, %v88_v18 }
  0x33   :  { %4829 = vset.pattern.permute.xlu1 %v5095_v6  ;;  %4830 = vset.pattern.permute.xlu0 %v5096_v7  ;;  %v97_v23 = vcombine.high %v89_v20, %v89_v20  ;;  %v109_v24 = vcombine.high %v108_v21, %v108_v21  ;;  %v112_v25 = vcombine.low %v89_v20, %v89_v20 }
  0x34   :  { %243 = vperm.xlu1 %4829, %v130_v3   ;;  %268 = vperm.xlu0 %4830, %v130_v3   ;;  %v119_v27 = vsel %vm118_vm0, %v89_v20, %v108_v21  ;;  %v116_v29 = vcombine.low %v108_v21, %v108_v21  ;;  %v113_v32 = vcombine.low %v96_v26, %v96_v26 }
  0x35   :  { %v120_v28 = vsel %vm118_vm0, %v97_v23, %v109_v24  ;;  %v123_v30 = vsel %vm122_vm1, %v119_v27, %v112_v25  ;;  %v121_v33 = vsel %vm118_vm0, %v96_v26, %v89_v20 }
  0x36   :  { %v124_v31 = vsel %vm122_vm1, %v120_v28, %v89_v20  ;;  %v5281_v34 = vsel %vm126_vm2, %v123_v30, %v116_v29  ;;  %v125_v36 = vsel %vm122_vm1, %v121_v33, %v113_v32 }
  0x37   :  { %v5284_v35 = vsel %vm126_vm2, %v124_v31, %v108_v21  ;;  %v5290_v40 = vsel %vm126_vm2, %v125_v36, %v112_v25 }
  0x38   :  { %4831 = vset.pattern.permute.xlu1 %v5097_v8  ;;  %4833 = vset.pattern.permute.xlu0 %v5098_v9 }
  0x39   :  { %293 = vperm.xlu1 %4831, %v130_v3   ;;  %133 = vperm.xlu0 %4833, %v130_v3  }
  0x3d   :  { %4832 = vset.pattern.permute.xlu1 %v5099_v10  ;;  %4846 = vset.pattern.permute.xlu0 %v5091_v1 }
  0x3e   :  { %318 = vperm.xlu1 %4832, %v130_v3  }
  0x42   :  { %4834 = vset.pattern.permute.xlu1 %v5098_v9 }
  0x43   :  { %345 = vperm.xlu1 %4834, %v342_v11  }
  0x47   :  { %4845 = vset.pattern.permute.xlu1 %v5091_v1 }
  0xa9   :  { %v144_v37 = vpop.permute.xlu0 %143  ;;  %v194_v43 = vpop.permute.xlu1 %193 }
  0xaa   :  { %v146_v38 = vmul.f32 %v144_v37, %v5281_v34  ;;  %v147_v39 = vmul.f32 %v144_v37, %v5284_v35  ;;  %v148_v42 = vmul.f32 %v144_v37, %v5290_v40  ;;  %v197_v45 = vmul.f32 %v194_v43, %v5284_v35 }
  0xab   :  { %v196_v49 = vmul.f32 %v194_v43, %v5281_v34  ;;  %v198_v51 = vmul.f32 %v194_v43, %v5290_v40 }
  0xac   :  { %152 = vrot.lane.b32.xlu0 %v146_v38, %s5101_s0  ;;  %154 = vrot.lane.b32.xlu1 %v147_v39, %s5101_s0 }
  0xae   :  { %v169_v41 = vpop.permute.xlu0 %168  ;;  %v219_v47 = vpop.permute.xlu1 %218 }
  0xaf   :  { %v173_v44 = vmul.f32 %v169_v41, %v5290_v40  ;;  %v172_v46 = vmul.f32 %v169_v41, %v5284_v35  ;;  %v171_v48 = vmul.f32 %v169_v41, %v5281_v34  ;;  %v223_v50 = vmul.f32 %v219_v47, %v5290_v40 }
  0xb0   :  { %156 = vrot.lane.b32.xlu1 %v148_v42, %s5101_s0  ;;  %v222_v54 = vmul.f32 %v219_v47, %v5284_v35  ;;  %v221_v55 = vmul.f32 %v219_v47, %v5281_v34 }
  0xb1   :  { %181 = vrot.lane.b32.xlu0 %v173_v44, %s5102_s2 }
  0xb3   :  { %v244_v52 = vpop.permute.xlu1 %243  ;;  %v269_v56 = vpop.permute.xlu0 %268 }
  0xb4   :  { %179 = vrot.lane.b32.xlu1 %v172_v46, %s5102_s2  ;;  %v247_v53 = vmul.f32 %v244_v52, %v5284_v35  ;;  %v246_v57 = vmul.f32 %v244_v52, %v5281_v34  ;;  %v273_v58 = vmul.f32 %v269_v56, %v5290_v40  ;;  %v248_v59 = vmul.f32 %v244_v52, %v5290_v40 }
  0xb5   :  { %204 = vrot.lane.b32.xlu0 %v197_v45, %s5103_s17  ;;  %v272_v61 = vmul.f32 %v269_v56, %v5284_v35  ;;  %v271_v62 = vmul.f32 %v269_v56, %v5281_v34 }
  0xb8   :  { %177 = vrot.lane.b32.xlu1 %v171_v48, %s5102_s2  ;;  %v294_v60 = vpop.permute.xlu1 %293  ;;  %v134_v15 = vpop.permute.xlu0 %133 }
  0xb9   :  { %202 = vrot.lane.b32.xlu0 %v196_v49, %s5103_s17  ;;  %v297_v63 = vmul.f32 %v294_v60, %v5284_v35  ;;  %v298_v0 = vmul.f32 %v294_v60, %v5290_v40  ;;  %v296_v11 = vmul.f32 %v294_v60, %v5281_v34  ;;  %v138_v29 = vmul.f32 %v134_v15, %v5290_v40 }
  0xba   :  { %v136_v36 = vmul.f32 %v134_v15, %v5281_v34  ;;  %v137_v44 = vmul.f32 %v134_v15, %v5284_v35 }
  0xbc   :  { %206 = vrot.lane.b32.xlu1 %v198_v51, %s5103_s17 }
  0xbd   :  { %231 = vrot.lane.b32.xlu0 %v223_v50, %s5104_s18  ;;  %v319_v1 = vpop.permute.xlu1 %318 }
  0xbe   :  { %v322_v3 = vmul.f32 %v319_v1, %v5284_v35  ;;  %v323_v12 = vmul.f32 %v319_v1, %v5290_v40  ;;  %v321_v13 = vmul.f32 %v319_v1, %v5281_v34 }
  0xc0   :  { %229 = vrot.lane.b32.xlu1 %v222_v54, %s5104_s18 }
  0xc1   :  { %254 = vrot.lane.b32.xlu0 %v247_v53, %s5105_s19 }
  0xc2   :  { %v5326_v14 = vpop.permute.xlu1 %345 }
  0xc4   :  { %227 = vrot.lane.b32.xlu1 %v221_v55, %s5104_s18 }
  0xc5   :  { %252 = vrot.lane.b32.xlu0 %v246_v57, %s5105_s19 }
  0xc8   :  { %256 = vrot.lane.b32.xlu1 %v248_v59, %s5105_s19 }
  0xc9   :  { %281 = vrot.lane.b32.xlu0 %v273_v58, %s5106_s20 }
  0xcc   :  { %279 = vrot.lane.b32.xlu1 %v272_v61, %s5106_s20 }
  0xcd   :  { %277 = vrot.lane.b32.xlu0 %v271_v62, %s5106_s20 }
  0xd0   :  { %304 = vrot.lane.b32.xlu1 %v297_v63, %s5107_s22 }
  0xd1   :  { %306 = vrot.lane.b32.xlu0 %v298_v0, %s5107_s22 }
  0xd4   :  { %302 = vrot.lane.b32.xlu1 %v296_v11, %s5107_s22 }
  0xd5   :  { %329 = vrot.lane.b32.xlu0 %v322_v3, %s5108_s23 }
  0xd8   :  { %331 = vrot.lane.b32.xlu1 %v323_v12, %s5108_s23 }
  0xd9   :  { %327 = vrot.lane.b32.xlu0 %v321_v13, %s5108_s23 }
 0x11e   :  { %v153_v17 = vpop.permute.xlu0 %152  ;;  %v155_v18 = vpop.permute.xlu1 %154 }
 0x11f   :  { %v159_v33 = vsel %vm158_vm3, %v153_v17, %v155_v18 }
 0x120   :  { %v164_v39 = vadd.f32 %v159_v33, %v136_v36 }
 0x122   :  { %v157_v19 = vpop.permute.xlu1 %156 }
 0x123   :  { %v182_v20 = vpop.permute.xlu0 %181  ;;  %v166_v31 = vadd.f32 %v157_v19, %v138_v29  ;;  %v160_v41 = vsel %vm158_vm3, %v155_v18, %v157_v19 }
 0x124   :  { %v165_v47 = vadd.f32 %v160_v41, %v137_v44 }
 0x125   :  { %v191_v42 = vadd.f32 %v182_v20, %v166_v31 }
 0x126   :  { %v180_v21 = vpop.permute.xlu1 %179 }
 0x127   :  { %v205_v22 = vpop.permute.xlu0 %204  ;;  %v185_v45 = vsel %vm183_vm4, %v180_v21, %v182_v20 }
 0x128   :  { %v190_v51 = vadd.f32 %v185_v45, %v165_v47  ;;  %v406_v45 = vld [vmem:[%s6392_s3 + $0x90] sm:$0xff] }
 0x129   :  { %v390_v47 = vld [vmem:[%s6392_s3 + $0x10] sm:$0xff] }
 0x12a   :  { %v178_v23 = vpop.permute.xlu1 %177 }
 0x12b   :  { %v203_v24 = vpop.permute.xlu0 %202  ;;  %v184_v37 = vsel %vm183_vm4, %v178_v23, %v180_v21 }
 0x12c   :  { %v189_v40 = vadd.f32 %v184_v37, %v164_v39  ;;  %v209_v48 = vsel %vm208_vm5, %v203_v24, %v205_v22  ;;  %v405_v39 = vld [vmem:[%s6392_s3 + $0x88] sm:$0xff] }
 0x12e   :  { %v207_v25 = vpop.permute.xlu1 %206  ;;  %v214_v53 = vadd.f32 %v209_v48, %v189_v40  ;;  %v407_v40 = vld [vmem:[%s6392_s3 + $0x98] sm:$0xff] }
 0x12f   :  { %v232_v26 = vpop.permute.xlu0 %231  ;;  %v216_v46 = vadd.f32 %v207_v25, %v191_v42  ;;  %v210_v34 = vsel %vm208_vm5, %v205_v22, %v207_v25  ;;  %v388_v42 = vld [vmem:[%s6392_s3] sm:$0xff]  ;;  %v391_v48 = vld [vmem:[%s6392_s3 + $0x18] sm:$0xff] }
 0x130   :  { %v215_v56 = vadd.f32 %v210_v34, %v190_v51  ;;  %v408_v34 = vld [vmem:[%s6392_s3 + $0xa0] sm:$0xff] }
 0x131   :  { %v241_v54 = vadd.f32 %v232_v26, %v216_v46  ;;  %v4580_v46 = vpack.c.bf16 %v407_v40, %v406_v45  ;;  %v392_v51 = vld [vmem:[%s6392_s3 + $0x20] sm:$0xff] }
 0x132   :  { %v230_v27 = vpop.permute.xlu1 %229 }
 0x133   :  { %v255_v28 = vpop.permute.xlu0 %254  ;;  %v235_v55 = vsel %vm233_vm6, %v230_v27, %v232_v26 }
 0x134   :  { %v240_v61 = vadd.f32 %v235_v55, %v215_v56  ;;  %v410_v55 = vld [vmem:[%s6392_s3 + $0xb0] sm:$0xff]  ;;  %v411_v56 = vld [vmem:[%s6392_s3 + $0xb8] sm:$0xff] }
 0x136   :  { %v228_v30 = vpop.permute.xlu1 %227 }
 0x137   :  { %v253_v32 = vpop.permute.xlu0 %252  ;;  %v234_v52 = vsel %vm233_vm6, %v228_v30, %v230_v27 }
 0x138   :  { %v239_v57 = vadd.f32 %v234_v52, %v214_v53  ;;  %v259_v62 = vsel %vm258_vm7, %v253_v32, %v255_v28  ;;  %v393_v53 = vld [vmem:[%s6392_s3 + $0x28] sm:$0xff] }
 0x13a   :  { %v257_v38 = vpop.permute.xlu1 %256  ;;  %v264_v11 = vadd.f32 %v259_v62, %v239_v57  ;;  %v394_v57 = vld [vmem:[%s6392_s3 + $0x30] sm:$0xff]  ;;  %v420_v62 = vld [vmem:[%s6392_s3 + $0x100] sm:$0xff] }
 0x13b   :  { %v282_v43 = vpop.permute.xlu0 %281  ;;  %v260_v58 = vsel %vm258_vm7, %v255_v28, %v257_v38  ;;  %v266_v59 = vadd.f32 %v257_v38, %v241_v54  ;;  %v4586_v54 = vpack.c.bf16 %v393_v53, %v392_v51  ;;  %v5124_v51 = vmov 26  }
 0x13c   :  { %v265_v0 = vadd.f32 %v260_v58, %v240_v61  ;;  %v395_v58 = vld [vmem:[%s6392_s3 + $0x38] sm:$0xff]  ;;  %v413_v61 = vld [vmem:[%s6392_s3 + $0xc8] sm:$0xff]  ;;  %v5126_v53 = vmov 15  }
 0x13d   :  { %v291_v12 = vadd.f32 %v282_v43, %v266_v59  ;;  %v4590_v59 = vpack.c.bf16 %v395_v58, %v394_v57  ;;  %v5131_v57 = vmov 19  }
 0x13e   :  { %v280_v49 = vpop.permute.xlu1 %279 }
 0x13f   :  { %v278_v50 = vpop.permute.xlu0 %277  ;;  %v285_v63 = vsel %vm283_vm8, %v280_v49, %v282_v43  ;;  %v389_v43 = vld [vmem:[%s6392_s3 + $0x8] sm:$0xff] }
 0x140   :  { %v284_v1 = vsel %vm283_vm8, %v278_v50, %v280_v49  ;;  %v290_v17 = vadd.f32 %v285_v63, %v265_v0  ;;  %v4578_v44 = vpack.c.bf16 %v389_v43, %v388_v42  ;;  %v4582_v49 = vpack.c.bf16 %v391_v48, %v390_v47  ;;  %v409_v50 = vld [vmem:[%s6392_s3 + $0xa8] sm:$0xff] }
 0x141   :  { %v289_v19 = vadd.f32 %v284_v1, %v264_v11  ;;  %v4584_v52 = vpack.c.bf16 %v409_v50, %v408_v34  ;;  %v421_v0 = vld [vmem:[%s6392_s3 + $0x108] sm:$0x7]  ;;  %v396_v1 = vld [vmem:[%s6392_s3 + $0x40] sm:$0xff] }
 0x142   :  { %v305_v35 = vpop.permute.xlu1 %304  ;;  %v4609_v11 = vpack.c.bf16 %v421_v0, %v420_v62  ;;  %v5470_v47 = vld [vmem:[%s6393_s4 + $0x8] sm:$0xff]  ;;  %v5488_v50 = vld [vmem:[%s6393_s4] sm:$0xff] }
 0x143   :  { %v307_v60 = vpop.permute.xlu0 %306 }
 0x144   :  { %v310_v13 = vsel %vm308_vm9, %v305_v35, %v307_v60  ;;  %v316_v20 = vadd.f32 %v307_v60, %v291_v12  ;;  %v412_v60 = vld [vmem:[%s6392_s3 + $0xc0] sm:$0xff]  ;;  %v397_v12 = vld [vmem:[%s6392_s3 + $0x48] sm:$0xff] }
 0x145   :  { %v315_v21 = vadd.f32 %v310_v13, %v290_v17  ;;  %v4592_v63 = vpack.c.bf16 %v413_v61, %v412_v60  ;;  %v4594_v13 = vpack.c.bf16 %v397_v12, %v396_v1  ;;  %v415_v17 = vld [vmem:[%s6392_s3 + $0xd8] sm:$0xff]  ;;  %v5132_v12 = vmov 22  }
 0x146   :  { %v303_v3 = vpop.permute.xlu1 %302 }
 0x147   :  { %v330_v15 = vpop.permute.xlu0 %329  ;;  %v309_v18 = vsel %vm308_vm9, %v303_v3, %v305_v35  ;;  %v4588_v35 = vpack.c.bf16 %v411_v56, %v410_v55  ;;  %v5109_v3 = vmov 0.0|0.0   ;;  %v5128_v55 = vmov 32  }
 0x148   :  { %v314_v23 = vadd.f32 %v309_v18, %v289_v19  ;;  %4608 = vmatprep.subr.bf16.mxu1 %v5109_v3  ;;  %v5112_v18 = vmov 0.0   ;;  %v5129_v56 = vmov 33  }
 0x149   :  { %4611 = vmatpush3.bf16.msk.msra.mxu1 %vm4610_vm13, %v4609_v11  ;;  %4358 = vmatprep.mubr.msk.f32.mxu1 %vm5111_vm14, %v5112_v18 }
 0x14a   :  { %v332_v22 = vpop.permute.xlu1 %331 }
 0x14b   :  { %v335_v24 = vsel %vm333_vm10, %v330_v15, %v332_v22  ;;  %v341_v25 = vadd.f32 %v332_v22, %v316_v20  ;;  %v328_v26 = vpop.permute.xlu0 %327  ;;  %v398_v20 = vld [vmem:[%s6392_s3 + $0x50] sm:$0xff] }
 0x14c   :  { %v340_v27 = vadd.f32 %v335_v24, %v315_v21  ;;  %v334_v28 = vsel %vm333_vm10, %v328_v26, %v330_v15  ;;  %v414_v15 = vld [vmem:[%s6392_s3 + $0xd0] sm:$0xff]  ;;  %v399_v21 = vld [vmem:[%s6392_s3 + $0x58] sm:$0xff]  ;;  %v417_v24 = vld [vmem:[%s6392_s3 + $0xe8] sm:$0xff] }
 0x14d   :  { %v339_v29 = vadd.f32 %v334_v28, %v314_v23  ;;  %v5336_v30 = vadd.f32 %v5326_v14, %v341_v25  ;;  %v4596_v19 = vpack.c.bf16 %v415_v17, %v414_v15  ;;  %v4598_v22 = vpack.c.bf16 %v399_v21, %v398_v20  ;;  %v416_v23 = vld [vmem:[%s6392_s3 + $0xe0] sm:$0xff] }
 0x14e   :  { %v5339_v31 = vadd.f32 %v5326_v14, %v340_v27  ;;  %v4600_v25 = vpack.c.bf16 %v417_v24, %v416_v23  ;;  %v400_v26 = vld [vmem:[%s6392_s3 + $0x60] sm:$0xff]  ;;  %v401_v27 = vld [vmem:[%s6392_s3 + $0x68] sm:$0xff]  ;;  %v5135_v23 = vmov 31  }
 0x14f   :  { %v5342_v32 = vadd.f32 %v5326_v14, %v339_v29  ;;  %v353_v33 = vmax.f32 %v5336_v30, 0.0  ;;  %v404_v14 = vld [vmem:[%s6392_s3 + $0x80] sm:$0xff]  ;;  %v4602_v28 = vpack.c.bf16 %v401_v27, %v400_v26  ;;  %v418_v29 = vld [vmem:[%s6392_s3 + $0xf0] sm:$0xff] }
 0x150   :  { %v352_v36 = vmax.f32 %v5339_v31, 0.0  ;;  %v4576_v41 = vpack.c.bf16 %v405_v39, %v404_v14  ;;  %v402_v39 = vld [vmem:[%s6392_s3 + $0x70] sm:$0xff]  ;;  %v5113_v31 = vmov 10  }
 0x151   :  { %v351_v37 = vmax.f32 %v5342_v32, 0.0  ;;  %361 = vrot.lane.b32.xlu0 %v353_v33, %s5101_s0  ;;  %v5115_v32 = vmov 13  }
 0x152   :  { %4577 = vmatprep.subr.bf16.mxu0 %v4576_v41  ;;  %v403_v41 = vld [vmem:[%s6392_s3 + $0x78] sm:$0xff] }
 0x153   :  { %v4835_v38 = vpack.i.bf16 %v351_v37, %v352_v36  ;;  %4579 = vmatpush3.bf16.msra.mxu0 %v4578_v44  ;;  %v4606_v43 = vpack.c.bf16 %v403_v41, %v402_v39  ;;  %v5138_v41 = vmov 18  }
 0x154   :  { %4581 = vmatprep.subr.bf16.mxu0 %v4580_v46 }
 0x155   :  { %4836 = vrot.lane.b32.xlu1 %v4835_v38, %s5101_s0  ;;  %v419_v38 = vld [vmem:[%s6392_s3 + $0xf8] sm:$0xff] }
 0x156   :  { %v4604_v14 = vpack.c.bf16 %v419_v38, %v418_v29 }
 0x157   :  { %4583 = vmatpush3.bf16.msra.mxu0 %v4582_v49 }
 0x158   :  { %4585 = vmatprep.subr.bf16.mxu0 %v4584_v52  ;;  %v5125_v52 = vmov 28  }
 0x15b   :  { %4587 = vmatpush3.bf16.msra.mxu0 %v4586_v54  ;;  %v5127_v54 = vmov 30  }
 0x15c   :  { %4589 = vmatprep.subr.bf16.mxu0 %v4588_v35  ;;  %v5130_v35 = vmov 34  }
 0x15f   :  { %4591 = vmatpush3.bf16.msra.mxu0 %v4590_v59 }
 0x160   :  { %4593 = vmatprep.subr.bf16.mxu0 %v4592_v63 }
 0x163   :  { %4595 = vmatpush3.bf16.msra.mxu0 %v4594_v13  ;;  %v5133_v13 = vmov 25  }
 0x164   :  { %4597 = vmatprep.subr.bf16.mxu0 %v4596_v19  ;;  %v5134_v19 = vmov 29  }
 0x167   :  { %4599 = vmatpush3.bf16.msra.mxu0 %v4598_v22 }
 0x168   :  { %4601 = vmatprep.subr.bf16.mxu0 %v4600_v25 }
 0x16b   :  { %4603 = vmatpush3.bf16.msra.mxu0 %v4602_v28  ;;  %v5136_v28 = vmov 35  }
 0x16c   :  { %4605 = vmatprep.subr.bf16.mxu0 %v4604_v14  ;;  %v5137_v14 = vmov 9  }
 0x16f   :  { %4607 = vmatpush3.bf16.msra.mxu0 %v4606_v43 }
 0x1c3   :  { %v362_v42 = vpop.permute.xlu0 %361 }
 0x1c4   :  { %v5463_v44 = vmax.f32 %v353_v33, %v362_v42 }
 0x1c6   :  { %378 = vrot.lane.b32.xlu0 %v5463_v44, %s5103_s17 }
 0x1c7   :  { %v4837_v45 = vpop.permute.xlu1 %4836 }
 0x1c8   :  { %v4839_v40 = vunpack.i.h.bf16 %v4837_v45  ;;  %v4838_v46 = vunpack.i.l.bf16 %v4837_v45 }
 0x1ca   :  { %v363_v48 = vsel %vm158_vm3, %v4839_v40, %v4838_v46  ;;  %v364_v49 = vsel %vm158_vm3, %v4838_v46, %v362_v42  ;;  %601 = vperm.xlu0 %4846, %v5470_v47   ;;  %v1281_v40 = vld [vmem:[%s6394_s5] sm:$0xff]  ;;  %vm4152_vm3 = vcmask 1024  }
 0x1cb   :  { %v5477_v30 = vmax.f32 %v351_v37, %v363_v48  ;;  %v5481_v33 = vmax.f32 %v352_v36, %v364_v49  ;;  %v5119_v36 = vmov 20   ;;  %v5123_v37 = vmov 12   ;;  %v1282_v48 = vld [vmem:[%s6394_s5 + $0x8] sm:$0xff]  ;;  %s5140_s5 = smov 118  }
 0x1cd   :  { %v4840_v34 = vpack.i.bf16 %v5477_v30, %v5481_v33 }
 0x1ce   :  { %4848 = vset.pattern.permute.xlu0 %v5092_v2 }
 0x1cf   :  { %4841 = vrot.lane.b32.xlu1 %v4840_v34, %s5103_s17  ;;  %637 = vperm.xlu0 %4848, %v5488_v50  }
 0x1d3   :  { %597 = vperm.xlu1 %4845, %v5488_v50   ;;  %4851 = vset.pattern.permute.xlu0 %v5094_v5 }
 0x1d4   :  { %661 = vperm.xlu0 %4851, %v5470_v47  }
 0x1d7   :  { %4847 = vset.pattern.permute.xlu1 %v5093_v4  ;;  %v5114_v4 = vmov 11  }
 0x1d8   :  { %617 = vperm.xlu1 %4847, %v5488_v50   ;;  %4853 = vset.pattern.permute.xlu0 %v5096_v7 }
 0x1d9   :  { %697 = vperm.xlu0 %4853, %v5488_v50  }
 0x1dc   :  { %621 = vperm.xlu1 %4847, %v5470_v47  }
 0x1dd   :  { %4856 = vset.pattern.permute.xlu0 %v5097_v8 }
 0x1de   :  { %721 = vperm.xlu0 %4856, %v5470_v47  }
 0x1e0   :  { %4849 = vset.pattern.permute.xlu1 %v5092_v2  ;;  %v5116_v2 = vmov 14  }
 0x1e1   :  { %641 = vperm.xlu1 %4849, %v5470_v47  }
 0x1e2   :  { %4858 = vset.pattern.permute.xlu0 %v5113_v31 }
 0x1e3   :  { %772 = vperm.xlu0 %4858, %v5488_v50  }
 0x1e5   :  { %4850 = vset.pattern.permute.xlu1 %v5094_v5  ;;  %v5117_v5 = vmov 16  }
 0x1e6   :  { %657 = vperm.xlu1 %4850, %v5488_v50  }
 0x1e7   :  { %4861 = vset.pattern.permute.xlu0 %v5114_v4 }
 0x1e8   :  { %796 = vperm.xlu0 %4861, %v5470_v47  }
 0x1ea   :  { %4852 = vset.pattern.permute.xlu1 %v5095_v6  ;;  %v5118_v6 = vmov 17  }
 0x1eb   :  { %677 = vperm.xlu1 %4852, %v5488_v50  }
 0x1ec   :  { %4863 = vset.pattern.permute.xlu0 %v5115_v32 }
 0x1ed   :  { %832 = vperm.xlu0 %4863, %v5488_v50  }
 0x1ef   :  { %681 = vperm.xlu1 %4852, %v5470_v47  }
 0x1f1   :  { %4866 = vset.pattern.permute.xlu0 %v5116_v2 }
 0x1f2   :  { %856 = vperm.xlu0 %4866, %v5470_v47  }
 0x1f3   :  { %4854 = vset.pattern.permute.xlu1 %v5096_v7  ;;  %v5120_v7 = vmov 21  }
 0x1f4   :  { %701 = vperm.xlu1 %4854, %v5470_v47  }
 0x1f6   :  { %4868 = vset.pattern.permute.xlu0 %v5117_v5 }
 0x1f7   :  { %892 = vperm.xlu0 %4868, %v5488_v50  }
 0x1f8   :  { %4855 = vset.pattern.permute.xlu1 %v5097_v8  ;;  %v5121_v8 = vmov 23  }
 0x1f9   :  { %717 = vperm.xlu1 %4855, %v5488_v50  }
 0x1fb   :  { %4871 = vset.pattern.permute.xlu0 %v5118_v6 }
 0x1fc   :  { %916 = vperm.xlu0 %4871, %v5470_v47  }
 0x1fd   :  { %4857 = vset.pattern.permute.xlu1 %v5099_v10  ;;  %v5122_v10 = vmov 24  }
 0x1fe   :  { %737 = vperm.xlu1 %4857, %v5488_v50  }
 0x200   :  { %4873 = vset.pattern.permute.xlu0 %v5119_v36 }
 0x201   :  { %967 = vperm.xlu0 %4873, %v5488_v50  }
 0x202   :  { %741 = vperm.xlu1 %4857, %v5470_v47  }
 0x205   :  { %4876 = vset.pattern.permute.xlu0 %v5120_v7 }
 0x206   :  { %4859 = vset.pattern.permute.xlu1 %v5113_v31  ;;  %991 = vperm.xlu0 %4876, %v5470_v47  }
 0x207   :  { %776 = vperm.xlu1 %4859, %v5470_v47  }
 0x20a   :  { %4878 = vset.pattern.permute.xlu0 %v5121_v8 }
 0x20b   :  { %4860 = vset.pattern.permute.xlu1 %v5114_v4  ;;  %1027 = vperm.xlu0 %4878, %v5488_v50  }
 0x20c   :  { %792 = vperm.xlu1 %4860, %v5488_v50  }
 0x20f   :  { %4881 = vset.pattern.permute.xlu0 %v5122_v10 }
 0x210   :  { %4862 = vset.pattern.permute.xlu1 %v5123_v37  ;;  %1051 = vperm.xlu0 %4881, %v5470_v47  }
 0x211   :  { %812 = vperm.xlu1 %4862, %v5488_v50  }
 0x214   :  { %4883 = vset.pattern.permute.xlu0 %v5124_v51 }
 0x215   :  { %816 = vperm.xlu1 %4862, %v5470_v47   ;;  %1087 = vperm.xlu0 %4883, %v5488_v50  }
 0x219   :  { %4864 = vset.pattern.permute.xlu1 %v5115_v32  ;;  %4886 = vset.pattern.permute.xlu0 %v5125_v52 }
 0x21a   :  { %836 = vperm.xlu1 %4864, %v5470_v47   ;;  %1126 = vperm.xlu0 %4886, %v5470_v47  }
 0x21e   :  { %4865 = vset.pattern.permute.xlu1 %v5116_v2  ;;  %4888 = vset.pattern.permute.xlu0 %v5098_v9 }
 0x21f   :  { %852 = vperm.xlu1 %4865, %v5488_v50   ;;  %584 = vperm.xlu0 %4888, %v5488_v50  }
 0x223   :  { %4867 = vset.pattern.permute.xlu1 %v5126_v53  ;;  %4891 = vset.pattern.permute.xlu0 %v5127_v54 }
 0x224   :  { %872 = vperm.xlu1 %4867, %v5488_v50   ;;  %1166 = vperm.xlu0 %4891, %v5470_v47  }
 0x228   :  { %876 = vperm.xlu1 %4867, %v5470_v47   ;;  %4893 = vset.pattern.permute.xlu0 %v5128_v55 }
 0x229   :  { %1202 = vperm.xlu0 %4893, %v5488_v50  }
 0x22c   :  { %4869 = vset.pattern.permute.xlu1 %v5117_v5 }
 0x22d   :  { %896 = vperm.xlu1 %4869, %v5470_v47   ;;  %4896 = vset.pattern.permute.xlu0 %v5129_v56 }
 0x22e   :  { %1226 = vperm.xlu0 %4896, %v5470_v47  }
 0x231   :  { %4870 = vset.pattern.permute.xlu1 %v5118_v6 }
 0x232   :  { %912 = vperm.xlu1 %4870, %v5488_v50   ;;  %4898 = vset.pattern.permute.xlu0 %v5130_v35 }
 0x233   :  { %1246 = vperm.xlu0 %4898, %v5470_v47  }
 0x236   :  { %4872 = vset.pattern.permute.xlu1 %v5131_v57 }
 0x237   :  { %947 = vperm.xlu1 %4872, %v5488_v50   ;;  %4904 = vset.pattern.permute.xlu0 %v5098_v9 }
 0x238   :  { %v379_v58 = vpop.permute.xlu0 %378 }
 0x239   :  { %v387_v59 = vmax.f32 %v5463_v44, %v379_v58  ;;  %v5139_v44 = vmov 27  }
 0x23b   :  { %4359 = vmatmul.mubr.msk.f32.vlgmr.msra.gmra.mrb[0].mxu1 %vm422_vm15, %v387_v59  ;;  %951 = vperm.xlu1 %4872, %v5470_v47  }
 0x23f   :  { %4874 = vset.pattern.permute.xlu1 %v5119_v36 }
 0x240   :  { %971 = vperm.xlu1 %4874, %v5470_v47  }
 0x241   :  { %v4842_v60 = vpop.permute.xlu1 %4841 }
 0x242   :  { %v4844_v61 = vunpack.i.h.bf16 %v4842_v60  ;;  %v4843_v62 = vunpack.i.l.bf16 %v4842_v60 }
 0x244   :  { %4875 = vset.pattern.permute.xlu1 %v5120_v7  ;;  %v381_v63 = vsel %vm208_vm5, %v4843_v62, %v379_v58  ;;  %v380_v0 = vsel %vm208_vm5, %v4844_v61, %v4843_v62 }
 0x245   :  { %987 = vperm.xlu1 %4875, %v5488_v50   ;;  %v386_v1 = vmax.f32 %v5481_v33, %v381_v63  ;;  %v385_v11 = vmax.f32 %v5477_v30, %v380_v0 }
 0x247   :  { %494 = vmatprep.mubr.f32.mxu0 %v386_v1 }
 0x248   :  { %495 = vmatmul.mubr.f32.vlgmr.msra.gmra.mrb[0].mxu0 %v385_v11 }
 0x249   :  { %4877 = vset.pattern.permute.xlu1 %v5132_v12  ;;  %1668 = vmatprep.mubr.f32.mxu0 %v5112_v18 }
 0x24a   :  { %1007 = vperm.xlu1 %4877, %v5488_v50  }
 0x24e   :  { %1011 = vperm.xlu1 %4877, %v5470_v47  }
 0x252   :  { %4879 = vset.pattern.permute.xlu1 %v5121_v8  ;;  %v5573_v15 = vpop.permute.xlu1 %597 }
 0x253   :  { %1031 = vperm.xlu1 %4879, %v5470_v47  }
 0x257   :  { %4880 = vset.pattern.permute.xlu1 %v5122_v10  ;;  %v5578_v17 = vpop.permute.xlu1 %617  ;;  %v602_v10 = vpop.permute.xlu0 %601 }
 0x258   :  { %1047 = vperm.xlu1 %4880, %v5488_v50  }
 0x25b   :  { %v5581_v20 = vpop.permute.xlu1 %621 }
 0x25c   :  { %4882 = vset.pattern.permute.xlu1 %v5133_v13 }
 0x25d   :  { %1067 = vperm.xlu1 %4882, %v5488_v50  }
 0x260   :  { %v5584_v21 = vpop.permute.xlu1 %641 }
 0x261   :  { %1071 = vperm.xlu1 %4882, %v5470_v47  }
 0x265   :  { %4884 = vset.pattern.permute.xlu1 %v5124_v51  ;;  %v5589_v22 = vpop.permute.xlu1 %657 }
 0x266   :  { %1091 = vperm.xlu1 %4884, %v5470_v47  }
 0x26a   :  { %4885 = vset.pattern.permute.xlu1 %v5125_v52  ;;  %v5593_v24 = vpop.permute.xlu1 %677 }
 0x26b   :  { %1122 = vperm.xlu1 %4885, %v5488_v50  }
 0x26e   :  { %v5596_v25 = vpop.permute.xlu1 %681 }
 0x26f   :  { %4887 = vset.pattern.permute.xlu1 %v5134_v19 }
 0x270   :  { %1142 = vperm.xlu1 %4887, %v5488_v50  }
 0x273   :  { %v5600_v26 = vpop.permute.xlu1 %701 }
 0x274   :  { %1146 = vperm.xlu1 %4887, %v5470_v47  }
 0x278   :  { %4889 = vset.pattern.permute.xlu1 %v5127_v54  ;;  %v5604_v27 = vpop.permute.xlu1 %717  ;;  %v638_v54 = vpop.permute.xlu0 %637 }
 0x279   :  { %1162 = vperm.xlu1 %4889, %v5488_v50  }
 0x27c   :  { %v662_v61 = vpop.permute.xlu0 %661 }
 0x27d   :  { %4890 = vset.pattern.permute.xlu1 %v5098_v9  ;;  %v5608_v29 = vpop.permute.xlu1 %737 }
 0x27e   :  { %589 = vperm.xlu1 %4890, %v5470_v47  }
 0x280   :  { %v698_v19 = vpop.permute.xlu0 %697 }
 0x281   :  { %v5612_v38 = vpop.permute.xlu1 %741 }
 0x282   :  { %4892 = vset.pattern.permute.xlu1 %v5135_v23 }
 0x283   :  { %1182 = vperm.xlu1 %4892, %v5488_v50  }
 0x286   :  { %v5615_v39 = vpop.permute.xlu1 %776 }
 0x287   :  { %1186 = vperm.xlu1 %4892, %v5470_v47  }
 0x28b   :  { %4894 = vset.pattern.permute.xlu1 %v5128_v55  ;;  %v5618_v42 = vpop.permute.xlu1 %792 }
 0x28c   :  { %1206 = vperm.xlu1 %4894, %v5470_v47  }
 0x290   :  { %4895 = vset.pattern.permute.xlu1 %v5129_v56  ;;  %v5622_v43 = vpop.permute.xlu1 %812 }
 0x291   :  { %1222 = vperm.xlu1 %4895, %v5488_v50  }
 0x294   :  { %v5625_v45 = vpop.permute.xlu1 %816 }
 0x295   :  { %4897 = vset.pattern.permute.xlu1 %v5130_v35 }
 0x296   :  { %1242 = vperm.xlu1 %4897, %v5488_v50  }
 0x299   :  { %v5632_v46 = vpop.permute.xlu1 %836 }
 0x29a   :  { %4899 = vset.pattern.permute.xlu1 %v5136_v28 }
 0x29b   :  { %1262 = vperm.xlu1 %4899, %v5488_v50  }
 0x29e   :  { %v5637_v49 = vpop.permute.xlu1 %852 }
 0x29f   :  { %1266 = vperm.xlu1 %4899, %v5470_v47  }
 0x2a3   :  { %4900 = vset.pattern.permute.xlu1 %v5137_v14  ;;  %v5639_v30 = vpop.permute.xlu1 %872 }
 0x2a4   :  { %760 = vperm.xlu1 %4900, %v5488_v50  }
 0x2a7   :  { %v5641_v33 = vpop.permute.xlu1 %876 }
 0x2a8   :  { %764 = vperm.xlu1 %4900, %v5470_v47  }
 0x2ac   :  { %4901 = vset.pattern.permute.xlu1 %v5138_v41  ;;  %v722_v41 = vpop.permute.xlu0 %721 }
 0x2ad   :  { %935 = vperm.xlu1 %4901, %v5488_v50  }
 0x2b1   :  { %939 = vperm.xlu1 %4901, %v5470_v47  }
 0x2b5   :  { %4902 = vset.pattern.permute.xlu1 %v5139_v44 }
 0x2b6   :  { %1110 = vperm.xlu1 %4902, %v5488_v50  }
 0x2ba   :  { %1114 = vperm.xlu1 %4902, %v5470_v47   ;;  %v5643_v47 = vpop.permute.xlu1 %896 }
 0x2be   :  { %4903 = vset.pattern.permute.xlu1 %v5098_v9  ;;  %v5645_v34 = vpop.permute.xlu1 %912 }
 0x2bf   :  { %1285 = vperm.xlu1 %4903, %v1281_v40  }
 0x2c2   :  { %v5647_v50 = vpop.permute.xlu1 %947 }
 0x2c3   :  { %1290 = vperm.xlu1 %4903, %v1282_v48  }
 0x2c6   :  { %v5649_v9 = vpop.permute.xlu1 %951 }
 0x2ca   :  { %v5651_v31 = vpop.permute.xlu1 %971 }
 0x2ce   :  { %v5653_v4 = vpop.permute.xlu1 %987 }
 0x2d2   :  { %v5655_v32 = vpop.permute.xlu1 %1007 }
 0x2d6   :  { %v5657_v2 = vpop.permute.xlu1 %1011 }
 0x2da   :  { %v5659_v5 = vpop.permute.xlu1 %1031 }
 0x2de   :  { %v5661_v6 = vpop.permute.xlu1 %1047 }
 0x2e2   :  { %v5663_v8 = vpop.permute.xlu1 %1067 }
 0x2e6   :  { %v5665_v37 = vpop.permute.xlu1 %1071 }
 0x2ea   :  { %v5667_v55 = vpop.permute.xlu1 %1091 }
 0x2ee   :  { %v5690_v0 = vpop.permute.xlu1 %1122 }
 0x2f2   :  { %v5706_v23 = vpop.permute.xlu1 %1142 }
 0x2f6   :  { %v5716_v44 = vpop.permute.xlu1 %1146 }
 0x2fa   :  { %v5725_v48 = vpop.permute.xlu1 %1162 }
 0x30e   :  { %v566_v36 = vpop.f32.mrb[0].mxu1 }
 0x30f   :  { %v4360_v7 = vpop.f32.mrb[1].mxu1 }
 0x31b   :  { %v4249_v51 = vpop.f32.mrb[0].mxu0 }
 0x31c   :  { %v4250_v52 = vpop.f32.mrb[1].mxu0 }
 0x31d   :  { %v4251_v53 = vadd.f32 %v4250_v52, %v4249_v51 }
 0x31f   :  { %v5669_v56 = vadd.f32 %v4251_v53, %v566_v36  ;;  %v5739_v53 = vpop.permute.xlu1 %589 }
 0x321   :  { %v5672_v35 = vrot.slane %v5669_v56, 6  ;;  %v5675_v57 = vrot.slane %v5669_v56, 4  ;;  %v5678_v58 = vrot.slane %v5669_v56, 2 }
 0x323   :  { %v579_v59 = vsel %vm118_vm0, %v5669_v56, %v5672_v35  ;;  %v1106_v60 = vsel %vm118_vm0, %v5672_v35, %v5675_v57 }
 0x324   :  { %v580_v62 = vsel %vm122_vm1, %v579_v59, %v5675_v57  ;;  %v1107_v63 = vsel %vm122_vm1, %v1106_v60, %v5678_v58  ;;  %v5755_v60 = vpop.permute.xlu1 %1182 }
 0x325   :  { %v5694_v1 = vsel %vm126_vm2, %v580_v62, %v5678_v58  ;;  %v5698_v11 = vsel %vm126_vm2, %v1107_v63, %v5669_v56 }
 0x326   :  { %v624_v12 = vmul.f32 %v5578_v17, %v5694_v1  ;;  %v604_v13 = vmul.f32 %v5573_v15, %v5694_v1  ;;  %v625_v28 = vmul.f32 %v5581_v20, %v5694_v1  ;;  %v605_v14 = vmul.f32 %v602_v10, %v5694_v1 }
 0x327   :  { %v645_v17 = vmul.f32 %v5584_v21, %v5694_v1  ;;  %v644_v15 = vmul.f32 %v638_v54, %v5694_v1  ;;  %v665_v20 = vmul.f32 %v662_v61, %v5694_v1  ;;  %v664_v40 = vmul.f32 %v5589_v22, %v5694_v1  ;;  %v773_v21 = vpop.permute.xlu0 %772 }
 0x328   :  { %628 = vrot.lane.b32.xlu0 %v624_v12, %s5102_s2  ;;  %608 = vrot.lane.b32.xlu1 %v604_v13, %s5101_s0  ;;  %v684_v36 = vmul.f32 %v5593_v24, %v5694_v1  ;;  %v704_v7 = vmul.f32 %v698_v19, %v5694_v1  ;;  %v756_v22 = vsel %vm118_vm0, %v5678_v58, %v5669_v56  ;;  %v5765_v12 = vpop.permute.xlu1 %1186 }
 0x329   :  { %v685_v10 = vmul.f32 %v5596_v25, %v5694_v1  ;;  %v724_v51 = vmul.f32 %v5604_v27, %v5694_v1  ;;  %v757_v24 = vsel %vm122_vm1, %v756_v22, %v5672_v35  ;;  %v705_v54 = vmul.f32 %v5600_v26, %v5694_v1 }
 0x32a   :  { %v744_v25 = vmul.f32 %v5608_v29, %v5694_v1  ;;  %v5751_v27 = vsel %vm126_vm2, %v757_v24, %v5675_v57  ;;  %v725_v61 = vmul.f32 %v722_v41, %v5694_v1  ;;  %v745_v26 = vmul.f32 %v5612_v38, %v5694_v1 }
 0x32b   :  { %v797_v52 = vpop.permute.xlu0 %796  ;;  %v779_v62 = vmul.f32 %v773_v21, %v5751_v27  ;;  %v799_v29 = vmul.f32 %v5618_v42, %v5751_v27  ;;  %v780_v13 = vmul.f32 %v5615_v39, %v5751_v27  ;;  %v819_v19 = vmul.f32 %v5622_v43, %v5751_v27 }
 0x32c   :  { %630 = vrot.lane.b32.xlu0 %v625_v28, %s5102_s2  ;;  %610 = vrot.lane.b32.xlu1 %v605_v14, %s5101_s0  ;;  %v5775_v28 = vpop.permute.xlu1 %1206  ;;  %v800_v42 = vmul.f32 %v797_v52, %v5751_v27  ;;  %v820_v39 = vmul.f32 %v5625_v45, %v5751_v27  ;;  %v879_v43 = vmul.f32 %v5639_v30, %v5751_v27 }
 0x32d   :  { %v931_v41 = vsel %vm118_vm0, %v5675_v57, %v5678_v58  ;;  %v919_v57 = vmul.f32 %v5645_v34, %v5751_v27  ;;  %vm1326_vm0 = vcmask 547840  }
 0x32e   :  { %v932_v45 = vsel %vm122_vm1, %v931_v41, %v5669_v56  ;;  %vm1443_vm1 = vcmask 130048  }
 0x32f   :  { %v833_v59 = vpop.permute.xlu0 %832 }
 0x330   :  { %650 = vrot.lane.b32.xlu0 %v645_v17, %s5140_s5  ;;  %648 = vrot.lane.b32.xlu1 %v644_v15, %s5140_s5  ;;  %v839_v14 = vmul.f32 %v833_v59, %v5751_v27  ;;  %v5785_v15 = vpop.permute.xlu1 %1222 }
 0x333   :  { %v857_v63 = vpop.permute.xlu0 %856 }
 0x334   :  { %670 = vrot.lane.b32.xlu0 %v665_v20, %s5141_s7  ;;  %668 = vrot.lane.b32.xlu1 %v664_v40, %s5141_s7  ;;  %v840_v20 = vmul.f32 %v5632_v46, %v5751_v27  ;;  %v5799_v21 = vpop.permute.xlu1 %1242  ;;  %v5807_v46 = vsel %vm126_vm2, %v932_v45, %v5672_v35  ;;  %v860_v56 = vmul.f32 %v857_v63, %v5751_v27  ;;  %vm2378_vm2 = vcmask 261120  }
 0x335   :  { %v954_v58 = vmul.f32 %v5647_v50, %v5807_v46  ;;  %v900_v50 = vmul.f32 %v5643_v47, %v5751_v27  ;;  %v1014_v52 = vmul.f32 %v5655_v32, %v5807_v46  ;;  %v955_v47 = vmul.f32 %v5649_v9, %v5807_v46 }
 0x336   :  { %v975_v32 = vmul.f32 %v5651_v31, %v5807_v46  ;;  %v1015_v31 = vmul.f32 %v5657_v2, %v5807_v46  ;;  %v1035_v2 = vmul.f32 %v5659_v5, %v5807_v46 }
 0x337   :  { %v893_v38 = vpop.permute.xlu0 %892 }
 0x338   :  { %688 = vrot.lane.b32.xlu0 %v684_v36, %s5142_s21  ;;  %708 = vrot.lane.b32.xlu1 %v704_v7, %s5105_s19  ;;  %v899_v40 = vmul.f32 %v893_v38, %v5751_v27  ;;  %v859_v36 = vmul.f32 %v5637_v49, %v5751_v27  ;;  %v5814_v22 = vpop.permute.xlu1 %1262  ;;  %v880_v49 = vmul.f32 %v5641_v33, %v5751_v27 }
 0x33b   :  { %v917_v17 = vpop.permute.xlu0 %916 }
 0x33c   :  { %690 = vrot.lane.b32.xlu0 %v685_v10, %s5142_s21  ;;  %728 = vrot.lane.b32.xlu1 %v724_v51, %s5143_s14  ;;  %v5823_v10 = vpop.permute.xlu1 %1266  ;;  %v994_v51 = vmul.f32 %v5653_v4, %v5807_v46  ;;  %v920_v33 = vmul.f32 %v917_v17, %v5751_v27  ;;  %v1054_v4 = vmul.f32 %v5661_v6, %v5807_v46 }
 0x33d   :  { %v1095_v17 = vmul.f32 %v5667_v55, %v5807_v46 }
 0x33f   :  { %v968_v30 = vpop.permute.xlu0 %967 }
 0x340   :  { %710 = vrot.lane.b32.xlu0 %v705_v54, %s5105_s19  ;;  %748 = vrot.lane.b32.xlu1 %v744_v25, %s5144_s16  ;;  %v974_v34 = vmul.f32 %v968_v30, %v5807_v46  ;;  %v5834_v54 = vpop.permute.xlu1 %760  ;;  %v1150_v30 = vmul.f32 %v5716_v44, %v5698_v11 }
 0x343   :  { %v992_v7 = vpop.permute.xlu0 %991 }
 0x344   :  { %730 = vrot.lane.b32.xlu0 %v725_v61, %s5143_s14  ;;  %783 = vrot.lane.b32.xlu1 %v779_v62, %s5101_s0  ;;  %v5844_v59 = vpop.permute.xlu1 %764  ;;  %v1074_v61 = vmul.f32 %v5663_v8, %v5807_v46  ;;  %v995_v9 = vmul.f32 %v992_v7, %v5807_v46  ;;  %v1129_v8 = vmul.f32 %v5690_v0, %v5698_v11 }
 0x345   :  { %v1169_v0 = vmul.f32 %v5725_v48, %v5698_v11  ;;  %v1190_v7 = vmul.f32 %v5765_v12, %v5698_v11  ;;  %v593_v12 = vmul.f32 %v5739_v53, %v5694_v1 }
 0x347   :  { %v1028_v35 = vpop.permute.xlu0 %1027 }
 0x348   :  { %750 = vrot.lane.b32.xlu0 %v745_v26, %s5144_s16  ;;  %803 = vrot.lane.b32.xlu1 %v799_v29, %s5102_s2  ;;  %v5854_v26 = vpop.permute.xlu1 %935 }
 0x34b   :  { %v1052_v24 = vpop.permute.xlu0 %1051 }
 0x34c   :  { %785 = vrot.lane.b32.xlu0 %v780_v13, %s5101_s0  ;;  %823 = vrot.lane.b32.xlu1 %v819_v19, %s5140_s5  ;;  %v5864_v63 = vpop.permute.xlu1 %939  ;;  %v1034_v13 = vmul.f32 %v1028_v35, %v5807_v46  ;;  %v1149_v19 = vmul.f32 %v5706_v23, %v5698_v11  ;;  %v1189_v23 = vmul.f32 %v5755_v60, %v5698_v11 }
 0x34d   :  { %v1249_v60 = vmul.f32 %v5799_v21, %v5698_v11  ;;  %v1210_v35 = vmul.f32 %v5775_v28, %v5698_v11 }
 0x34f   :  { %v1088_v25 = vpop.permute.xlu0 %1087 }
 0x350   :  { %805 = vrot.lane.b32.xlu0 %v800_v42, %s5102_s2  ;;  %843 = vrot.lane.b32.xlu1 %v839_v14, %s5141_s7  ;;  %v1094_v6 = vmul.f32 %v1088_v25, %v5807_v46  ;;  %v5875_v42 = vpop.permute.xlu1 %1110  ;;  %v1055_v14 = vmul.f32 %v1052_v24, %v5807_v46 }
 0x353   :  { %v1127_v62 = vpop.permute.xlu0 %1126 }
 0x354   :  { %825 = vrot.lane.b32.xlu0 %v820_v39, %s5140_s5  ;;  %883 = vrot.lane.b32.xlu1 %v879_v43, %s5105_s19  ;;  %v5885_v48 = vpop.permute.xlu1 %1114  ;;  %v1075_v43 = vmul.f32 %v5665_v37, %v5807_v46  ;;  %v1269_v37 = vmul.f32 %v5814_v22, %v5698_v11 }
 0x357   :  { %v585_v29 = vpop.permute.xlu0 %584 }
 0x358   :  { %845 = vrot.lane.b32.xlu0 %v840_v20, %s5141_s7  ;;  %903 = vrot.lane.b32.xlu1 %v899_v40, %s5143_s14  ;;  %v5895_v41 = vpop.permute.xlu1 %1285  ;;  %v1130_v40 = vmul.f32 %v1127_v62, %v5698_v11  ;;  %v592_v22 = vmul.f32 %v585_v29, %v5694_v1 }
 0x35b   :  { %v1167_v38 = vpop.permute.xlu0 %1166 }
 0x35c   :  { %863 = vrot.lane.b32.xlu0 %v859_v36, %s5142_s21  ;;  %923 = vrot.lane.b32.xlu1 %v919_v57, %s5144_s16  ;;  %v5904_v55 = vpop.permute.xlu1 %1290  ;;  %v1170_v57 = vmul.f32 %v1167_v38, %v5698_v11 }
 0x35f   :  { %v1203_v5 = vpop.permute.xlu0 %1202 }
 0x360   :  { %865 = vrot.lane.b32.xlu0 %v860_v56, %s5142_s21  ;;  %958 = vrot.lane.b32.xlu1 %v954_v58, %s5101_s0  ;;  %v1209_v39 = vmul.f32 %v1203_v5, %v5698_v11 }
 0x363   :  { %v1227_v20 = vpop.permute.xlu0 %1226 }
 0x364   :  { %885 = vrot.lane.b32.xlu0 %v880_v49, %s5105_s19  ;;  %978 = vrot.lane.b32.xlu1 %v974_v34, %s5102_s2  ;;  %v1230_v25 = vmul.f32 %v1227_v20, %v5698_v11 }
 0x367   :  { %v1247_v45 = vpop.permute.xlu0 %1246 }
 0x368   :  { %905 = vrot.lane.b32.xlu0 %v900_v50, %s5143_s14  ;;  %998 = vrot.lane.b32.xlu1 %v994_v51, %s5140_s5  ;;  %v1250_v62 = vmul.f32 %v1247_v45, %v5698_v11 }
 0x36c   :  { %925 = vrot.lane.b32.xlu0 %v920_v33, %s5144_s16  ;;  %1018 = vrot.lane.b32.xlu1 %v1014_v52, %s5141_s7  ;;  %v1229_v52 = vmul.f32 %v5785_v15, %v5698_v11 }
 0x370   :  { %960 = vrot.lane.b32.xlu0 %v955_v47, %s5101_s0  ;;  %1058 = vrot.lane.b32.xlu1 %v1054_v4, %s5105_s19 }
 0x374   :  { %980 = vrot.lane.b32.xlu0 %v975_v32, %s5102_s2  ;;  %1078 = vrot.lane.b32.xlu1 %v1074_v61, %s5143_s14 }
 0x378   :  { %1000 = vrot.lane.b32.xlu0 %v995_v9, %s5140_s5  ;;  %1098 = vrot.lane.b32.xlu1 %v1094_v6, %s5144_s16 }
 0x37c   :  { %1020 = vrot.lane.b32.xlu0 %v1015_v31, %s5141_s7  ;;  %1133 = vrot.lane.b32.xlu1 %v1129_v8, %s5101_s0  ;;  %v1270_v8 = vmul.f32 %v5823_v10, %v5698_v11  ;;  %v768_v10 = vmul.f32 %v5844_v59, %v5751_v27 }
 0x380   :  { %1038 = vrot.lane.b32.xlu0 %v1034_v13, %s5142_s21  ;;  %1153 = vrot.lane.b32.xlu1 %v1149_v19, %s5102_s2  ;;  %v767_v19 = vmul.f32 %v5834_v54, %v5751_v27 }
 0x384   :  { %1040 = vrot.lane.b32.xlu0 %v1035_v2, %s5142_s21  ;;  %1173 = vrot.lane.b32.xlu1 %v1169_v0, %s5140_s5 }
 0x388   :  { %1060 = vrot.lane.b32.xlu0 %v1055_v14, %s5105_s19  ;;  %1193 = vrot.lane.b32.xlu1 %v1189_v23, %s5141_s7 }
 0x38c   :  { %1080 = vrot.lane.b32.xlu0 %v1075_v43, %s5143_s14  ;;  %1213 = vrot.lane.b32.xlu1 %v1209_v39, %s5142_s21 }
 0x390   :  { %1100 = vrot.lane.b32.xlu0 %v1095_v17, %s5144_s16  ;;  %1253 = vrot.lane.b32.xlu1 %v1249_v60, %s5143_s14 }
 0x394   :  { %1135 = vrot.lane.b32.xlu0 %v1130_v40, %s5101_s0  ;;  %1273 = vrot.lane.b32.xlu1 %v1269_v37, %s5144_s16 }
 0x398   :  { %1155 = vrot.lane.b32.xlu0 %v1150_v30, %s5102_s2 }
 0x39a   :  { %v629_v21 = vpop.permute.xlu0 %628  ;;  %v609_v36 = vpop.permute.xlu1 %608 }
 0x39b   :  { %v614_v49 = vadd.f32 %v609_v36, %v592_v22 }
 0x39c   :  { %1175 = vrot.lane.b32.xlu0 %v1170_v57, %s5140_s5 }
 0x39d   :  { %v634_v50 = vadd.f32 %v629_v21, %v614_v49 }
 0x39e   :  { %v631_v56 = vpop.permute.xlu0 %630  ;;  %v611_v58 = vpop.permute.xlu1 %610 }
 0x39f   :  { %v615_v47 = vadd.f32 %v611_v58, %v593_v12  ;;  %v942_v12 = vmul.f32 %v5854_v26, %v5807_v46 }
 0x3a0   :  { %1195 = vrot.lane.b32.xlu0 %v1190_v7, %s5141_s7 }
 0x3a1   :  { %v635_v9 = vadd.f32 %v631_v56, %v615_v47 }
 0x3a2   :  { %v651_v34 = vpop.permute.xlu0 %650  ;;  %v649_v44 = vpop.permute.xlu1 %648 }
 0x3a3   :  { %v654_v24 = vadd.f32 %v649_v44, %v634_v50  ;;  %v655_v1 = vadd.f32 %v651_v34, %v635_v9 }
 0x3a4   :  { %1215 = vrot.lane.b32.xlu0 %v1210_v35, %s5142_s21 }
 0x3a6   :  { %v671_v51 = vpop.permute.xlu0 %670  ;;  %v669_v33 = vpop.permute.xlu1 %668 }
 0x3a7   :  { %v674_v4 = vadd.f32 %v669_v33, %v654_v24  ;;  %v675_v2 = vadd.f32 %v671_v51, %v655_v1  ;;  %v943_v1 = vmul.f32 %v5864_v63, %v5807_v46 }
 0x3a8   :  { %1233 = vrot.lane.b32.xlu0 %v1229_v52, %s5105_s19 }
 0x3aa   :  { %v689_v32 = vpop.permute.xlu0 %688  ;;  %v709_v28 = vpop.permute.xlu1 %708 }
 0x3ab   :  { %v694_v61 = vadd.f32 %v689_v32, %v674_v4 }
 0x3ac   :  { %1235 = vrot.lane.b32.xlu0 %v1230_v25, %s5105_s19 }
 0x3ad   :  { %v714_v6 = vadd.f32 %v709_v28, %v694_v61 }
 0x3ae   :  { %v691_v15 = vpop.permute.xlu0 %690  ;;  %v729_v31 = vpop.permute.xlu1 %728 }
 0x3af   :  { %v734_v53 = vadd.f32 %v729_v31, %v714_v6  ;;  %v695_v38 = vadd.f32 %v691_v15, %v675_v2 }
 0x3b0   :  { %1255 = vrot.lane.b32.xlu0 %v1250_v62, %s5143_s14 }
 0x3b2   :  { %v711_v29 = vpop.permute.xlu0 %710  ;;  %v749_v13 = vpop.permute.xlu1 %748 }
 0x3b3   :  { %v754_v0 = vadd.f32 %v749_v13, %v734_v53  ;;  %v715_v39 = vadd.f32 %v711_v29, %v695_v38 }
 0x3b4   :  { %1275 = vrot.lane.b32.xlu0 %v1270_v8, %s5144_s16 }
 0x3b5   :  { %v769_v14 = vadd.f32 %v767_v19, %v754_v0 }
 0x3b6   :  { %v731_v23 = vpop.permute.xlu0 %730  ;;  %v784_v5 = vpop.permute.xlu1 %783 }
 0x3b7   :  { %v735_v43 = vadd.f32 %v731_v23, %v715_v39  ;;  %v789_v57 = vadd.f32 %v784_v5, %v769_v14 }
 0x3ba   :  { %v751_v17 = vpop.permute.xlu0 %750  ;;  %v804_v60 = vpop.permute.xlu1 %803 }
 0x3bb   :  { %v755_v20 = vadd.f32 %v751_v17, %v735_v43  ;;  %v809_v56 = vadd.f32 %v804_v60, %v789_v57 }
 0x3bd   :  { %v770_v40 = vadd.f32 %v768_v10, %v755_v20 }
 0x3be   :  { %v786_v37 = vpop.permute.xlu0 %785  ;;  %v824_v45 = vpop.permute.xlu1 %823 }
 0x3bf   :  { %v829_v22 = vadd.f32 %v824_v45, %v809_v56  ;;  %v790_v50 = vadd.f32 %v786_v37, %v770_v40  ;;  %v1117_v37 = vmul.f32 %v5875_v42, %v5698_v11 }
 0x3c2   :  { %v806_v54 = vpop.permute.xlu0 %805  ;;  %v844_v30 = vpop.permute.xlu1 %843 }
 0x3c3   :  { %v849_v49 = vadd.f32 %v844_v30, %v829_v22  ;;  %v810_v33 = vadd.f32 %v806_v54, %v790_v50 }
 0x3c6   :  { %v826_v21 = vpop.permute.xlu0 %825  ;;  %v884_v36 = vpop.permute.xlu1 %883 }
 0x3c7   :  { %v830_v24 = vadd.f32 %v826_v21, %v810_v33 }
 0x3ca   :  { %v846_v58 = vpop.permute.xlu0 %845  ;;  %v904_v7 = vpop.permute.xlu1 %903 }
 0x3cb   :  { %v850_v32 = vadd.f32 %v846_v58, %v830_v24 }
 0x3ce   :  { %v864_v34 = vpop.permute.xlu0 %863  ;;  %v924_v44 = vpop.permute.xlu1 %923 }
 0x3cf   :  { %v869_v35 = vadd.f32 %v864_v34, %v849_v49 }
 0x3d1   :  { %v889_v51 = vadd.f32 %v884_v36, %v869_v35 }
 0x3d2   :  { %v866_v27 = vpop.permute.xlu0 %865  ;;  %v959_v59 = vpop.permute.xlu1 %958 }
 0x3d3   :  { %v909_v52 = vadd.f32 %v904_v7, %v889_v51  ;;  %v870_v61 = vadd.f32 %v866_v27, %v850_v32 }
 0x3d5   :  { %v929_v47 = vadd.f32 %v924_v44, %v909_v52  ;;  %v1118_v44 = vmul.f32 %v5885_v48, %v5698_v11 }
 0x3d6   :  { %v886_v4 = vpop.permute.xlu0 %885  ;;  %v979_v25 = vpop.permute.xlu1 %978 }
 0x3d7   :  { %v944_v28 = vadd.f32 %v942_v12, %v929_v47  ;;  %v890_v6 = vadd.f32 %v886_v4, %v870_v61 }
 0x3d9   :  { %v964_v26 = vadd.f32 %v959_v59, %v944_v28 }
 0x3da   :  { %v906_v9 = vpop.permute.xlu0 %905  ;;  %v999_v62 = vpop.permute.xlu1 %998 }
 0x3db   :  { %v910_v15 = vadd.f32 %v906_v9, %v890_v6  ;;  %v984_v0 = vadd.f32 %v979_v25, %v964_v26 }
 0x3dd   :  { %v1004_v14 = vadd.f32 %v999_v62, %v984_v0  ;;  %v1319_v0 = vld [vmem:[%s6395_s6 + $0x10] sm:$0xff] }
 0x3de   :  { %v926_v31 = vpop.permute.xlu0 %925  ;;  %v1019_v29 = vpop.permute.xlu1 %1018 }
 0x3df   :  { %v930_v53 = vadd.f32 %v926_v31, %v910_v15  ;;  %v1024_v39 = vadd.f32 %v1019_v29, %v1004_v14 }
 0x3e1   :  { %v945_v8 = vadd.f32 %v943_v1, %v930_v53 }
 0x3e2   :  { %v961_v13 = vpop.permute.xlu0 %960  ;;  %v1059_v2 = vpop.permute.xlu1 %1058 }
 0x3e3   :  { %v965_v10 = vadd.f32 %v961_v13, %v945_v8 }
 0x3e6   :  { %v981_v19 = vpop.permute.xlu0 %980  ;;  %v1079_v23 = vpop.permute.xlu1 %1078 }
 0x3e7   :  { %v985_v46 = vadd.f32 %v981_v19, %v965_v10  ;;  %v1317_v19 = vld [vmem:[%s6395_s6] sm:$0xff] }
 0x3ea   :  { %v1001_v38 = vpop.permute.xlu0 %1000  ;;  %v1099_v60 = vpop.permute.xlu1 %1098 }
 0x3eb   :  { %v1005_v45 = vadd.f32 %v1001_v38, %v985_v46 }
 0x3ee   :  { %v1021_v5 = vpop.permute.xlu0 %1020  ;;  %v1134_v30 = vpop.permute.xlu1 %1133 }
 0x3ef   :  { %v1025_v36 = vadd.f32 %v1021_v5, %v1005_v45  ;;  %v1325_v45 = vld [vmem:[%s6395_s6 + $0x40] sm:$0x7] }
 0x3f2   :  { %v1039_v43 = vpop.permute.xlu0 %1038  ;;  %v1154_v22 = vpop.permute.xlu1 %1153 }
 0x3f3   :  { %v1044_v17 = vadd.f32 %v1039_v43, %v1024_v39 }
 0x3f5   :  { %v1064_v20 = vadd.f32 %v1059_v2, %v1044_v17  ;;  %v1318_v2 = vld [vmem:[%s6395_s6 + $0x8] sm:$0xff] }
 0x3f6   :  { %v1041_v40 = vpop.permute.xlu0 %1040  ;;  %v1174_v51 = vpop.permute.xlu1 %1173 }
 0x3f7   :  { %v1084_v63 = vadd.f32 %v1079_v23, %v1064_v20  ;;  %v1045_v56 = vadd.f32 %v1041_v40, %v1025_v36  ;;  %v4612_v23 = vpack.c.bf16 %v1318_v2, %v1317_v19  ;;  %v1321_v20 = vld [vmem:[%s6395_s6 + $0x20] sm:$0xff]  ;;  %v1322_v40 = vld [vmem:[%s6395_s6 + $0x28] sm:$0xff]  ;;  %v1417_v2 = vld [vmem:[#allocation3 + $0x30] sm:$0xff] }
 0x3f8   :  { %v4620_v46 = vpack.c.bf16 %v1322_v40, %v1321_v20  ;;  %v1412_v36 = vld [vmem:[#allocation3 + $0x8] sm:$0xff]  ;;  %v1439_v19 = vld [vmem:[#allocation3 + $0xe0] sm:$0xff]  ;;  %v2377_v40 = vld [vmem:[%s6399_s10 + $0x18] sm:$0xff] }
 0x3f9   :  { %v1104_v54 = vadd.f32 %v1099_v60, %v1084_v63  ;;  %4613 = vmatprep.subr.bf16.mxu1 %v4612_v23  ;;  %v1323_v63 = vld [vmem:[%s6395_s6 + $0x30] sm:$0xff] }
 0x3fa   :  { %v1061_v21 = vpop.permute.xlu0 %1060  ;;  %v1194_v33 = vpop.permute.xlu1 %1193  ;;  %4615 = vmatpush3.bf16.msra.mxu1 %v4612_v23  ;;  %v2376_v20 = vld [vmem:[%s6399_s10 + $0x10] sm:$0xff] }
 0x3fb   :  { %v1119_v57 = vadd.f32 %v1117_v37, %v1104_v54  ;;  %v1065_v7 = vadd.f32 %v1061_v21, %v1045_v56  ;;  %v1432_v21 = vld [vmem:[#allocation3 + $0xa8] sm:$0xff] }
 0x3fd   :  { %v1139_v42 = vadd.f32 %v1134_v30, %v1119_v57  ;;  %v1416_v30 = vld [vmem:[#allocation3 + $0x28] sm:$0xff] }
 0x3fe   :  { %v1081_v58 = vpop.permute.xlu0 %1080  ;;  %v1214_v47 = vpop.permute.xlu1 %1213  ;;  %v4636_v56 = vpack.c.bf16 %v1432_v21, %v1416_v30  ;;  %v1441_v30 = vld [vmem:[#allocation3 + $0xf0] sm:$0xff] }
 0x3ff   :  { %v1085_v49 = vadd.f32 %v1081_v58, %v1065_v7  ;;  %v1159_v52 = vadd.f32 %v1154_v22, %v1139_v42  ;;  %v1428_v58 = vld [vmem:[#allocation3 + $0x88] sm:$0xff]  ;;  %v1415_v7 = vld [vmem:[#allocation3 + $0x20] sm:$0xff] }
 0x400   :  { %v1431_v22 = vld [vmem:[#allocation3 + $0xa0] sm:$0xff]  ;;  %4637 = vmatprep.subr.bf16.mxu0 %v4636_v56 }
 0x401   :  { %v1179_v24 = vadd.f32 %v1174_v51, %v1159_v52  ;;  %v1427_v42 = vld [vmem:[#allocation3 + $0x80] sm:$0xff] }
 0x402   :  { %v1101_v34 = vpop.permute.xlu0 %1100  ;;  %v1254_v28 = vpop.permute.xlu1 %1253 }
 0x403   :  { %v1105_v35 = vadd.f32 %v1101_v34, %v1085_v49  ;;  %v1199_v25 = vadd.f32 %v1194_v33, %v1179_v24  ;;  %v4628_v49 = vpack.c.bf16 %v1428_v58, %v1412_v36  ;;  %v4638_v34 = vpack.c.bf16 %v1431_v22, %v1415_v7  ;;  %v1436_v24 = vld [vmem:[#allocation3 + $0xc8] sm:$0xff] }
 0x404   :  { %v2284_v36 = vsub.s32 1, %v5269_v16  ;;  %v2296_v58 = vsub.s32 4, %v5269_v16  ;;  %v2300_v7 = vsub.s32 5, %v5269_v16 }
 0x405   :  { %v1120_v50 = vadd.f32 %v1118_v44, %v1105_v35  ;;  %v1219_v61 = vadd.f32 %v1214_v47, %v1199_v25  ;;  %4639 = vmatpush1.bf16.msra.mxu0 %v4638_v34  ;;  %v1430_v25 = vld [vmem:[#allocation3 + $0x98] sm:$0xff]  ;;  %v2288_v34 = vsub.s32 2, %v5269_v16 }
 0x406   :  { %v1136_v27 = vpop.permute.xlu0 %1135  ;;  %v1274_v31 = vpop.permute.xlu1 %1273 }
 0x407   :  { %v1140_v9 = vadd.f32 %v1136_v27, %v1120_v50  ;;  %v1411_v27 = vld [vmem:[#allocation3] sm:$0xff] }
 0x408   :  { %v4630_v33 = vpack.c.bf16 %v1427_v42, %v1411_v27  ;;  %v2308_v27 = vsub.s32 7, %v5269_v16 }
 0x40a   :  { %v1156_v59 = vpop.permute.xlu0 %1155 }
 0x40b   :  { %v1160_v62 = vadd.f32 %v1156_v59, %v1140_v9  ;;  %v1413_v9 = vld [vmem:[#allocation3 + $0x10] sm:$0xff] }
 0x40e   :  { %v1176_v12 = vpop.permute.xlu0 %1175 }
 0x40f   :  { %v1180_v48 = vadd.f32 %v1176_v12, %v1160_v62  ;;  %v1420_v12 = vld [vmem:[#allocation3 + $0x48] sm:$0xff] }
 0x410   :  { %v4644_v47 = vpack.c.bf16 %v1436_v24, %v1420_v12  ;;  %v1424_v62 = vld [vmem:[#allocation3 + $0x68] sm:$0xff]  ;;  %v2066_v12 = vld [vmem:[#allocation5] sm:$0xff] }
 0x411   :  { %v2070_v24 = vld [vmem:[#allocation5 + $0x20] sm:$0xff] }
 0x412   :  { %v1196_v4 = vpop.permute.xlu0 %1195  ;;  %4645 = vmatprep.subr.bf16.mxu0 %v4644_v47 }
 0x413   :  { %v1200_v53 = vadd.f32 %v1196_v4, %v1180_v48  ;;  %v1414_v4 = vld [vmem:[#allocation3 + $0x18] sm:$0xff] }
 0x414   :  { %v1418_v48 = vld [vmem:[#allocation3 + $0x38] sm:$0xff] }
 0x416   :  { %v1216_v32 = vpop.permute.xlu0 %1215 }
 0x417   :  { %v1220_v29 = vadd.f32 %v1216_v32, %v1200_v53  ;;  %v4632_v32 = vpack.c.bf16 %v1430_v25, %v1414_v4  ;;  %v2067_v25 = vld [vmem:[#allocation5 + $0x8] sm:$0xff] }
 0x41a   :  { %v1234_v6 = vpop.permute.xlu0 %1233 }
 0x41b   :  { %v1239_v11 = vadd.f32 %v1234_v6, %v1219_v61  ;;  %v1435_v61 = vld [vmem:[#allocation3 + $0xc0] sm:$0xff]  ;;  %v1429_v6 = vld [vmem:[#allocation3 + $0x90] sm:$0xff] }
 0x41c   :  { %v4634_v53 = vpack.c.bf16 %v1429_v6, %v1413_v9  ;;  %v2083_v9 = vld [vmem:[#allocation5 + $0x88] sm:$0xff] }
 0x41d   :  { %v1259_v15 = vadd.f32 %v1254_v28, %v1239_v11  ;;  %v1419_v28 = vld [vmem:[#allocation3 + $0x40] sm:$0xff]  ;;  %v1440_v11 = vld [vmem:[#allocation3 + $0xe8] sm:$0xff] }
 0x41e   :  { %v1236_v1 = vpop.permute.xlu0 %1235  ;;  %v2087_v6 = vld [vmem:[#allocation5 + $0xa8] sm:$0xff] }
 0x41f   :  { %v1279_v8 = vadd.f32 %v1274_v31, %v1259_v15  ;;  %v1240_v14 = vadd.f32 %v1236_v1, %v1220_v29  ;;  %v1434_v15 = vld [vmem:[#allocation3 + $0xb8] sm:$0xff]  ;;  %v4646_v31 = vpack.c.bf16 %v1435_v61, %v1419_v28  ;;  %v4652_v29 = vpack.c.bf16 %v1440_v11, %v1424_v62  ;;  %v2086_v28 = vld [vmem:[#allocation5 + $0xa0] sm:$0xff]  ;;  %v2071_v61 = vld [vmem:[#allocation5 + $0x28] sm:$0xff] }
 0x420   :  { %v2280_v62 = vsub.s32 0, %v5269_v16 }
 0x421   :  { %v1293_v13 = vadd.f32 %v5895_v41, %v1279_v8  ;;  %v1320_v41 = vld [vmem:[%s6395_s6 + $0x18] sm:$0xff] }
 0x422   :  { %v1256_v26 = vpop.permute.xlu0 %1255  ;;  %v4616_v5 = vpack.c.bf16 %v1320_v41, %v1319_v0  ;;  %v1433_v0 = vld [vmem:[#allocation3 + $0xb0] sm:$0xff] }
 0x423   :  { %v1295_v38 = vmax.f32 %v1293_v13, 0.0  ;;  %v1260_v39 = vadd.f32 %v1256_v26, %v1240_v14  ;;  %v4640_v13 = vpack.c.bf16 %v1434_v15, %v1418_v48  ;;  %v1423_v26 = vld [vmem:[#allocation3 + $0x60] sm:$0xff]  ;;  %v1438_v14 = vld [vmem:[#allocation3 + $0xd8] sm:$0xff]  ;;  %v4642_v41 = vpack.c.bf16 %v1433_v0, %v1417_v2 }
 0x424   :  { %4617 = vmatprep.subr.bf16.mxu1 %v4616_v5  ;;  %v4654_v23 = vpack.c.bf16 %v1439_v19, %v1423_v26  ;;  %v6106_v15 = vld [vmem:[%s6398_s9] sm:$0xff] }
 0x425   :  { %1299 = vrot.lane.b32.xlu1 %v1295_v38, %s5101_s0  ;;  %4619 = vmatpush3.bf16.msra.mxu1 %v4616_v5 }
 0x426   :  { %v1276_v43 = vpop.permute.xlu0 %1275  ;;  %4621 = vmatprep.subr.bf16.mxu1 %v4620_v46 }
 0x427   :  { %v1280_v17 = vadd.f32 %v1276_v43, %v1260_v39  ;;  %v2374_v39 = vld [vmem:[%s6399_s10] sm:$0xff]  ;;  %v2375_v43 = vld [vmem:[%s6399_s10 + $0x8] sm:$0xff] }
 0x429   :  { %v1294_v60 = vadd.f32 %v5904_v55, %v1280_v17  ;;  %v1324_v55 = vld [vmem:[%s6395_s6 + $0x38] sm:$0xff]  ;;  %4623 = vmatpush3.bf16.msra.mxu1 %v4620_v46 }
 0x42a   :  { %v4624_v37 = vpack.c.bf16 %v1324_v55, %v1323_v63  ;;  %v1421_v17 = vld [vmem:[#allocation3 + $0x50] sm:$0xff]  ;;  %v1426_v63 = vld [vmem:[#allocation3 + $0x78] sm:$0xff] }
 0x42b   :  { %v1296_v10 = vmax.f32 %v1294_v60, 0.0  ;;  %v1437_v60 = vld [vmem:[#allocation3 + $0xd0] sm:$0xff]  ;;  %v1442_v55 = vld [vmem:[#allocation3 + $0xf8] sm:$0xff] }
 0x42c   :  { %4625 = vmatprep.subr.bf16.mxu1 %v4624_v37  ;;  %v4650_v46 = vpack.c.bf16 %v1437_v60, %v1421_v17  ;;  %v2074_v60 = vld [vmem:[#allocation5 + $0x40] sm:$0xff] }
 0x42d   :  { %1301 = vrot.lane.b32.xlu0 %v1296_v10, %s5101_s0  ;;  %4627 = vmatpush3.bf16.msra.mxu1 %v4624_v37  ;;  %v6027_v37 = vpack.c.bf16 %v2377_v40, %v2376_v20  ;;  %v6112_v20 = vrot.slane %v6106_v15, %v2284_v36  ;;  %v6115_v40 = vrot.slane %v6106_v15, %v2296_v58 }
 0x42e   :  { %4377 = vmatprep.subr.msk.mxu1 %vm426_vm11, %v1325_v45 }
 0x431   :  { %4378 = vmatpush3.msk.msra.mxu1 %vm426_vm11, %v1325_v45  ;;  %v4656_v45 = vpack.c.bf16 %v1442_v55, %v1426_v63 }
 0x432   :  { %4629 = vmatprep.subr.bf16.mxu1 %v4628_v49 }
 0x497   :  { %v1300_v54 = vpop.permute.xlu1 %1299 }
 0x498   :  { %v1305_v57 = vmax.f32 %v1295_v38, %v1300_v54  ;;  %v1422_v38 = vld [vmem:[#allocation3 + $0x58] sm:$0xff]  ;;  %v1425_v54 = vld [vmem:[#allocation3 + $0x70] sm:$0xff] }
 0x499   :  { %v4648_v5 = vpack.c.bf16 %v1438_v14, %v1422_v38  ;;  %v4658_v21 = vpack.c.bf16 %v1441_v30, %v1425_v54  ;;  %v2075_v30 = vld [vmem:[#allocation5 + $0x48] sm:$0xff] }
 0x49a   :  { %1309 = vrot.lane.b32.xlu1 %v1305_v57, %s5140_s5 }
 0x49f   :  { %v1302_v44 = vpop.permute.xlu0 %1301 }
 0x4a0   :  { %v1306_v35 = vmax.f32 %v1296_v10, %v1302_v44  ;;  %v6013_v10 = vpack.c.bf16 %v2375_v43, %v2374_v39  ;;  %v2292_v44 = vsub.s32 3, %v5269_v16  ;;  %v2068_v43 = vld [vmem:[#allocation5 + $0x10] sm:$0xff] }
 0x4a2   :  { %1311 = vrot.lane.b32.xlu0 %v1306_v35, %s5140_s5 }
 0x50c   :  { %v1310_v50 = vpop.permute.xlu1 %1309 }
 0x50d   :  { %v1315_v51 = vmax.f32 %v1305_v57, %v1310_v50  ;;  %v6069_v57 = vld [vmem:[%s6398_s9 + $0x8] sm:$0xff]  ;;  %s5145_s9 = smov 64  }
 0x50e   :  { %v6072_v56 = vrot.slane %v6069_v57, %v2284_v36  ;;  %v6077_v22 = vrot.slane %v6069_v57, %v2296_v58  ;;  %v6080_v49 = vrot.slane %v6069_v57, %v2300_v7  ;;  %v6088_v50 = vrot.slane %v6069_v57, %v2292_v44  ;;  %v2090_v36 = vld [vmem:[#allocation5 + $0xc0] sm:$0xff] }
 0x50f   :  { %4379 = vmatprep.mubr.msk.f32.mxu1 %vm1326_vm0, %v1315_v51  ;;  %v2304_v51 = vsub.s32 6, %v5269_v16  ;;  %v6127_v58 = vrot.slane %v6069_v57, %v2280_v62 }
 0x511   :  { %v6095_v42 = vrot.slane %v6069_v57, %v2304_v51 }
 0x514   :  { %v1312_v59 = vpop.permute.xlu0 %1311 }
 0x515   :  { %v1316_v52 = vmax.f32 %v1306_v35, %v1312_v59  ;;  %v6085_v35 = vrot.slane %v6069_v57, %v2288_v34  ;;  %v6100_v59 = vrot.slane %v6069_v57, %v2308_v27 }
 0x517   :  { %4380 = vmatmul.mubr.msk.f32.vlgmr.msra.gmra.mrb[2].mxu1 %vm1326_vm0, %v1316_v52 }
 0x518   :  { %4631 = vmatpush1.bf16.msra.mxu1 %v4630_v33  ;;  %1514 = vmatprep.mubr.f32.mxu1 %v5112_v18 }
 0x519   :  { %4633 = vmatprep.subr.bf16.mxu1 %v4632_v32  ;;  %v2082_v32 = vld [vmem:[#allocation5 + $0x80] sm:$0xff] }
 0x5ea   :  { %v5978_v1 = vpop.f32.mrb[2].mxu1 }
 0x5eb   :  { %v5980_v8 = vpop.f32.mrb[3].mxu1 }
 0x5ec   :  { %4165 = vmatmul.mubr.msk.f32.vlgmr.msra.gmra.mrb[4].mxu1 %vm1443_vm1, %v5980_v8  ;;  %4169 = vmatmul.mubr.msk.f32.vlgmr.msra.gmra.mrb[2].mxu0 %vm1443_vm1, %v5980_v8 }
 0x5ed   :  { %4647 = vmatpush1.bf16.msra.mxu0 %v4646_v31  ;;  %1520 = vmatprep.mubr.f32.mxu1 %v5112_v18 }
 0x5ee   :  { %1674 = vmatprep.mubr.f32.mxu0 %v5112_v18  ;;  %4635 = vmatpush1.bf16.msra.mxu1 %v4634_v53 }
 0x5ef   :  { %4653 = vmatprep.subr.bf16.mxu0 %v4652_v29  ;;  %4641 = vmatprep.subr.bf16.mxu1 %v4640_v13 }
 0x5f0   :  { %4166 = vmatmul.mubr.msk.f32.gmra.mrb[6].mxu1 %vm1443_vm1, %v5978_v1  ;;  %4170 = vmatmul.mubr.msk.f32.gmra.mrb[4].mxu0 %vm1443_vm1, %v5978_v1 }
 0x5f1   :  { %1591 = vmatprep.mubr.f32.mxu1 %v5112_v18  ;;  %1822 = vmatprep.mubr.f32.mxu0 %v5112_v18 }
 0x5f4   :  { %4167 = vmatmul.mubr.msk.f32.vlgmr.msra.gmra.mrb[8].mxu1 %vm1443_vm1, %v5980_v8  ;;  %4173 = vmatmul.mubr.msk.f32.vlgmr.msra.gmra.mrb[6].mxu0 %vm1443_vm1, %v5980_v8 }
 0x5f5   :  { %4655 = vmatpush1.bf16.msra.mxu0 %v4654_v23  ;;  %1597 = vmatprep.mubr.f32.mxu1 %v5112_v18  ;;  %v6109_v23 = vrot.slane %v6106_v15, %v2280_v62 }
 0x5f6   :  { %1828 = vmatprep.mubr.f32.mxu0 %v5112_v18  ;;  %4643 = vmatpush1.bf16.msra.mxu1 %v4642_v41 }
 0x5f7   :  { %4660 = vmatprep.subr.bf16.mxu0 %v5109_v3  ;;  %4649 = vmatprep.subr.bf16.mxu1 %v4648_v5 }
 0x5f8   :  { %4168 = vmatmul.mubr.msk.f32.gmra.mrb[10].mxu1 %vm1443_vm1, %v5978_v1  ;;  %4174 = vmatmul.mubr.msk.f32.gmra.mrb[8].mxu0 %vm1443_vm1, %v5978_v1 }
 0x5f9   :  { %1745 = vmatprep.mubr.f32.mxu1 %v5112_v18  ;;  %1976 = vmatprep.mubr.f32.mxu0 %v5112_v18 }
 0x5fc   :  { %4171 = vmatmul.mubr.msk.f32.vlgmr.msra.gmra.mrb[12].mxu1 %vm1443_vm1, %v5980_v8  ;;  %4177 = vmatmul.mubr.msk.f32.vlgmr.msra.gmra.mrb[10].mxu0 %vm1443_vm1, %v5980_v8 }
 0x5fd   :  { %4662 = vmatpush3.bf16.msra.mxu0 %v6013_v10  ;;  %1751 = vmatprep.mubr.f32.mxu1 %v5112_v18 }
 0x5fe   :  { %1982 = vmatprep.mubr.f32.mxu0 %v5112_v18  ;;  %4663 = vmatprep.subr.bf16.mxu0 %v5109_v3 }
 0x5ff   :  { %4651 = vmatpush1.bf16.msra.mxu1 %v4650_v46 }
 0x600   :  { %4172 = vmatmul.mubr.msk.f32.gmra.mrb[14].mxu1 %vm1443_vm1, %v5978_v1  ;;  %4178 = vmatmul.mubr.msk.f32.gmra.mrb[12].mxu0 %vm1443_vm1, %v5978_v1 }
 0x601   :  { %4665 = vmatpush3.bf16.msra.mxu0 %v6027_v37  ;;  %1899 = vmatprep.mubr.f32.mxu1 %v5112_v18 }
 0x602   :  { %4390 = vmatprep.mubr.msk.f32.mxu0 %vm5111_vm14, %v5112_v18  ;;  %4657 = vmatprep.subr.bf16.mxu1 %v4656_v45  ;;  %v2069_v45 = vld [vmem:[#allocation5 + $0x18] sm:$0xff] }
 0x603   :  { %4672 = vmatprep.subr.bf16.mxu0 %v5109_v3 }
 0x604   :  { %4175 = vmatmul.mubr.msk.f32.vlgmr.msra.gmra.mrb[16].mxu1 %vm1443_vm1, %v5980_v8  ;;  %4391 = vmatmul.mubr.f32.vlgmr.msra.gmra.mrb[14].mxu0 %v5112_v18 }
 0x605   :  { %1905 = vmatprep.mubr.f32.mxu1 %v5112_v18  ;;  %4659 = vmatpush1.bf16.msra.mxu1 %v4658_v21  ;;  %v6118_v21 = vrot.slane %v6106_v15, %v2288_v34  ;;  %v2091_v34 = vld [vmem:[#allocation5 + $0xc8] sm:$0xff] }
 0x606   :  { %4666 = vmatprep.subr.bf16.mxu1 %v5109_v3  ;;  %4674 = vmatpush3.bf16.msra.mxu0 %v6013_v10 }
 0x607   :  { %4675 = vmatprep.subr.bf16.mxu0 %v5109_v3  ;;  %4412 = vmatprep.mubr.msk.f32.mxu0 %vm5111_vm14, %v5112_v18 }
 0x608   :  { %4176 = vmatmul.mubr.msk.f32.gmra.mrb[18].mxu1 %vm1443_vm1, %v5978_v1 }
 0x609   :  { %2053 = vmatprep.mubr.f32.mxu1 %v5112_v18 }
 0x60a   :  { %4677 = vmatpush3.bf16.msra.mxu0 %v6027_v37 }
 0x60b   :  { %4684 = vmatprep.subr.bf16.mxu0 %v5109_v3 }
 0x60c   :  { %4179 = vmatmul.mubr.msk.f32.vlgmr.msra.gmra.mrb[20].mxu1 %vm1443_vm1, %v5980_v8 }
 0x60d   :  { %2059 = vmatprep.mubr.f32.mxu1 %v5112_v18  ;;  %4668 = vmatpush3.bf16.msra.mxu1 %v6013_v10 }
 0x60e   :  { %4669 = vmatprep.subr.bf16.mxu1 %v5109_v3 }
 0x610   :  { %4180 = vmatmul.mubr.msk.f32.gmra.mrb[22].mxu1 %vm1443_vm1, %v5978_v1 }
 0x611   :  { %4671 = vmatpush3.bf16.msra.mxu1 %v6027_v37  ;;  %4401 = vmatprep.mubr.msk.f32.mxu1 %vm5111_vm14, %v5112_v18 }
 0x612   :  { %4678 = vmatprep.subr.bf16.mxu1 %v5109_v3 }
 0x6bf   :  { %v1516_v33 = vpop.f32.mrb[4].mxu1  ;;  %v1670_v52 = vpop.f32.mrb[2].mxu0 }
 0x6c0   :  { %v1518_v47 = vpop.f32.mrb[5].mxu1  ;;  %v1672_v4 = vpop.f32.mrb[3].mxu0  ;;  %v2098_v31 = vmul.f32 %v2066_v12, %v1516_v33  ;;  %v2102_v1 = vmul.f32 %v2070_v24, %v1670_v52  ;;  %v6121_v33 = vrot.slane %v6106_v15, %v2300_v7  ;;  %v2084_v24 = vld [vmem:[#allocation5 + $0x90] sm:$0xff] }
 0x6c1   :  { %v2099_v26 = vmul.f32 %v2067_v25, %v1518_v47  ;;  %v2103_v19 = vmul.f32 %v2071_v61, %v1672_v4  ;;  %v6124_v47 = vrot.slane %v6106_v15, %v2292_v44  ;;  %v2085_v61 = vld [vmem:[#allocation5 + $0x98] sm:$0xff] }
 0x6c3   :  { %v1522_v11 = vpop.f32.mrb[6].mxu1  ;;  %v1676_v48 = vpop.f32.mrb[4].mxu0 }
 0x6c4   :  { %v2114_v53 = vmul.f32 %v2082_v32, %v1522_v11  ;;  %v2118_v8 = vmul.f32 %v2086_v28, %v1676_v48  ;;  %v1524_v29 = vpop.f32.mrb[7].mxu1  ;;  %v1678_v13 = vpop.f32.mrb[5].mxu0 }
 0x6c5   :  { %v2115_v2 = vmul.f32 %v2083_v9, %v1524_v29  ;;  %v2119_v0 = vmul.f32 %v2087_v6, %v1678_v13 }
 0x6c6   :  { %v2130_v38 = vadd.f32 %v2114_v53, %v2098_v31  ;;  %v2134_v14 = vadd.f32 %v2118_v8, %v2102_v1 }
 0x6c7   :  { %v2131_v41 = vadd.f32 %v2115_v2, %v2099_v26  ;;  %v2135_v5 = vadd.f32 %v2119_v0, %v2103_v19  ;;  %v1593_v39 = vpop.f32.mrb[8].mxu1  ;;  %v1824_v17 = vpop.f32.mrb[6].mxu0  ;;  %v2072_v26 = vld [vmem:[#allocation5 + $0x30] sm:$0xff] }
 0x6c8   :  { %v2162_v46 = vrot.slane %v2130_v38, 4  ;;  %v2166_v63 = vrot.slane %v2134_v14, 4  ;;  %v1595_v55 = vpop.f32.mrb[9].mxu1  ;;  %v1826_v54 = vpop.f32.mrb[7].mxu0  ;;  %v2100_v32 = vmul.f32 %v2068_v43, %v1593_v39  ;;  %v2106_v28 = vmul.f32 %v2074_v60, %v1824_v17 }
 0x6c9   :  { %v2163_v52 = vrot.slane %v2131_v41, 4  ;;  %v2167_v12 = vrot.slane %v2135_v5, 4  ;;  %v2101_v7 = vmul.f32 %v2069_v45, %v1595_v55  ;;  %v2107_v11 = vmul.f32 %v2075_v30, %v1826_v54 }
 0x6ca   :  { %v2194_v4 = vadd.f32 %v2162_v46, %v2130_v38  ;;  %v2198_v25 = vadd.f32 %v2166_v63, %v2134_v14  ;;  %v2078_v14 = vld [vmem:[#allocation5 + $0x60] sm:$0xff]  ;;  %v6132_v39 = vrot.slane %v6106_v15, %v2304_v51  ;;  %v2079_v63 = vld [vmem:[#allocation5 + $0x68] sm:$0xff] }
 0x6cb   :  { %v2195_v9 = vadd.f32 %v2163_v52, %v2131_v41  ;;  %v2199_v6 = vadd.f32 %v2167_v12, %v2135_v5  ;;  %v1599_v48 = vpop.f32.mrb[10].mxu1  ;;  %v1830_v31 = vpop.f32.mrb[8].mxu0  ;;  %v2073_v41 = vld [vmem:[#allocation5 + $0x38] sm:$0xff]  ;;  %v2094_v51 = vld [vmem:[#allocation5 + $0xe0] sm:$0xff] }
 0x6cc   :  { %v2116_v1 = vmul.f32 %v2084_v24, %v1599_v48  ;;  %v2122_v53 = vmul.f32 %v2090_v36, %v1830_v31  ;;  %v1601_v8 = vpop.f32.mrb[11].mxu1  ;;  %v1832_v44 = vpop.f32.mrb[9].mxu0  ;;  %v2226_v29 = vrot.slane %v2194_v4, 2  ;;  %v2230_v13 = vrot.slane %v2198_v25, 2  ;;  %v2089_v31 = vld [vmem:[#allocation5 + $0xb8] sm:$0xff] }
 0x6cd   :  { %v2117_v57 = vmul.f32 %v2085_v61, %v1601_v8  ;;  %v2123_v62 = vmul.f32 %v2091_v34, %v1832_v44  ;;  %v2227_v19 = vrot.slane %v2195_v9, 2  ;;  %v2231_v2 = vrot.slane %v2199_v6, 2  ;;  %v2088_v34 = vld [vmem:[#allocation5 + $0xb0] sm:$0xff] }
 0x6ce   :  { %v2132_v0 = vadd.f32 %v2116_v1, %v2100_v32  ;;  %v2138_v38 = vadd.f32 %v2122_v53, %v2106_v28  ;;  %v2262_v5 = vadd.f32 %v2230_v13, %v2198_v25  ;;  %v2258_v36 = vadd.f32 %v2226_v29, %v2194_v4  ;;  %v2095_v1 = vld [vmem:[#allocation5 + $0xe8] sm:$0xff] }
 0x6cf   :  { %v2133_v43 = vadd.f32 %v2117_v57, %v2101_v7  ;;  %v2139_v17 = vadd.f32 %v2123_v62, %v2107_v11  ;;  %v1747_v60 = vpop.f32.mrb[12].mxu1  ;;  %v1978_v46 = vpop.f32.mrb[10].mxu0  ;;  %v2259_v55 = vadd.f32 %v2227_v19, %v2195_v9  ;;  %v2263_v45 = vadd.f32 %v2231_v2, %v2199_v6 }
 0x6d0   :  { %v2164_v54 = vrot.slane %v2132_v0, 4  ;;  %v2170_v30 = vrot.slane %v2138_v38, 4  ;;  %v2104_v52 = vmul.f32 %v2072_v26, %v1747_v60  ;;  %v1749_v12 = vpop.f32.mrb[13].mxu1  ;;  %v1980_v24 = vpop.f32.mrb[11].mxu0  ;;  %v2110_v28 = vmul.f32 %v2078_v14, %v1978_v46 }
 0x6d1   :  { %v2165_v32 = vrot.slane %v2133_v43, 4  ;;  %v2171_v25 = vrot.slane %v2139_v17, 4  ;;  %v2105_v61 = vmul.f32 %v2073_v41, %v1749_v12  ;;  %v2111_v11 = vmul.f32 %v2079_v63, %v1980_v24 }
 0x6d2   :  { %v2196_v48 = vadd.f32 %v2164_v54, %v2132_v0  ;;  %v2202_v7 = vadd.f32 %v2170_v30, %v2138_v38  ;;  %v6135_v9 = vadd.f32 %v6112_v20, %v2259_v55  ;;  %v6138_v4 = vadd.f32 %v6115_v40, %v2262_v5 }
 0x6d3   :  { %v2197_v6 = vadd.f32 %v2165_v32, %v2133_v43  ;;  %v2203_v53 = vadd.f32 %v2171_v25, %v2139_v17  ;;  %v1753_v8 = vpop.f32.mrb[14].mxu1  ;;  %v1984_v44 = vpop.f32.mrb[12].mxu0  ;;  %v6141_v29 = vadd.f32 %v6121_v33, %v2263_v45  ;;  %v2358_v17 = vadd.f32 %v6109_v23, %v2258_v36  ;;  %v2076_v33 = vld [vmem:[#allocation5 + $0x50] sm:$0xff] }
 0x6d4   :  { %v2120_v13 = vmul.f32 %v2088_v34, %v1753_v8  ;;  %v2126_v57 = vmul.f32 %v2094_v51, %v1984_v44  ;;  %v1755_v62 = vpop.f32.mrb[15].mxu1  ;;  %v1986_v26 = vpop.f32.mrb[13].mxu0  ;;  %v2228_v19 = vrot.slane %v2196_v48, 2  ;;  %v2234_v2 = vrot.slane %v2202_v7, 2  ;;  %v2092_v51 = vld [vmem:[#allocation5 + $0xd0] sm:$0xff] }
 0x6d5   :  { %v2121_v0 = vmul.f32 %v2089_v31, %v1755_v62  ;;  %v2127_v38 = vmul.f32 %v2095_v1, %v1986_v26  ;;  %v2229_v20 = vrot.slane %v2197_v6, 2  ;;  %v2235_v14 = vrot.slane %v2203_v53, 2 }
 0x6d6   :  { %v2136_v41 = vadd.f32 %v2120_v13, %v2104_v52  ;;  %v2142_v43 = vadd.f32 %v2126_v57, %v2110_v28  ;;  %v2260_v60 = vadd.f32 %v2228_v19, %v2196_v48  ;;  %v2266_v45 = vadd.f32 %v2234_v2, %v2202_v7  ;;  %v2077_v28 = vld [vmem:[#allocation5 + $0x58] sm:$0xff] }
 0x6d7   :  { %v2137_v40 = vadd.f32 %v2121_v0, %v2105_v61  ;;  %v2143_v5 = vadd.f32 %v2127_v38, %v2111_v11  ;;  %v1901_v46 = vpop.f32.mrb[16].mxu1  ;;  %v2448_v63 = vpop.f32.mrb[14].mxu0  ;;  %v2261_v55 = vadd.f32 %v2229_v20, %v2197_v6  ;;  %v2267_v25 = vadd.f32 %v2235_v14, %v2203_v53  ;;  %v2093_v11 = vld [vmem:[#allocation5 + $0xd8] sm:$0xff] }
 0x6d8   :  { %v2168_v54 = vrot.slane %v2136_v41, 4  ;;  %v2174_v30 = vrot.slane %v2142_v43, 4  ;;  %v6144_v12 = vadd.f32 %v2448_v63, %v2358_v17  ;;  %v1903_v24 = vpop.f32.mrb[17].mxu1  ;;  %v4392_v32 = vpop.f32.mrb[15].mxu0  ;;  %v6147_v23 = vadd.f32 %v6118_v21, %v2260_v60  ;;  %v2080_v60 = vld [vmem:[#allocation5 + $0x70] sm:$0xff]  ;;  %v2097_v63 = vld [vmem:[#allocation5 + $0xf8] sm:$0xff] }
 0x6d9   :  { %v2169_v34 = vrot.slane %v2137_v40, 4  ;;  %v2175_v52 = vrot.slane %v2143_v5, 4  ;;  %v2309_v36 = vrot.slane %v6106_v15, %v2308_v27  ;;  %v2108_v7 = vmul.f32 %v2076_v33, %v1901_v46  ;;  %v2081_v33 = vld [vmem:[#allocation5 + $0x78] sm:$0xff] }
 0x6da   :  { %v2200_v61 = vadd.f32 %v2168_v54, %v2136_v41  ;;  %v2206_v48 = vadd.f32 %v2174_v30, %v2142_v43  ;;  %4907 = vtanh.f32 %v6144_v12  ;;  %v6154_v53 = vadd.f32 %v6124_v47, %v2261_v55 }
 0x6db   :  { %v2201_v31 = vadd.f32 %v2169_v34, %v2137_v40  ;;  %v2207_v1 = vadd.f32 %v2175_v52, %v2143_v5  ;;  %v1907_v6 = vpop.f32.mrb[18].mxu1  ;;  %v6157_v8 = vadd.f32 %v6127_v58, %v2266_v45  ;;  %v2109_v21 = vmul.f32 %v2077_v28, %v1903_v24 }
 0x6dc   :  { %v2124_v44 = vmul.f32 %v2092_v51, %v1907_v6  ;;  %v1909_v16 = vpop.f32.mrb[19].mxu1  ;;  %v2232_v13 = vrot.slane %v2200_v61, 2  ;;  %v6160_v27 = vadd.f32 %v6072_v56, %v2267_v25  ;;  %v2238_v62 = vrot.slane %v2206_v48, 2  ;;  %v2096_v56 = vld [vmem:[#allocation5 + $0xf0] sm:$0xff] }
 0x6dd   :  { %v2125_v15 = vmul.f32 %v2093_v11, %v1909_v16  ;;  %v2233_v57 = vrot.slane %v2201_v31, 2  ;;  %v2239_v26 = vrot.slane %v2207_v1, 2 }
 0x6de   :  { %v2140_v19 = vadd.f32 %v2124_v44, %v2108_v7  ;;  %v2264_v2 = vadd.f32 %v2232_v13, %v2200_v61  ;;  %v2270_v20 = vadd.f32 %v2238_v62, %v2206_v48 }
 0x6df   :  { %v2141_v0 = vadd.f32 %v2125_v15, %v2109_v21  ;;  %v2055_v38 = vpop.f32.mrb[20].mxu1  ;;  %v2265_v47 = vadd.f32 %v2233_v57, %v2201_v31  ;;  %v2271_v14 = vadd.f32 %v2239_v26, %v2207_v1  ;;  %v4181_v57 = vmul.f32 -1.442695, %v6144_v12 }
 0x6e0   :  { %v2172_v58 = vrot.slane %v2140_v19, 4  ;;  %v2057_v41 = vpop.f32.mrb[21].mxu1  ;;  %v6163_v43 = vadd.f32 %v6132_v39, %v2264_v2  ;;  %v6168_v5 = vadd.f32 %v6077_v22, %v2270_v20  ;;  %v2112_v24 = vmul.f32 %v2080_v60, %v2055_v38 }
 0x6e1   :  { %v2173_v17 = vrot.slane %v2141_v0, 4  ;;  %v6165_v40 = vadd.f32 %v2309_v36, %v2265_v47  ;;  %v6171_v55 = vadd.f32 %v6080_v49, %v2271_v14  ;;  %v2113_v34 = vmul.f32 %v2081_v33, %v2057_v41 }
 0x6e2   :  { %v2204_v46 = vadd.f32 %v2172_v58, %v2140_v19  ;;  %4909 = vpow2.f32 %v4181_v57 }
 0x6e3   :  { %v2205_v45 = vadd.f32 %v2173_v17, %v2141_v0  ;;  %v2061_v54 = vpop.f32.mrb[22].mxu1 }
 0x6e4   :  { %v4908_v30 = vpop.eup %4907  ;;  %v2128_v39 = vmul.f32 %v2096_v56, %v2061_v54  ;;  %v2063_v32 = vpop.f32.mrb[23].mxu1  ;;  %v2236_v25 = vrot.slane %v2204_v46, 2 }
 0x6e5   :  { %v2129_v52 = vmul.f32 %v2097_v63, %v2063_v32  ;;  %2462 = vrot.lane.b32.xlu1 %v4908_v30, %s5145_s9  ;;  %v2237_v22 = vrot.slane %v2205_v45, 2 }
 0x6e6   :  { %v2144_v28 = vadd.f32 %v2128_v39, %v2112_v24  ;;  %v2268_v51 = vadd.f32 %v2236_v25, %v2204_v46 }
 0x6e7   :  { %v2145_v36 = vadd.f32 %v2129_v52, %v2113_v34  ;;  %v2269_v61 = vadd.f32 %v2237_v22, %v2205_v45 }
 0x6e8   :  { %v2176_v48 = vrot.slane %v2144_v28, 4  ;;  %v6175_v49 = vadd.f32 %v6085_v35, %v2268_v51 }
 0x6e9   :  { %v2177_v7 = vrot.slane %v2145_v36, 4  ;;  %v6178_v11 = vadd.f32 %v6088_v50, %v2269_v61 }
 0x6ea   :  { %v2208_v31 = vadd.f32 %v2176_v48, %v2144_v28 }
 0x6eb   :  { %v2209_v1 = vadd.f32 %v2177_v7, %v2145_v36 }
 0x6ec   :  { %v2240_v6 = vrot.slane %v2208_v31, 2  ;;  %v4910_v35 = vpop.eup %4909 }
 0x6ed   :  { %v2241_v21 = vrot.slane %v2209_v1, 2  ;;  %v2456_v62 = vadd.f32 1.0, %v4910_v35 }
 0x6ee   :  { %v2272_v44 = vadd.f32 %v2240_v6, %v2208_v31 }
 0x6ef   :  { %v2273_v16 = vadd.f32 %v2241_v21, %v2209_v1  ;;  %4911 = vrcp.f32 %v2456_v62 }
 0x6f0   :  { %v6181_v13 = vadd.f32 %v6095_v42, %v2272_v44 }
 0x6f1   :  { %v6184_v15 = vadd.f32 %v6100_v59, %v2273_v16 }
 0x6f9   :  { %v4912_v50 = vpop.eup %4911 }
 0x6fa   :  { %v2460_v2 = vmul.f32 0.0, %v4912_v50 }
 0x757   :  { %v2463_v26 = vpop.permute.xlu1 %2462 }
 0x758   :  { %v2465_v19 = vmul.f32 %v4912_v50, %v2463_v26 }
 0x75a   :  { %2467 = vrot.lane.b32.xlu0 %v2465_v19, %s5146_s29 }
 0x7cc   :  { %v2468_v0 = vpop.permute.xlu0 %2467 }
 0x7cd   :  { %v2470_v38 = vadd.f32 %v2468_v0, %v2460_v2 }
 0x7cf   :  { %4913 = vtanh.f32 %v2470_v38 }
 0x7d9   :  { %v4914_v42 = vpop.eup %4913 }
 0x7da   :  { %2473 = vrot.lane.b32.xlu1 %v4914_v42, %s5145_s9 }
 0x84c   :  { %v2474_v59 = vpop.permute.xlu1 %2473 }
 0x84d   :  { %v2476_v47 = vmul.f32 %v4912_v50, %v2474_v59 }
 0x84f   :  { %2478 = vrot.lane.b32.xlu0 %v2476_v47, %s5146_s29 }
 0x8c1   :  { %v2479_v12 = vpop.permute.xlu0 %2478 }
 0x8c2   :  { %4402 = vmatmul.mubr.msk.f32.vlgmr.msra.gmra.mrb[24].mxu1 %vm2378_vm2, %v2479_v12 }
 0x8c3   :  { %4680 = vmatpush3.bf16.msra.mxu1 %v6013_v10  ;;  %4423 = vmatprep.mubr.msk.f32.mxu1 %vm5111_vm14, %v5112_v18 }
 0x8c4   :  { %4681 = vmatprep.subr.bf16.mxu1 %v5109_v3 }
 0x8c7   :  { %4683 = vmatpush3.bf16.msra.mxu1 %v6027_v37 }
 0x8c8   :  { %4690 = vmatprep.subr.bf16.mxu1 %v5109_v3 }
 0x995   :  { %v2548_v20 = vpop.f32.mrb[24].mxu1 }
 0x996   :  { %v2552_v14 = vadd.f32 %v2548_v20, %v6135_v9  ;;  %v4403_v58 = vpop.f32.mrb[25].mxu1 }
 0x998   :  { %4915 = vtanh.f32 %v2552_v14  ;;  %v4183_v17 = vmul.f32 -1.442695, %v2552_v14 }
 0x99a   :  { %4917 = vpow2.f32 %v4183_v17 }
 0x9a2   :  { %v4916_v41 = vpop.eup %4915 }
 0x9a3   :  { %2562 = vrot.lane.b32.xlu1 %v4916_v41, %s5145_s9 }
 0x9a4   :  { %v4918_v60 = vpop.eup %4917 }
 0x9a5   :  { %v2556_v56 = vadd.f32 1.0, %v4918_v60 }
 0x9a7   :  { %4919 = vrcp.f32 %v2556_v56 }
 0x9b1   :  { %v4920_v46 = vpop.eup %4919 }
 0x9b2   :  { %v2560_v45 = vmul.f32 %v4920_v46, %v2470_v38 }
 0xa15   :  { %v2563_v33 = vpop.permute.xlu1 %2562 }
 0xa16   :  { %v2565_v63 = vmul.f32 %v4920_v46, %v2563_v33 }
 0xa18   :  { %2567 = vrot.lane.b32.xlu0 %v2565_v63, %s5146_s29 }
 0xa8a   :  { %v2568_v54 = vpop.permute.xlu0 %2567 }
 0xa8b   :  { %v2570_v30 = vadd.f32 %v2568_v54, %v2560_v45 }
 0xa8d   :  { %4921 = vtanh.f32 %v2570_v30 }
 0xa97   :  { %v4922_v9 = vpop.eup %4921 }
 0xa98   :  { %2573 = vrot.lane.b32.xlu1 %v4922_v9, %s5145_s9 }
 0xb0a   :  { %v2574_v24 = vpop.permute.xlu1 %2573 }
 0xb0b   :  { %v2576_v39 = vmul.f32 %v4920_v46, %v2574_v24 }
 0xb0d   :  { %2578 = vrot.lane.b32.xlu0 %v2576_v39, %s5146_s29 }
 0xb7f   :  { %v2579_v32 = vpop.permute.xlu0 %2578 }
 0xb80   :  { %4413 = vmatmul.mubr.msk.f32.vlgmr.msra.gmra.mrb[16].mxu0 %vm2378_vm2, %v2579_v32 }
 0xb81   :  { %4686 = vmatpush3.bf16.msra.mxu0 %v6013_v10  ;;  %4434 = vmatprep.mubr.msk.f32.mxu0 %vm5111_vm14, %v5112_v18 }
 0xb82   :  { %4687 = vmatprep.subr.bf16.mxu0 %v5109_v3 }
 0xb85   :  { %4689 = vmatpush3.bf16.msra.mxu0 %v6027_v37 }
 0xb86   :  { %4696 = vmatprep.subr.bf16.mxu0 %v5109_v3 }
 0xc53   :  { %v2648_v25 = vpop.f32.mrb[16].mxu0 }
 0xc54   :  { %v2652_v34 = vadd.f32 %v2648_v25, %v6147_v23  ;;  %v4414_v52 = vpop.f32.mrb[17].mxu0 }
 0xc56   :  { %4923 = vtanh.f32 %v2652_v34  ;;  %v4185_v28 = vmul.f32 -1.442695, %v2652_v34 }
 0xc58   :  { %4925 = vpow2.f32 %v4185_v28 }
 0xc60   :  { %v4924_v22 = vpop.eup %4923 }
 0xc61   :  { %2662 = vrot.lane.b32.xlu1 %v4924_v22, %s5145_s9 }
 0xc62   :  { %v4926_v51 = vpop.eup %4925 }
 0xc63   :  { %v2656_v36 = vadd.f32 1.0, %v4926_v51 }
 0xc65   :  { %4927 = vrcp.f32 %v2656_v36 }
 0xc6f   :  { %v4928_v61 = vpop.eup %4927 }
 0xc70   :  { %v2660_v31 = vmul.f32 %v4928_v61, %v2570_v30 }
 0xcd3   :  { %v2663_v48 = vpop.permute.xlu1 %2662 }
 0xcd4   :  { %v2665_v7 = vmul.f32 %v4928_v61, %v2663_v48 }
 0xcd6   :  { %2667 = vrot.lane.b32.xlu0 %v2665_v7, %s5146_s29 }
 0xd48   :  { %v2668_v1 = vpop.permute.xlu0 %2667 }
 0xd49   :  { %v2670_v6 = vadd.f32 %v2668_v1, %v2660_v31 }
 0xd4b   :  { %4929 = vtanh.f32 %v2670_v6 }
 0xd55   :  { %v4930_v23 = vpop.eup %4929 }
 0xd56   :  { %2673 = vrot.lane.b32.xlu1 %v4930_v23, %s5145_s9 }
 0xdc8   :  { %v2674_v21 = vpop.permute.xlu1 %2673 }
 0xdc9   :  { %v2676_v44 = vmul.f32 %v4928_v61, %v2674_v21 }
 0xdcb   :  { %2678 = vrot.lane.b32.xlu0 %v2676_v44, %s5146_s29 }
 0xe3d   :  { %v2679_v16 = vpop.permute.xlu0 %2678 }
 0xe3e   :  { %4424 = vmatmul.mubr.msk.f32.vlgmr.msra.gmra.mrb[26].mxu1 %vm2378_vm2, %v2679_v16 }
 0xe3f   :  { %4692 = vmatpush3.bf16.msra.mxu1 %v6013_v10  ;;  %4445 = vmatprep.mubr.msk.f32.mxu1 %vm5111_vm14, %v5112_v18 }
 0xe40   :  { %4693 = vmatprep.subr.bf16.mxu1 %v5109_v3 }
 0xe43   :  { %4695 = vmatpush3.bf16.msra.mxu1 %v6027_v37 }
 0xe44   :  { %4702 = vmatprep.subr.bf16.mxu1 %v5109_v3 }
 0xf11   :  { %v2748_v57 = vpop.f32.mrb[26].mxu1 }
 0xf12   :  { %v2752_v35 = vadd.f32 %v2748_v57, %v6154_v53  ;;  %v4425_v62 = vpop.f32.mrb[27].mxu1 }
 0xf14   :  { %4931 = vtanh.f32 %v2752_v35  ;;  %v4187_v26 = vmul.f32 -1.442695, %v2752_v35 }
 0xf16   :  { %4933 = vpow2.f32 %v4187_v26 }
 0xf1e   :  { %v4932_v50 = vpop.eup %4931 }
 0xf1f   :  { %2762 = vrot.lane.b32.xlu1 %v4932_v50, %s5145_s9 }
 0xf20   :  { %v4934_v19 = vpop.eup %4933 }
 0xf21   :  { %v2756_v2 = vadd.f32 1.0, %v4934_v19 }
 0xf23   :  { %4935 = vrcp.f32 %v2756_v2 }
 0xf2d   :  { %v4936_v0 = vpop.eup %4935 }
 0xf2e   :  { %v2760_v59 = vmul.f32 %v4936_v0, %v2670_v6 }
 0xf91   :  { %v2763_v38 = vpop.permute.xlu1 %2762 }
 0xf92   :  { %v2765_v42 = vmul.f32 %v4936_v0, %v2763_v38 }
 0xf94   :  { %2767 = vrot.lane.b32.xlu0 %v2765_v42, %s5146_s29 }
0x1006   :  { %v2768_v47 = vpop.permute.xlu0 %2767 }
0x1007   :  { %v2770_v12 = vadd.f32 %v2768_v47, %v2760_v59 }
0x1009   :  { %4937 = vtanh.f32 %v2770_v12 }
0x1013   :  { %v4938_v53 = vpop.eup %4937 }
0x1014   :  { %2773 = vrot.lane.b32.xlu1 %v4938_v53, %s5145_s9 }
0x1086   :  { %v2774_v20 = vpop.permute.xlu1 %2773 }
0x1087   :  { %v2776_v14 = vmul.f32 %v4936_v0, %v2774_v20 }
0x1089   :  { %2778 = vrot.lane.b32.xlu0 %v2776_v14, %s5146_s29 }
0x10fb   :  { %v2779_v58 = vpop.permute.xlu0 %2778 }
0x10fc   :  { %4435 = vmatmul.mubr.msk.f32.vlgmr.msra.gmra.mrb[18].mxu0 %vm2378_vm2, %v2779_v58 }
0x10fd   :  { %4698 = vmatpush3.bf16.msra.mxu0 %v6013_v10  ;;  %4456 = vmatprep.mubr.msk.f32.mxu0 %vm5111_vm14, %v5112_v18 }
0x10fe   :  { %4699 = vmatprep.subr.bf16.mxu0 %v5109_v3 }
0x1101   :  { %4701 = vmatpush3.bf16.msra.mxu0 %v6027_v37 }
0x1102   :  { %4708 = vmatprep.subr.bf16.mxu0 %v5109_v3 }
0x11cf   :  { %v2848_v41 = vpop.f32.mrb[18].mxu0 }
0x11d0   :  { %v2852_v17 = vadd.f32 %v2848_v41, %v6138_v4  ;;  %v4436_v60 = vpop.f32.mrb[19].mxu0 }
0x11d2   :  { %4939 = vtanh.f32 %v2852_v17  ;;  %v4189_v46 = vmul.f32 -1.442695, %v2852_v17 }
0x11d4   :  { %4941 = vpow2.f32 %v4189_v46 }
0x11dc   :  { %v4940_v56 = vpop.eup %4939 }
0x11dd   :  { %2862 = vrot.lane.b32.xlu1 %v4940_v56, %s5145_s9 }
0x11de   :  { %v4942_v33 = vpop.eup %4941 }
0x11df   :  { %v2856_v63 = vadd.f32 1.0, %v4942_v33 }
0x11e1   :  { %4943 = vrcp.f32 %v2856_v63 }
0x11eb   :  { %v4944_v45 = vpop.eup %4943 }
0x11ec   :  { %v2860_v9 = vmul.f32 %v4944_v45, %v2770_v12 }
0x124f   :  { %v2863_v54 = vpop.permute.xlu1 %2862 }
0x1250   :  { %v2865_v30 = vmul.f32 %v4944_v45, %v2863_v54 }
0x1252   :  { %2867 = vrot.lane.b32.xlu0 %v2865_v30, %s5146_s29 }
0x12c4   :  { %v2868_v24 = vpop.permute.xlu0 %2867 }
0x12c5   :  { %v2870_v39 = vadd.f32 %v2868_v24, %v2860_v9 }
0x12c7   :  { %4945 = vtanh.f32 %v2870_v39 }
0x12d1   :  { %v4946_v4 = vpop.eup %4945 }
0x12d2   :  { %2873 = vrot.lane.b32.xlu1 %v4946_v4, %s5145_s9 }
0x1344   :  { %v2874_v32 = vpop.permute.xlu1 %2873 }
0x1345   :  { %v2876_v25 = vmul.f32 %v4944_v45, %v2874_v32 }
0x1347   :  { %2878 = vrot.lane.b32.xlu0 %v2876_v25, %s5146_s29 }
0x13b9   :  { %v2879_v34 = vpop.permute.xlu0 %2878 }
0x13ba   :  { %4446 = vmatmul.mubr.msk.f32.vlgmr.msra.gmra.mrb[28].mxu1 %vm2378_vm2, %v2879_v34 }
0x13bb   :  { %4704 = vmatpush3.bf16.msra.mxu1 %v6013_v10  ;;  %4467 = vmatprep.mubr.msk.f32.mxu1 %vm5111_vm14, %v5112_v18 }
0x13bc   :  { %4705 = vmatprep.subr.bf16.mxu1 %v5109_v3 }
0x13bf   :  { %4707 = vmatpush3.bf16.msra.mxu1 %v6027_v37 }
0x13c0   :  { %4714 = vmatprep.subr.bf16.mxu1 %v5109_v3 }
0x148d   :  { %v2948_v52 = vpop.f32.mrb[28].mxu1 }
0x148e   :  { %v2952_v22 = vadd.f32 %v2948_v52, %v6141_v29  ;;  %v4447_v28 = vpop.f32.mrb[29].mxu1 }
0x1490   :  { %4947 = vtanh.f32 %v2952_v22  ;;  %v4191_v36 = vmul.f32 -1.442695, %v2952_v22 }
0x1492   :  { %4949 = vpow2.f32 %v4191_v36 }
0x149a   :  { %v4948_v51 = vpop.eup %4947 }
0x149b   :  { %2962 = vrot.lane.b32.xlu1 %v4948_v51, %s5145_s9 }
0x149c   :  { %v4950_v61 = vpop.eup %4949 }
0x149d   :  { %v2956_v48 = vadd.f32 1.0, %v4950_v61 }
0x149f   :  { %4951 = vrcp.f32 %v2956_v48 }
0x14a9   :  { %v4952_v7 = vpop.eup %4951 }
0x14aa   :  { %v2960_v6 = vmul.f32 %v4952_v7, %v2870_v39 }
0x150d   :  { %v2963_v31 = vpop.permute.xlu1 %2962 }
0x150e   :  { %v2965_v1 = vmul.f32 %v4952_v7, %v2963_v31 }
0x1510   :  { %2967 = vrot.lane.b32.xlu0 %v2965_v1, %s5146_s29 }
0x1582   :  { %v2968_v23 = vpop.permute.xlu0 %2967 }
0x1583   :  { %v2970_v21 = vadd.f32 %v2968_v23, %v2960_v6 }
0x1585   :  { %4953 = vtanh.f32 %v2970_v21 }
0x158f   :  { %v4954_v29 = vpop.eup %4953 }
0x1590   :  { %2973 = vrot.lane.b32.xlu1 %v4954_v29, %s5145_s9 }
0x1602   :  { %v2974_v44 = vpop.permute.xlu1 %2973 }
0x1603   :  { %v2976_v16 = vmul.f32 %v4952_v7, %v2974_v44 }
0x1605   :  { %2978 = vrot.lane.b32.xlu0 %v2976_v16, %s5146_s29 }
0x1677   :  { %v2979_v57 = vpop.permute.xlu0 %2978 }
0x1678   :  { %4457 = vmatmul.mubr.msk.f32.vlgmr.msra.gmra.mrb[20].mxu0 %vm2378_vm2, %v2979_v57 }
0x1679   :  { %4710 = vmatpush3.bf16.msra.mxu0 %v6013_v10  ;;  %4478 = vmatprep.mubr.msk.f32.mxu0 %vm5111_vm14, %v5112_v18 }
0x167a   :  { %4711 = vmatprep.subr.bf16.mxu0 %v5109_v3 }
0x167d   :  { %4713 = vmatpush3.bf16.msra.mxu0 %v6027_v37 }
0x167e   :  { %4720 = vmatprep.subr.bf16.mxu0 %v5109_v3 }
0x174b   :  { %v3048_v35 = vpop.f32.mrb[20].mxu0 }
0x174c   :  { %v3052_v62 = vadd.f32 %v3048_v35, %v6163_v43  ;;  %v4458_v50 = vpop.f32.mrb[21].mxu0 }
0x174e   :  { %4955 = vtanh.f32 %v3052_v62  ;;  %v4193_v19 = vmul.f32 -1.442695, %v3052_v62 }
0x1750   :  { %4957 = vpow2.f32 %v4193_v19 }
0x1758   :  { %v4956_v26 = vpop.eup %4955 }
0x1759   :  { %3062 = vrot.lane.b32.xlu1 %v4956_v26, %s5145_s9 }
0x175a   :  { %v4958_v2 = vpop.eup %4957 }
0x175b   :  { %v3056_v0 = vadd.f32 1.0, %v4958_v2 }
0x175d   :  { %4959 = vrcp.f32 %v3056_v0 }
0x1767   :  { %v4960_v38 = vpop.eup %4959 }
0x1768   :  { %v3060_v47 = vmul.f32 %v4960_v38, %v2970_v21 }
0x17cb   :  { %v3063_v42 = vpop.permute.xlu1 %3062 }
0x17cc   :  { %v3065_v59 = vmul.f32 %v4960_v38, %v3063_v42 }
0x17ce   :  { %3067 = vrot.lane.b32.xlu0 %v3065_v59, %s5146_s29 }
0x1840   :  { %v3068_v12 = vpop.permute.xlu0 %3067 }
0x1841   :  { %v3070_v53 = vadd.f32 %v3068_v12, %v3060_v47 }
0x1843   :  { %4961 = vtanh.f32 %v3070_v53 }
0x184d   :  { %v4962_v43 = vpop.eup %4961 }
0x184e   :  { %3073 = vrot.lane.b32.xlu1 %v4962_v43, %s5145_s9 }
0x18c0   :  { %v3074_v20 = vpop.permute.xlu1 %3073 }
0x18c1   :  { %v3076_v14 = vmul.f32 %v4960_v38, %v3074_v20 }
0x18c3   :  { %3078 = vrot.lane.b32.xlu0 %v3076_v14, %s5146_s29 }
0x1935   :  { %v3079_v58 = vpop.permute.xlu0 %3078 }
0x1936   :  { %4468 = vmatmul.mubr.msk.f32.vlgmr.msra.gmra.mrb[30].mxu1 %vm2378_vm2, %v3079_v58 }
0x1937   :  { %4716 = vmatpush3.bf16.msra.mxu1 %v6013_v10  ;;  %4489 = vmatprep.mubr.msk.f32.mxu1 %vm5111_vm14, %v5112_v18 }
0x1938   :  { %4717 = vmatprep.subr.bf16.mxu1 %v5109_v3 }
0x193b   :  { %4719 = vmatpush3.bf16.msra.mxu1 %v6027_v37 }
0x193c   :  { %4726 = vmatprep.subr.bf16.mxu1 %v5109_v3 }
0x1a09   :  { %v3148_v41 = vpop.f32.mrb[30].mxu1 }
0x1a0a   :  { %v3152_v17 = vadd.f32 %v3148_v41, %v6165_v40  ;;  %v4469_v60 = vpop.f32.mrb[31].mxu1 }
0x1a0c   :  { %4963 = vtanh.f32 %v3152_v17  ;;  %v4195_v46 = vmul.f32 -1.442695, %v3152_v17 }
0x1a0e   :  { %4965 = vpow2.f32 %v4195_v46 }
0x1a16   :  { %v4964_v56 = vpop.eup %4963 }
0x1a17   :  { %3162 = vrot.lane.b32.xlu1 %v4964_v56, %s5145_s9 }
0x1a18   :  { %v4966_v33 = vpop.eup %4965 }
0x1a19   :  { %v3156_v63 = vadd.f32 1.0, %v4966_v33 }
0x1a1b   :  { %4967 = vrcp.f32 %v3156_v63 }
0x1a25   :  { %v4968_v45 = vpop.eup %4967 }
0x1a26   :  { %v3160_v9 = vmul.f32 %v4968_v45, %v3070_v53 }
0x1a89   :  { %v3163_v54 = vpop.permute.xlu1 %3162 }
0x1a8a   :  { %v3165_v30 = vmul.f32 %v4968_v45, %v3163_v54 }
0x1a8c   :  { %3167 = vrot.lane.b32.xlu0 %v3165_v30, %s5146_s29 }
0x1afe   :  { %v3168_v24 = vpop.permute.xlu0 %3167 }
0x1aff   :  { %v3170_v39 = vadd.f32 %v3168_v24, %v3160_v9 }
0x1b01   :  { %4969 = vtanh.f32 %v3170_v39 }
0x1b0b   :  { %v4970_v40 = vpop.eup %4969 }
0x1b0c   :  { %3173 = vrot.lane.b32.xlu1 %v4970_v40, %s5145_s9 }
0x1b7e   :  { %v3174_v4 = vpop.permute.xlu1 %3173 }
0x1b7f   :  { %v3176_v32 = vmul.f32 %v4968_v45, %v3174_v4 }
0x1b81   :  { %3178 = vrot.lane.b32.xlu0 %v3176_v32, %s5146_s29 }
0x1bf3   :  { %v3179_v25 = vpop.permute.xlu0 %3178 }
0x1bf4   :  { %4479 = vmatmul.mubr.msk.f32.vlgmr.msra.gmra.mrb[22].mxu0 %vm2378_vm2, %v3179_v25 }
0x1bf5   :  { %4722 = vmatpush3.bf16.msra.mxu0 %v6013_v10  ;;  %4500 = vmatprep.mubr.msk.f32.mxu0 %vm5111_vm14, %v5112_v18 }
0x1bf6   :  { %4723 = vmatprep.subr.bf16.mxu0 %v5109_v3 }
0x1bf9   :  { %4725 = vmatpush3.bf16.msra.mxu0 %v6027_v37 }
0x1bfa   :  { %4732 = vmatprep.subr.bf16.mxu0 %v5109_v3 }
0x1cc7   :  { %v3248_v34 = vpop.f32.mrb[22].mxu0 }
0x1cc8   :  { %v3252_v52 = vadd.f32 %v3248_v34, %v6157_v8  ;;  %v4480_v22 = vpop.f32.mrb[23].mxu0 }
0x1cca   :  { %4971 = vtanh.f32 %v3252_v52  ;;  %v4197_v51 = vmul.f32 -1.442695, %v3252_v52 }
0x1ccc   :  { %4973 = vpow2.f32 %v4197_v51 }
0x1cd4   :  { %v4972_v28 = vpop.eup %4971 }
0x1cd5   :  { %3262 = vrot.lane.b32.xlu1 %v4972_v28, %s5145_s9 }
0x1cd6   :  { %v4974_v36 = vpop.eup %4973 }
0x1cd7   :  { %v3256_v61 = vadd.f32 1.0, %v4974_v36 }
0x1cd9   :  { %4975 = vrcp.f32 %v3256_v61 }
0x1ce3   :  { %v4976_v48 = vpop.eup %4975 }
0x1ce4   :  { %v3260_v1 = vmul.f32 %v4976_v48, %v3170_v39 }
0x1d47   :  { %v3263_v7 = vpop.permute.xlu1 %3262 }
0x1d48   :  { %v3265_v31 = vmul.f32 %v4976_v48, %v3263_v7 }
0x1d4a   :  { %3267 = vrot.lane.b32.xlu0 %v3265_v31, %s5146_s29 }
0x1dbc   :  { %v3268_v6 = vpop.permute.xlu0 %3267 }
0x1dbd   :  { %v3270_v23 = vadd.f32 %v3268_v6, %v3260_v1 }
0x1dbf   :  { %4977 = vtanh.f32 %v3270_v23 }
0x1dc9   :  { %v4978_v8 = vpop.eup %4977 }
0x1dca   :  { %3273 = vrot.lane.b32.xlu1 %v4978_v8, %s5145_s9 }
0x1e3c   :  { %v3274_v21 = vpop.permute.xlu1 %3273 }
0x1e3d   :  { %v3276_v29 = vmul.f32 %v4976_v48, %v3274_v21 }
0x1e3f   :  { %3278 = vrot.lane.b32.xlu0 %v3276_v29, %s5146_s29 }
0x1eb1   :  { %v3279_v44 = vpop.permute.xlu0 %3278 }
0x1eb2   :  { %4490 = vmatmul.mubr.msk.f32.vlgmr.msra.gmra.mrb[32].mxu1 %vm2378_vm2, %v3279_v44 }
0x1eb3   :  { %4728 = vmatpush3.bf16.msra.mxu1 %v6013_v10  ;;  %4511 = vmatprep.mubr.msk.f32.mxu1 %vm5111_vm14, %v5112_v18 }
0x1eb4   :  { %4729 = vmatprep.subr.bf16.mxu1 %v5109_v3 }
0x1eb7   :  { %4731 = vmatpush3.bf16.msra.mxu1 %v6027_v37 }
0x1eb8   :  { %4738 = vmatprep.subr.bf16.mxu1 %v5109_v3 }
0x1f85   :  { %v3348_v16 = vpop.f32.mrb[32].mxu1 }
0x1f86   :  { %v3352_v57 = vadd.f32 %v3348_v16, %v6160_v27  ;;  %v4491_v35 = vpop.f32.mrb[33].mxu1 }
0x1f88   :  { %4979 = vtanh.f32 %v3352_v57  ;;  %v4199_v50 = vmul.f32 -1.442695, %v3352_v57 }
0x1f8a   :  { %4981 = vpow2.f32 %v4199_v50 }
0x1f92   :  { %v4980_v62 = vpop.eup %4979 }
0x1f93   :  { %3362 = vrot.lane.b32.xlu1 %v4980_v62, %s5145_s9 }
0x1f94   :  { %v4982_v26 = vpop.eup %4981 }
0x1f95   :  { %v3356_v19 = vadd.f32 1.0, %v4982_v26 }
0x1f97   :  { %4983 = vrcp.f32 %v3356_v19 }
0x1fa1   :  { %v4984_v2 = vpop.eup %4983 }
0x1fa2   :  { %v3360_v42 = vmul.f32 %v4984_v2, %v3270_v23 }
0x2005   :  { %v3363_v0 = vpop.permute.xlu1 %3362 }
0x2006   :  { %v3365_v38 = vmul.f32 %v4984_v2, %v3363_v0 }
0x2008   :  { %3367 = vrot.lane.b32.xlu0 %v3365_v38, %s5146_s29 }
0x207a   :  { %v3368_v59 = vpop.permute.xlu0 %3367 }
0x207b   :  { %v3370_v47 = vadd.f32 %v3368_v59, %v3360_v42 }
0x207d   :  { %4985 = vtanh.f32 %v3370_v47 }
0x2087   :  { %v4986_v27 = vpop.eup %4985 }
0x2088   :  { %3373 = vrot.lane.b32.xlu1 %v4986_v27, %s5145_s9 }
0x20fa   :  { %v3374_v12 = vpop.permute.xlu1 %3373 }
0x20fb   :  { %v3376_v53 = vmul.f32 %v4984_v2, %v3374_v12 }
0x20fd   :  { %3378 = vrot.lane.b32.xlu0 %v3376_v53, %s5146_s29 }
0x216f   :  { %v3379_v43 = vpop.permute.xlu0 %3378 }
0x2170   :  { %4501 = vmatmul.mubr.msk.f32.vlgmr.msra.gmra.mrb[24].mxu0 %vm2378_vm2, %v3379_v43 }
0x2171   :  { %4734 = vmatpush3.bf16.msra.mxu0 %v6013_v10  ;;  %4522 = vmatprep.mubr.msk.f32.mxu0 %vm5111_vm14, %v5112_v18 }
0x2172   :  { %4735 = vmatprep.subr.bf16.mxu0 %v5109_v3 }
0x2175   :  { %4737 = vmatpush3.bf16.msra.mxu0 %v6027_v37 }
0x2176   :  { %4744 = vmatprep.subr.bf16.mxu0 %v5109_v3 }
0x2243   :  { %v3448_v20 = vpop.f32.mrb[24].mxu0 }
0x2244   :  { %v3452_v14 = vadd.f32 %v3448_v20, %v6175_v49  ;;  %v4502_v58 = vpop.f32.mrb[25].mxu0 }
0x2246   :  { %4987 = vtanh.f32 %v3452_v14  ;;  %v4201_v17 = vmul.f32 -1.442695, %v3452_v14 }
0x2248   :  { %4989 = vpow2.f32 %v4201_v17 }
0x2250   :  { %v4988_v41 = vpop.eup %4987 }
0x2251   :  { %3462 = vrot.lane.b32.xlu1 %v4988_v41, %s5145_s9 }
0x2252   :  { %v4990_v60 = vpop.eup %4989 }
0x2253   :  { %v3456_v56 = vadd.f32 1.0, %v4990_v60 }
0x2255   :  { %4991 = vrcp.f32 %v3456_v56 }
0x225f   :  { %v4992_v46 = vpop.eup %4991 }
0x2260   :  { %v3460_v45 = vmul.f32 %v4992_v46, %v3370_v47 }
0x22c3   :  { %v3463_v33 = vpop.permute.xlu1 %3462 }
0x22c4   :  { %v3465_v63 = vmul.f32 %v4992_v46, %v3463_v33 }
0x22c6   :  { %3467 = vrot.lane.b32.xlu0 %v3465_v63, %s5146_s29 }
0x2338   :  { %v3468_v54 = vpop.permute.xlu0 %3467 }
0x2339   :  { %v3470_v30 = vadd.f32 %v3468_v54, %v3460_v45 }
0x233b   :  { %4993 = vtanh.f32 %v3470_v30 }
0x2345   :  { %v4994_v49 = vpop.eup %4993 }
0x2346   :  { %3473 = vrot.lane.b32.xlu1 %v4994_v49, %s5145_s9 }
0x23b8   :  { %v3474_v9 = vpop.permute.xlu1 %3473 }
0x23b9   :  { %v3476_v24 = vmul.f32 %v4992_v46, %v3474_v9 }
0x23bb   :  { %3478 = vrot.lane.b32.xlu0 %v3476_v24, %s5146_s29 }
0x242d   :  { %v3479_v39 = vpop.permute.xlu0 %3478 }
0x242e   :  { %4512 = vmatmul.mubr.msk.f32.vlgmr.msra.gmra.mrb[34].mxu1 %vm2378_vm2, %v3479_v39 }
0x242f   :  { %4740 = vmatpush3.bf16.msra.mxu1 %v6013_v10  ;;  %4533 = vmatprep.mubr.msk.f32.mxu1 %vm5111_vm14, %v5112_v18 }
0x2430   :  { %4741 = vmatprep.subr.bf16.mxu1 %v5109_v3 }
0x2433   :  { %4743 = vmatpush3.bf16.msra.mxu1 %v6027_v37 }
0x2434   :  { %4750 = vmatprep.subr.bf16.mxu1 %v5109_v3 }
0x2501   :  { %v3548_v40 = vpop.f32.mrb[34].mxu1 }
0x2502   :  { %v3552_v4 = vadd.f32 %v3548_v40, %v6178_v11  ;;  %v4513_v32 = vpop.f32.mrb[35].mxu1 }
0x2504   :  { %4995 = vtanh.f32 %v3552_v4  ;;  %v4203_v34 = vmul.f32 -1.442695, %v3552_v4 }
0x2506   :  { %4997 = vpow2.f32 %v4203_v34 }
0x250e   :  { %v4996_v25 = vpop.eup %4995 }
0x250f   :  { %3562 = vrot.lane.b32.xlu1 %v4996_v25, %s5145_s9 }
0x2510   :  { %v4998_v52 = vpop.eup %4997 }
0x2511   :  { %v3556_v22 = vadd.f32 1.0, %v4998_v52 }
0x2513   :  { %4999 = vrcp.f32 %v3556_v22 }
0x251d   :  { %v5000_v28 = vpop.eup %4999 }
0x251e   :  { %v3560_v61 = vmul.f32 %v5000_v28, %v3470_v30 }
0x2581   :  { %v3563_v51 = vpop.permute.xlu1 %3562 }
0x2582   :  { %v3565_v36 = vmul.f32 %v5000_v28, %v3563_v51 }
0x2584   :  { %3567 = vrot.lane.b32.xlu0 %v3565_v36, %s5146_s29 }
0x25f6   :  { %v3568_v48 = vpop.permute.xlu0 %3567 }
0x25f7   :  { %v3570_v7 = vadd.f32 %v3568_v48, %v3560_v61 }
0x25f9   :  { %5001 = vtanh.f32 %v3570_v7 }
0x2603   :  { %v5002_v11 = vpop.eup %5001 }
0x2604   :  { %3573 = vrot.lane.b32.xlu1 %v5002_v11, %s5145_s9 }
0x2676   :  { %v3574_v31 = vpop.permute.xlu1 %3573 }
0x2677   :  { %v3576_v1 = vmul.f32 %v5000_v28, %v3574_v31 }
0x2679   :  { %3578 = vrot.lane.b32.xlu0 %v3576_v1, %s5146_s29 }
0x26eb   :  { %v3579_v6 = vpop.permute.xlu0 %3578 }
0x26ec   :  { %4523 = vmatmul.mubr.msk.f32.vlgmr.msra.gmra.mrb[26].mxu0 %vm2378_vm2, %v3579_v6 }
0x26ed   :  { %4746 = vmatpush3.bf16.msra.mxu0 %v6013_v10  ;;  %4544 = vmatprep.mubr.msk.f32.mxu0 %vm5111_vm14, %v5112_v18 }
0x26ee   :  { %4747 = vmatprep.subr.bf16.mxu0 %v5109_v3 }
0x26f1   :  { %4749 = vmatpush3.bf16.msra.mxu0 %v6027_v37 }
0x26f2   :  { %4756 = vmatprep.subr.bf16.mxu0 %v5109_v3 }
0x27bf   :  { %v3648_v23 = vpop.f32.mrb[26].mxu0 }
0x27c0   :  { %v3652_v8 = vadd.f32 %v3648_v23, %v6168_v5  ;;  %v4524_v21 = vpop.f32.mrb[27].mxu0 }
0x27c1   :  { %v3978_v21 = vld [vmem:[%s6400_s11 + $0x8] sm:$0xff] }
0x27c2   :  { %5003 = vtanh.f32 %v3652_v8  ;;  %v4205_v44 = vmul.f32 -1.442695, %v3652_v8 }
0x27c4   :  { %5005 = vpow2.f32 %v4205_v44 }
0x27cc   :  { %v5004_v29 = vpop.eup %5003 }
0x27cd   :  { %3662 = vrot.lane.b32.xlu1 %v5004_v29, %s5145_s9  ;;  %v3979_v29 = vld [vmem:[%s6400_s11 + $0x10] sm:$0xff] }
0x27ce   :  { %v5006_v16 = vpop.eup %5005 }
0x27cf   :  { %v3656_v57 = vadd.f32 1.0, %v5006_v16  ;;  %v3980_v16 = vld [vmem:[%s6400_s11 + $0x18] sm:$0xff] }
0x27d1   :  { %5007 = vrcp.f32 %v3656_v57  ;;  %v4760_v57 = vpack.c.bf16 %v3980_v16, %v3979_v29 }
0x27db   :  { %v5008_v35 = vpop.eup %5007 }
0x27dc   :  { %v3660_v26 = vmul.f32 %v5008_v35, %v3570_v7 }
0x283f   :  { %v3663_v62 = vpop.permute.xlu1 %3662 }
0x2840   :  { %v3665_v50 = vmul.f32 %v5008_v35, %v3663_v62 }
0x2842   :  { %3667 = vrot.lane.b32.xlu0 %v3665_v50, %s5146_s29 }
0x28b4   :  { %v3668_v19 = vpop.permute.xlu0 %3667 }
0x28b5   :  { %v3670_v2 = vadd.f32 %v3668_v19, %v3660_v26  ;;  %v4064_v19 = vld [vmem:[%s6402_s13] sm:$0xff] }
0x28b7   :  { %5009 = vtanh.f32 %v3670_v2 }
0x28c1   :  { %v5010_v5 = vpop.eup %5009 }
0x28c2   :  { %3673 = vrot.lane.b32.xlu1 %v5010_v5, %s5145_s9  ;;  %v4212_v5 = vld [vmem:[%s6401_s12] ss:$0 sm:$0xff] }
0x2934   :  { %v3674_v0 = vpop.permute.xlu1 %3673 }
0x2935   :  { %v3676_v38 = vmul.f32 %v5008_v35, %v3674_v0 }
0x2937   :  { %3678 = vrot.lane.b32.xlu0 %v3676_v38, %s5146_s29 }
0x29a9   :  { %v3679_v42 = vpop.permute.xlu0 %3678 }
0x29aa   :  { %4534 = vmatmul.mubr.msk.f32.vlgmr.msra.gmra.mrb[36].mxu1 %vm2378_vm2, %v3679_v42 }
0x29ab   :  { %4752 = vmatpush3.bf16.msra.mxu1 %v6013_v10  ;;  %4555 = vmatprep.mubr.msk.f32.mxu1 %vm5111_vm14, %v5112_v18 }
0x29ac   :  { %4753 = vmatprep.subr.bf16.mxu1 %v5109_v3 }
0x29af   :  { %4755 = vmatpush3.bf16.msra.mxu1 %v6027_v37 }
0x29b0   :  { %4762 = vmatprep.subr.bf16.mxu1 %v5109_v3 }
0x2a7d   :  { %v3748_v59 = vpop.f32.mrb[36].mxu1 }
0x2a7e   :  { %v3752_v47 = vadd.f32 %v3748_v59, %v6171_v55  ;;  %v4535_v27 = vpop.f32.mrb[37].mxu1 }
0x2a80   :  { %5011 = vtanh.f32 %v3752_v47  ;;  %v4207_v53 = vmul.f32 -1.442695, %v3752_v47  ;;  %v4214_v47 = vld [vmem:[#allocation2] ss:$0 sm:$0xff] }
0x2a82   :  { %5013 = vpow2.f32 %v4207_v53 }
0x2a8a   :  { %v5012_v12 = vpop.eup %5011 }
0x2a8b   :  { %3762 = vrot.lane.b32.xlu1 %v5012_v12, %s5145_s9 }
0x2a8c   :  { %v5014_v10 = vpop.eup %5013 }
0x2a8d   :  { %v3756_v43 = vadd.f32 1.0, %v5014_v10 }
0x2a8f   :  { %5015 = vrcp.f32 %v3756_v43 }
0x2a99   :  { %v5016_v20 = vpop.eup %5015 }
0x2a9a   :  { %v3760_v37 = vmul.f32 %v5016_v20, %v3670_v2  ;;  %v4065_v2 = vld [vmem:[%s6402_s13 + $0x8] sm:$0xff] }
0x2afd   :  { %v3763_v14 = vpop.permute.xlu1 %3762 }
0x2afe   :  { %v3765_v58 = vmul.f32 %v5016_v20, %v3763_v14 }
0x2b00   :  { %3767 = vrot.lane.b32.xlu0 %v3765_v58, %s5146_s29 }
0x2b72   :  { %v3768_v41 = vpop.permute.xlu0 %3767 }
0x2b73   :  { %v3770_v17 = vadd.f32 %v3768_v41, %v3760_v37 }
0x2b75   :  { %5017 = vtanh.f32 %v3770_v17 }
0x2b7f   :  { %v5018_v55 = vpop.eup %5017 }
0x2b80   :  { %3773 = vrot.lane.b32.xlu1 %v5018_v55, %s5145_s9 }
0x2bf2   :  { %v3774_v60 = vpop.permute.xlu1 %3773 }
0x2bf3   :  { %v3776_v56 = vmul.f32 %v5016_v20, %v3774_v60 }
0x2bf5   :  { %3778 = vrot.lane.b32.xlu0 %v3776_v56, %s5146_s29 }
0x2c67   :  { %v3779_v46 = vpop.permute.xlu0 %3778 }
0x2c68   :  { %4545 = vmatmul.mubr.msk.f32.vlgmr.msra.gmra.mrb[28].mxu0 %vm2378_vm2, %v3779_v46 }
0x2c69   :  { %4566 = vmatprep.mubr.msk.f32.mxu0 %vm5111_vm14, %v5112_v18 }
0x2d3b   :  { %v3848_v33 = vpop.f32.mrb[28].mxu0 }
0x2d3c   :  { %v3852_v63 = vadd.f32 %v3848_v33, %v6181_v13  ;;  %v4546_v45 = vpop.f32.mrb[29].mxu0 }
0x2d3e   :  { %5019 = vtanh.f32 %v3852_v63  ;;  %v4209_v30 = vmul.f32 -1.442695, %v3852_v63 }
0x2d40   :  { %5021 = vpow2.f32 %v4209_v30 }
0x2d48   :  { %v5020_v54 = vpop.eup %5019 }
0x2d49   :  { %3862 = vrot.lane.b32.xlu1 %v5020_v54, %s5145_s9 }
0x2d4a   :  { %v5022_v49 = vpop.eup %5021 }
0x2d4b   :  { %v3856_v9 = vadd.f32 1.0, %v5022_v49 }
0x2d4d   :  { %5023 = vrcp.f32 %v3856_v9 }
0x2d57   :  { %v5024_v24 = vpop.eup %5023 }
0x2d58   :  { %v3860_v4 = vmul.f32 %v5024_v24, %v3770_v17 }
0x2dbb   :  { %v3863_v39 = vpop.permute.xlu1 %3862 }
0x2dbc   :  { %v3865_v40 = vmul.f32 %v5024_v24, %v3863_v39 }
0x2dbe   :  { %3867 = vrot.lane.b32.xlu0 %v3865_v40, %s5146_s29 }
0x2e30   :  { %v3868_v32 = vpop.permute.xlu0 %3867 }
0x2e31   :  { %v3870_v25 = vadd.f32 %v3868_v32, %v3860_v4 }
0x2e33   :  { %5025 = vtanh.f32 %v3870_v25 }
0x2e3d   :  { %v5026_v13 = vpop.eup %5025 }
0x2e3e   :  { %3873 = vrot.lane.b32.xlu1 %v5026_v13, %s5145_s9 }
0x2eb0   :  { %v3874_v34 = vpop.permute.xlu1 %3873 }
0x2eb1   :  { %v3876_v52 = vmul.f32 %v5024_v24, %v3874_v34 }
0x2eb3   :  { %3878 = vrot.lane.b32.xlu0 %v3876_v52, %s5146_s29 }
0x2f25   :  { %v3879_v22 = vpop.permute.xlu0 %3878 }
0x2f26   :  { %4556 = vmatmul.mubr.msk.f32.vlgmr.msra.gmra.mrb[38].mxu1 %vm2378_vm2, %v3879_v22 }
0x2f27   :  { %4573 = vmatprep.mubr.msk.f32.mxu1 %vm5111_vm14, %v5112_v18 }
0x2ff9   :  { %v3948_v28 = vpop.f32.mrb[38].mxu1 }
0x2ffa   :  { %v3952_v51 = vadd.f32 %v3948_v28, %v6184_v15  ;;  %v4557_v36 = vpop.f32.mrb[39].mxu1  ;;  %v3977_v15 = vld [vmem:[%s6400_s11] sm:$0xff] }
0x2ffb   :  { %v4757_v44 = vpack.c.bf16 %v3978_v21, %v3977_v15 }
0x2ffc   :  { %5027 = vtanh.f32 %v3952_v51  ;;  %v4211_v48 = vmul.f32 -1.442695, %v3952_v51 }
0x2ffd   :  { %4758 = vmatpush3.bf16.msra.mxu0 %v4757_v44 }
0x2ffe   :  { %5029 = vpow2.f32 %v4211_v48  ;;  %4759 = vmatprep.subr.bf16.mxu0 %v5109_v3  ;;  %v4763_v3 = vpack.c.bf16 %v4065_v2, %v4064_v19 }
0x3000   :  { %4764 = vmatpush3.bf16.msra.mxu1 %v4763_v3 }
0x3001   :  { %4761 = vmatpush3.bf16.msra.mxu0 %v4760_v57 }
0x3006   :  { %v5028_v61 = vpop.eup %5027 }
0x3007   :  { %3962 = vrot.lane.b32.xlu1 %v5028_v61, %s5145_s9 }
0x3008   :  { %v5030_v7 = vpop.eup %5029 }
0x3009   :  { %v3956_v11 = vadd.f32 1.0, %v5030_v7 }
0x300b   :  { %5031 = vrcp.f32 %v3956_v11 }
0x3015   :  { %v5032_v31 = vpop.eup %5031 }
0x3016   :  { %v3960_v23 = vmul.f32 %v5032_v31, %v3870_v25 }
0x3079   :  { %v3963_v1 = vpop.permute.xlu1 %3962 }
0x307a   :  { %v3965_v6 = vmul.f32 %v5032_v31, %v3963_v1 }
0x307c   :  { %3967 = vrot.lane.b32.xlu0 %v3965_v6, %s5146_s29 }
0x30ee   :  { %v3968_v18 = vpop.permute.xlu0 %3967 }
0x30ef   :  { %v3970_v8 = vadd.f32 %v3968_v18, %v3960_v23 }
0x30f1   :  { %5033 = vtanh.f32 %v3970_v8 }
0x30fb   :  { %v5034_v35 = vpop.eup %5033 }
0x30fc   :  { %3973 = vrot.lane.b32.xlu1 %v5034_v35, %s5145_s9 }
0x316e   :  { %v3974_v62 = vpop.permute.xlu1 %3973 }
0x316f   :  { %v3976_v50 = vmul.f32 %v5032_v31, %v3974_v62 }
0x3171   :  { %3989 = vrot.lane.b32.xlu0 %v3976_v50, %s5146_s29 }
0x31e3   :  { %v3990_v26 = vpop.permute.xlu0 %3989 }
0x31e4   :  { %4567 = vmatmul.mubr.msk.f32.vlgmr.msra.gmra.mrb[30].mxu0 %vm2378_vm2, %v3990_v26 }
0x32b7   :  { %v4059_v0 = vpop.f32.mrb[30].mxu0 }
0x32b8   :  { %v4060_v38 = vadd.f32 %v4212_v5, %v4059_v0  ;;  %v4568_v42 = vpop.f32.mrb[31].mxu0 }
0x32ba   :  { %v4063_v59 = vmax.f32 %v4060_v38, 0.0 }
0x32bc   :  { %4574 = vmatmul.mubr.msk.f32.vlgmr.msra.gmra.mrb[40].mxu1 %vm1443_vm1, %v4063_v59 }
0x338f   :  { %v4142_v27 = vpop.f32.mrb[40].mxu1 }
0x3390   :  { %v4143_v12 = vadd.f32 %v4214_v47, %v4142_v27  ;;  %v4575_v53 = vpop.f32.mrb[41].mxu1 }
0x3392   :  { %v4216_v10 = vmul.f32 -1.442695, %v4143_v12 }
0x3394   :  { %5035 = vpow2.f32 %v4216_v10 }
0x339e   :  { %v5036_v43 = vpop.eup %5035 }
0x339f   :  { %v4149_v20 = vadd.f32 1.0, %v5036_v43 }
0x33a1   :  { %5037 = vrcp.f32 %v4149_v20 }
0x33ab   :  { %v5038_v14 = vpop.eup %5037 }
0x33ac   :  { %4153 = vst.msk [vmem:[%s6404_s15] sm:$0x3] %vm4152_vm3, %v5038_v14 }
0x33ad   :  { %4158 = vsyncpa [#allocation4], 1 }
0x33ae   :  { %4159 = vsyncpa [#allocation6], 1 }

</bundles_post_ra>
